<compile_context>
chip_gen: v7x
topology: tpu7x:2x2x1
jax: 0.10.0
libtpu: 0.0.40
codegen_flags: <defaults>
</compile_context>

<pallas_src>
import jax
import jax.numpy as jnp
from jax import lax
from jax.experimental import pallas as pl
from jax.experimental.pallas import tpu as pltpu

ACTION_DIM = 7       # len(action_vocab)
NUM_CLASSES = 2
HIDDEN = 128
FEAT = 64
FRAME_BLOCK = 8      # frames per CNN grid step (sublane dim of activations)
CPAD = 128           # intermediate channel dims padded to one full lane tile

VMEM_SPEC = pl.BlockSpec(memory_space=pltpu.MemorySpace.VMEM)


# ----------------------------- Pallas kernels ------------------------------

def _conv3x3_relu_row(xpad_ref, w_ref, b, row):
    """One conv output row: ReLU(sum over 9 taps of shifted-window @ w_tap + b).

    xpad_ref: (Hs+2, Ws+2, FB, Cin) zero-padded activation ref; `row` may be a
    traced index.  Returns a (Ws*FB, Cout) f32 strip (fits the vreg file, so
    the 9-tap accumulation never writes back to VMEM).
    """
    Hp, Wp, FB, Cin = xpad_ref.shape
    Ws = Wp - 2
    Cout = w_ref.shape[2]
    acc = jnp.zeros((Ws * FB, Cout), jnp.float32)
    for dh in range(3):                                   # in-kernel im2col:
        for dw in range(3):                               # 9 shifted matmuls
            win = xpad_ref[pl.ds(row + dh, 1), dw:dw + Ws, :, :]   # (1,Ws,FB,Cin)
            lhs = win.reshape(Ws * FB, Cin).astype(w_ref.dtype)
            acc = acc + jnp.dot(lhs, w_ref[dh * 3 + dw],
                                preferred_element_type=jnp.float32)
    return jnp.maximum(acc + b, 0.0)                      # bias + ReLU (f32)


def _conv_pool_layer(xpad_ref, w_ref, b_ref, out_ref):
    """3x3 conv + ReLU + fused 2x2 maxpool, written into the interior of the
    zero-bordered padded scratch `out_ref` (which feeds the next conv)."""
    Hp, Wp, FB, _ = xpad_ref.shape
    Hs, Ws = Hp - 2, Wp - 2
    Cout = w_ref.shape[2]
    Hq, Wq = out_ref.shape[0], out_ref.shape[1]
    zdt = out_ref.dtype
    b = b_ref[...]

    # Zero only the 1-pixel border (interior is fully overwritten below).  Done
    # every grid step so it stays correct if the "parallel" axis is sharded
    # across TensorCores (scratch is per-core); cost is a few strided stores.
    out_ref[0:1, :, :, :] = jnp.zeros((1, Wq, FB, Cout), zdt)
    out_ref[Hq - 1:Hq, :, :, :] = jnp.zeros((1, Wq, FB, Cout), zdt)
    out_ref[:, 0:1, :, :] = jnp.zeros((Hq, 1, FB, Cout), zdt)
    out_ref[:, Wq - 1:Wq, :, :] = jnp.zeros((Hq, 1, FB, Cout), zdt)

    def width_pool(strip):                                 # (Ws*FB,C)->(Ws//2,FB,C)
        y = strip.reshape(Ws // 2, 2, FB, Cout)
        return jnp.maximum(y[:, 0], y[:, 1])

    def pool_row(r, carry):
        top = width_pool(_conv3x3_relu_row(xpad_ref, w_ref, b, 2 * r))
        bot = width_pool(_conv3x3_relu_row(xpad_ref, w_ref, b, 2 * r + 1))
        y = jnp.maximum(top, bot)                          # fused 2x2 maxpool
        out_ref[pl.ds(r + 1, 1), 1:Wq - 1, :, :] = (
            y.reshape(1, Ws // 2, FB, Cout).astype(zdt))   # bf16 store, once
        return carry

    lax.fori_loop(0, Hs // 2, pool_row, 0)


def _conv3x3_gap(xpad_ref, w_ref, b_ref):
    """3x3 conv + ReLU + global average pool -> (FB, Cout) f32 features.
    The conv3 output map is never materialized (running row sum)."""
    Hp, Wp, FB, _ = xpad_ref.shape
    Hs, Ws = Hp - 2, Wp - 2
    Cout = w_ref.shape[2]
    b = b_ref[...]

    def row_sum(h, total):
        row = _conv3x3_relu_row(xpad_ref, w_ref, b, h)     # (Ws*FB, Cout)
        return total + jnp.sum(row.reshape(Ws, FB, Cout), axis=0)

    total = lax.fori_loop(0, Hs, row_sum, jnp.zeros((FB, Cout), jnp.float32))
    return total * (1.0 / (Hs * Ws))


def _cnn_encoder_kernel(xp_ref, w1_ref, b1_ref, w2_ref, b2_ref, w3_ref, b3_ref,
                        wih_ref, blstm_ref, gx_ref, pad2_ref, pad3_ref):
    """Fused CNN encoder + hoisted LSTM input projection for 8 frames.
    Activation layout: (H, W, frames, channels) — frames on sublanes,
    channels on lanes; every intermediate stays in VMEM (bf16 scratch)."""
    _conv_pool_layer(xp_ref, w1_ref, b1_ref, pad2_ref)     # conv1+ReLU+pool
    _conv_pool_layer(pad2_ref, w2_ref, b2_ref, pad3_ref)   # conv2+ReLU+pool
    feats = _conv3x3_gap(pad3_ref, w3_ref, b3_ref)         # conv3+ReLU+GAP

    # Hoisted LSTM input projection + combined bias (b_ih + b_hh): the
    # recurrent kernel then only needs one h @ W_hh matmul per time step.
    gx_ref[...] = (jnp.dot(feats.astype(jnp.bfloat16), wih_ref[...],
                           preferred_element_type=jnp.float32)
                   + blstm_ref[...])


def _lstm_fc_kernel(gx_ref, whh_ref, act_ref, wfh_ref, wfa_ref, bfc_ref, o_ref):
    """LSTM recurrence over precomputed input gates + fused concat/FC head.
    Kept entirely in f32 (tiny matmuls; avoids compounding bf16 drift)."""
    T, Bp, _ = gx_ref.shape
    Hd = whh_ref.shape[0]
    whh = whh_ref[...]                                     # (H, 4H), hoisted
    h = jnp.zeros((Bp, Hd), jnp.float32)
    c = jnp.zeros((Bp, Hd), jnp.float32)
    for t in range(T):                        # short fixed T -> fully unrolled
        gates = gx_ref[t] + jnp.dot(h, whh, preferred_element_type=jnp.float32)
        i = jax.nn.sigmoid(gates[:, 0 * Hd:1 * Hd])        # PyTorch gate order:
        f = jax.nn.sigmoid(gates[:, 1 * Hd:2 * Hd])        # i, f, g, o
        g = jnp.tanh(gates[:, 2 * Hd:3 * Hd])
        o = jax.nn.sigmoid(gates[:, 3 * Hd:4 * Hd])
        c = f * c + i * g
        h = o * jnp.tanh(c)
    # fc(concat([h_T, action_vec])) == h_T @ W[:H] + action_vec @ W[H:] + b
    logits = (jnp.dot(h, wfh_ref[...], preferred_element_type=jnp.float32)
              + jnp.dot(act_ref[...], wfa_ref[...],
                        preferred_element_type=jnp.float32)
              + bfc_ref[...])
    o_ref[...] = logits[:o_ref.shape[0], :]


# ------------------------------ wrappers -----------------------------------

def init_params(seed=0):
    keys = jax.random.split(jax.random.PRNGKey(seed), 12)
    s = 0.05
    return {
        # conv weights: (kh*kw, Cin, Cout) == PyTorch (Cout,Cin,3,3).permute(2,3,1,0)
        "w1": jax.random.normal(keys[0], (9, 3, 16), jnp.float32) * s,
        "b1": jax.random.normal(keys[1], (1, 16), jnp.float32) * s,
        "w2": jax.random.normal(keys[2], (9, 16, 32), jnp.float32) * s,
        "b2": jax.random.normal(keys[3], (1, 32), jnp.float32) * s,
        "w3": jax.random.normal(keys[4], (9, 32, 64), jnp.float32) * s,
        "b3": jax.random.normal(keys[5], (1, 64), jnp.float32) * s,
        # LSTM (PyTorch gate order i,f,g,o), stored transposed: (in, 4H).
        "w_ih": jax.random.normal(keys[6], (FEAT, 4 * HIDDEN), jnp.float32) * s,
        "w_hh": jax.random.normal(keys[7], (HIDDEN, 4 * HIDDEN), jnp.float32) * s,
        # NOTE: any checkpoint import must sum b_ih + b_hh into this one bias.
        "b_lstm": (jax.random.normal(keys[8], (1, 4 * HIDDEN), jnp.float32) * s
                   + jax.random.normal(keys[9], (1, 4 * HIDDEN), jnp.float32) * s),
        # fc: Linear(128 + ACTION_DIM, NUM_CLASSES), stored transposed.
        "w_fc": jax.random.normal(keys[10], (HIDDEN + ACTION_DIM, NUM_CLASSES),
                                  jnp.float32) * s,
        "b_fc": jax.random.normal(keys[11], (1, NUM_CLASSES), jnp.float32) * s,
    }


def drowsiness_cnn_lstm_forward(x, action_vec, params):
    """x: (B, T, 3, H, W) float32 frames (PyTorch layout); action_vec: (B, 7)."""
    B, T, C, H, W = x.shape
    assert C == 3
    assert H % 4 == 0 and W % 4 == 0, "two 2x2 maxpools require H, W % 4 == 0"
    BT = B * T
    BTp = pl.cdiv(BT, FRAME_BLOCK) * FRAME_BLOCK
    Hp, Wp = H + 2, W + 2

    # Frames -> (H, W, frames, channels): frames on sublanes, raw C=3 on lanes
    # (no 3->128 lane pad in HBM), spatially padded for conv1, bf16 for DMA.
    xi = x.reshape(BT, C, H, W).transpose(2, 3, 0, 1)
    xi = jnp.pad(xi, ((1, 1), (1, 1), (0, BTp - BT), (0, 0))).astype(jnp.bfloat16)

    def pad_io(w, cin_to, cout_to):
        return jnp.pad(w, ((0, 0), (0, cin_to - w.shape[1]),
                           (0, cout_to - w.shape[2])))

    def pad_b(b):
        return jnp.pad(b, ((0, 0), (0, CPAD - b.shape[1])))

    # conv1 keeps its raw K=3 contraction in f32 (tiny); conv2/conv3 are padded
    # to one 128-lane K tile and pre-cast to bf16 (halved weight DMA, no
    # per-tap in-kernel casts).
    w1 = pad_io(params["w1"], params["w1"].shape[1], CPAD)                 # (9,3,128) f32
    w2 = pad_io(params["w2"], CPAD, CPAD).astype(jnp.bfloat16)             # (9,128,128)
    w3 = pad_io(params["w3"], CPAD, CPAD).astype(jnp.bfloat16)             # (9,128,128)
    b1, b2, b3 = pad_b(params["b1"]), pad_b(params["b2"]), pad_b(params["b3"])
    w_ih = jnp.pad(params["w_ih"], ((0, CPAD - FEAT), (0, 0))).astype(jnp.bfloat16)

    def full(shape):
        return pl.BlockSpec(shape, lambda i: (0,) * len(shape))

    cnn_flops = (2 * BTp * 9 * (H * W * 3 * 16
                                + (H // 2) * (W // 2) * 16 * 32
                                + (H // 4) * (W // 4) * 32 * 64)
                 + 2 * BTp * FEAT * 4 * HIDDEN)
    cnn_bytes = (Hp * Wp * BTp * 3 * 2
                 + 9 * (3 * CPAD * 4 + 2 * CPAD * CPAD * 2)
                 + CPAD * 4 * HIDDEN * 2 + 3 * CPAD * 4 + 4 * HIDDEN * 4
                 + BTp * 4 * HIDDEN * 4)

    gates_x = pl.pallas_call(
        _cnn_encoder_kernel,
        out_shape=jax.ShapeDtypeStruct((BTp, 4 * HIDDEN), jnp.float32),
        grid=(BTp // FRAME_BLOCK,),
        in_specs=[
            pl.BlockSpec((Hp, Wp, FRAME_BLOCK, C), lambda i: (0, 0, i, 0)),
            full((9, 3, CPAD)), full((1, CPAD)),
            full((9, CPAD, CPAD)), full((1, CPAD)),
            full((9, CPAD, CPAD)), full((1, CPAD)),
            full((CPAD, 4 * HIDDEN)), full((1, 4 * HIDDEN)),
        ],
        out_specs=pl.BlockSpec((FRAME_BLOCK, 4 * HIDDEN), lambda i: (i, 0)),
        scratch_shapes=[
            pltpu.VMEM((H // 2 + 2, W // 2 + 2, FRAME_BLOCK, CPAD), jnp.bfloat16),
            pltpu.VMEM((H // 4 + 2, W // 4 + 2, FRAME_BLOCK, CPAD), jnp.bfloat16),
        ],
        compiler_params=pltpu.CompilerParams(
            dimension_semantics=("parallel",),    # frame blocks are independent
            vmem_limit_bytes=48 * 1024 * 1024),   # v7x-safe (64 MiB/TC)
        cost_estimate=pl.CostEstimate(flops=cnn_flops, transcendentals=0,
                                      bytes_accessed=cnn_bytes),
    )(xi, w1, b1, w2, b2, w3, b3, w_ih, params["b_lstm"])

    # (B*T, 4H) -> time-major (T, Bpad, 4H); pad batch to a full sublane tile.
    # Padded frame rows (BTp > B*T) hold garbage gates and MUST be dropped here.
    Bp = pl.cdiv(B, 8) * 8
    gx_seq = gates_x[:BT].reshape(B, T, 4 * HIDDEN).transpose(1, 0, 2)
    gx_seq = jnp.pad(gx_seq, ((0, 0), (0, Bp - B), (0, 0)))
    act_pad = jnp.pad(action_vec, ((0, Bp - B), (0, 0)))

    lstm_flops = (2 * T * Bp * HIDDEN * 4 * HIDDEN
                  + 2 * Bp * (HIDDEN + ACTION_DIM) * NUM_CLASSES)
    lstm_bytes = 4 * (T * Bp * 4 * HIDDEN + HIDDEN * 4 * HIDDEN
                      + Bp * ACTION_DIM + (HIDDEN + ACTION_DIM) * NUM_CLASSES
                      + NUM_CLASSES + B * NUM_CLASSES)

    logits = pl.pallas_call(
        _lstm_fc_kernel,
        out_shape=jax.ShapeDtypeStruct((B, NUM_CLASSES), jnp.float32),
        in_specs=[VMEM_SPEC] * 6,
        out_specs=VMEM_SPEC,
        cost_estimate=pl.CostEstimate(flops=lstm_flops,
                                      transcendentals=5 * T * Bp * HIDDEN,
                                      bytes_accessed=lstm_bytes),
    )(gx_seq, params["w_hh"], act_pad,
      params["w_fc"][:HIDDEN], params["w_fc"][HIDDEN:], params["b_fc"])
    return logits


if __name__ == "__main__":
    B, T, C, H, W = 2, 4, 3, 16, 16
    key = jax.random.PRNGKey(0)
    kx, ka = jax.random.split(key)
    x = jax.random.normal(kx, (B, T, C, H, W), jnp.float32)
    action_vec = jax.random.normal(ka, (B, ACTION_DIM), jnp.float32)

    params = init_params(seed=0)

    fwd = jax.jit(drowsiness_cnn_lstm_forward)
    out = jax.block_until_ready(fwd(x, action_vec, params))
    assert out.shape == (B, NUM_CLASSES), out.shape
    print("KERNEL_OK")
</pallas_src>

<mosaic_0001>
module attributes {stable_mosaic.version = 11 : i64} {
  func.func @_cnn_encoder_kernel(%arg0: i32, %arg1: memref<18x18x8x3xbf16, #tpu.memory_space<vmem>>, %arg2: memref<9x3x128xf32, #tpu.memory_space<vmem>>, %arg3: memref<1x128xf32, #tpu.memory_space<vmem>>, %arg4: memref<9x128x128xbf16, #tpu.memory_space<vmem>>, %arg5: memref<1x128xf32, #tpu.memory_space<vmem>>, %arg6: memref<9x128x128xbf16, #tpu.memory_space<vmem>>, %arg7: memref<1x128xf32, #tpu.memory_space<vmem>>, %arg8: memref<128x512xbf16, #tpu.memory_space<vmem>>, %arg9: memref<1x512xf32, #tpu.memory_space<vmem>>, %arg10: memref<8x512xf32, #tpu.memory_space<vmem>>, %arg11: memref<10x10x8x128xbf16, #tpu.memory_space<vmem>>, %arg12: memref<6x6x8x128xbf16, #tpu.memory_space<vmem>>) attributes {dimension_semantics = [#tpu.dimension_semantics<parallel>], iteration_bounds = array<i64: 1>, scalar_prefetch = 0 : i64, scratch_operands = 2 : i64, tpu.core_type = #tpu.core_type<tc>, window_params = [{transform_indices = @transform_0, window_bounds = array<i64: 18, 18, 8, 3>}, {pipeline_mode = #tpu.pipeline_mode<synchronous>, transform_indices = @transform_1, window_bounds = array<i64: 9, 3, 128>}, {pipeline_mode = #tpu.pipeline_mode<synchronous>, transform_indices = @transform_2, window_bounds = array<i64: 1, 128>}, {pipeline_mode = #tpu.pipeline_mode<synchronous>, transform_indices = @transform_3, window_bounds = array<i64: 9, 128, 128>}, {pipeline_mode = #tpu.pipeline_mode<synchronous>, transform_indices = @transform_4, window_bounds = array<i64: 1, 128>}, {pipeline_mode = #tpu.pipeline_mode<synchronous>, transform_indices = @transform_5, window_bounds = array<i64: 9, 128, 128>}, {pipeline_mode = #tpu.pipeline_mode<synchronous>, transform_indices = @transform_6, window_bounds = array<i64: 1, 128>}, {pipeline_mode = #tpu.pipeline_mode<synchronous>, transform_indices = @transform_7, window_bounds = array<i64: 128, 512>}, {pipeline_mode = #tpu.pipeline_mode<synchronous>, transform_indices = @transform_8, window_bounds = array<i64: 1, 512>}, {transform_indices = @transform_9, window_bounds = array<i64: 8, 512>}]} {
    %c0 = arith.constant 0 : index
    %c0_0 = arith.constant 0 : index
    %0 = vector.load %arg3[%c0, %c0_0] : memref<1x128xf32, #tpu.memory_space<vmem>>, vector<1x128xf32>
    %cst = arith.constant 0.000000e+00 : bf16
    %1 = vector.broadcast %cst : bf16 to vector<1x10x8x128xbf16>
    %c0_1 = arith.constant 0 : index
    %c0_2 = arith.constant 0 : index
    %c0_3 = arith.constant 0 : index
    %c0_4 = arith.constant 0 : index
    %2 = vector.load %arg11[%c0_1, %c0_2, %c0_3, %c0_4] : memref<10x10x8x128xbf16, #tpu.memory_space<vmem>>, vector<1x10x8x128xbf16>
    tpu.vector_store %arg11[%c0_1, %c0_2, %c0_3, %c0_4], %1 {strides = array<i32>} : memref<10x10x8x128xbf16, #tpu.memory_space<vmem>>, vector<1x10x8x128xbf16>,
    %cst_5 = arith.constant 0.000000e+00 : bf16
    %3 = vector.broadcast %cst_5 : bf16 to vector<1x10x8x128xbf16>
    %c9 = arith.constant 9 : index
    %c0_6 = arith.constant 0 : index
    %c0_7 = arith.constant 0 : index
    %c0_8 = arith.constant 0 : index
    %4 = vector.load %arg11[%c9, %c0_6, %c0_7, %c0_8] : memref<10x10x8x128xbf16, #tpu.memory_space<vmem>>, vector<1x10x8x128xbf16>
    tpu.vector_store %arg11[%c9, %c0_6, %c0_7, %c0_8], %3 {strides = array<i32>} : memref<10x10x8x128xbf16, #tpu.memory_space<vmem>>, vector<1x10x8x128xbf16>,
    %cst_9 = arith.constant 0.000000e+00 : bf16
    %5 = vector.broadcast %cst_9 : bf16 to vector<10x1x8x128xbf16>
    %c0_10 = arith.constant 0 : index
    %c0_11 = arith.constant 0 : index
    %c0_12 = arith.constant 0 : index
    %c0_13 = arith.constant 0 : index
    %6 = vector.load %arg11[%c0_10, %c0_11, %c0_12, %c0_13] : memref<10x10x8x128xbf16, #tpu.memory_space<vmem>>, vector<10x1x8x128xbf16>
    tpu.vector_store %arg11[%c0_10, %c0_11, %c0_12, %c0_13], %5 {strides = array<i32>} : memref<10x10x8x128xbf16, #tpu.memory_space<vmem>>, vector<10x1x8x128xbf16>,
    %cst_14 = arith.constant 0.000000e+00 : bf16
    %7 = vector.broadcast %cst_14 : bf16 to vector<10x1x8x128xbf16>
    %c0_15 = arith.constant 0 : index
    %c9_16 = arith.constant 9 : index
    %c0_17 = arith.constant 0 : index
    %c0_18 = arith.constant 0 : index
    %8 = vector.load %arg11[%c0_15, %c9_16, %c0_17, %c0_18] : memref<10x10x8x128xbf16, #tpu.memory_space<vmem>>, vector<10x1x8x128xbf16>
    tpu.vector_store %arg11[%c0_15, %c9_16, %c0_17, %c0_18], %7 {strides = array<i32>} : memref<10x10x8x128xbf16, #tpu.memory_space<vmem>>, vector<10x1x8x128xbf16>,
    %c0_i32 = arith.constant 0 : i32
    %c8_i32 = arith.constant 8 : i32
    %9 = arith.addi %c0_i32, %c8_i32 : i32
    %c1_i32 = arith.constant 1 : i32
    scf.for %arg13 = %c0_i32 to %9 step %c1_i32  : i32 {
      %c2_i32 = arith.constant 2 : i32
      %33 = arith.muli %c2_i32, %arg13 : i32
      %cst_59 = arith.constant 0.000000e+00 : f32
      %34 = vector.broadcast %cst_59 : f32 to vector<128x128xf32>
      %c0_i32_60 = arith.constant 0 : i32
      %35 = arith.addi %33, %c0_i32_60 : i32
      %36 = arith.index_cast %35 : i32 to index
      %c0_61 = arith.constant 0 : index
      %c0_62 = arith.constant 0 : index
      %c0_63 = arith.constant 0 : index
      %37 = vector.load %arg1[%36, %c0_61, %c0_62, %c0_63] : memref<18x18x8x3xbf16, #tpu.memory_space<vmem>>, vector<1x16x8x3xbf16>
      %38 = vector.shape_cast %37 : vector<1x16x8x3xbf16> to vector<128x3xbf16>
      %39 = arith.extf %38 : vector<128x3xbf16> to vector<128x3xf32>
      %c0_64 = arith.constant 0 : index
      %c0_65 = arith.constant 0 : index
      %c0_66 = arith.constant 0 : index
      %40 = vector.load %arg2[%c0_64, %c0_65, %c0_66] : memref<9x3x128xf32, #tpu.memory_space<vmem>>, vector<1x3x128xf32>
      %41 = vector.shape_cast %40 : vector<1x3x128xf32> to vector<3x128xf32>
      %cst_67 = arith.constant dense<0.000000e+00> : vector<128x128xf32>
      %42 = tpu.matmul %39, %41, %cst_67 {dimension_numbers = #tpu.dot_dimension_numbers<[1], [0], [0], [1], [0, 0, 1, 1], [], []>} : vector<128x3xf32>, vector<3x128xf32>, vector<128x128xf32> -> vector<128x128xf32>
      %43 = arith.addf %34, %42 : vector<128x128xf32>
      %c0_i32_68 = arith.constant 0 : i32
      %44 = arith.addi %33, %c0_i32_68 : i32
      %45 = arith.index_cast %44 : i32 to index
      %c1 = arith.constant 1 : index
      %c0_69 = arith.constant 0 : index
      %c0_70 = arith.constant 0 : index
      %46 = vector.load %arg1[%45, %c1, %c0_69, %c0_70] : memref<18x18x8x3xbf16, #tpu.memory_space<vmem>>, vector<1x16x8x3xbf16>
      %47 = vector.shape_cast %46 : vector<1x16x8x3xbf16> to vector<128x3xbf16>
      %48 = arith.extf %47 : vector<128x3xbf16> to vector<128x3xf32>
      %c1_71 = arith.constant 1 : index
      %c0_72 = arith.constant 0 : index
      %c0_73 = arith.constant 0 : index
      %49 = vector.load %arg2[%c1_71, %c0_72, %c0_73] : memref<9x3x128xf32, #tpu.memory_space<vmem>>, vector<1x3x128xf32>
      %50 = vector.shape_cast %49 : vector<1x3x128xf32> to vector<3x128xf32>
      %cst_74 = arith.constant dense<0.000000e+00> : vector<128x128xf32>
      %51 = tpu.matmul %48, %50, %cst_74 {dimension_numbers = #tpu.dot_dimension_numbers<[1], [0], [0], [1], [0, 0, 1, 1], [], []>} : vector<128x3xf32>, vector<3x128xf32>, vector<128x128xf32> -> vector<128x128xf32>
      %52 = arith.addf %43, %51 : vector<128x128xf32>
      %c0_i32_75 = arith.constant 0 : i32
      %53 = arith.addi %33, %c0_i32_75 : i32
      %54 = arith.index_cast %53 : i32 to index
      %c2 = arith.constant 2 : index
      %c0_76 = arith.constant 0 : index
      %c0_77 = arith.constant 0 : index
      %55 = vector.load %arg1[%54, %c2, %c0_76, %c0_77] : memref<18x18x8x3xbf16, #tpu.memory_space<vmem>>, vector<1x16x8x3xbf16>
      %56 = vector.shape_cast %55 : vector<1x16x8x3xbf16> to vector<128x3xbf16>
      %57 = arith.extf %56 : vector<128x3xbf16> to vector<128x3xf32>
      %c2_78 = arith.constant 2 : index
      %c0_79 = arith.constant 0 : index
      %c0_80 = arith.constant 0 : index
      %58 = vector.load %arg2[%c2_78, %c0_79, %c0_80] : memref<9x3x128xf32, #tpu.memory_space<vmem>>, vector<1x3x128xf32>
      %59 = vector.shape_cast %58 : vector<1x3x128xf32> to vector<3x128xf32>
      %cst_81 = arith.constant dense<0.000000e+00> : vector<128x128xf32>
      %60 = tpu.matmul %57, %59, %cst_81 {dimension_numbers = #tpu.dot_dimension_numbers<[1], [0], [0], [1], [0, 0, 1, 1], [], []>} : vector<128x3xf32>, vector<3x128xf32>, vector<128x128xf32> -> vector<128x128xf32>
      %61 = arith.addf %52, %60 : vector<128x128xf32>
      %c1_i32_82 = arith.constant 1 : i32
      %62 = arith.addi %33, %c1_i32_82 : i32
      %63 = arith.index_cast %62 : i32 to index
      %c0_83 = arith.constant 0 : index
      %c0_84 = arith.constant 0 : index
      %c0_85 = arith.constant 0 : index
      %64 = vector.load %arg1[%63, %c0_83, %c0_84, %c0_85] : memref<18x18x8x3xbf16, #tpu.memory_space<vmem>>, vector<1x16x8x3xbf16>
      %65 = vector.shape_cast %64 : vector<1x16x8x3xbf16> to vector<128x3xbf16>
      %66 = arith.extf %65 : vector<128x3xbf16> to vector<128x3xf32>
      %c3 = arith.constant 3 : index
      %c0_86 = arith.constant 0 : index
      %c0_87 = arith.constant 0 : index
      %67 = vector.load %arg2[%c3, %c0_86, %c0_87] : memref<9x3x128xf32, #tpu.memory_space<vmem>>, vector<1x3x128xf32>
      %68 = vector.shape_cast %67 : vector<1x3x128xf32> to vector<3x128xf32>
      %cst_88 = arith.constant dense<0.000000e+00> : vector<128x128xf32>
      %69 = tpu.matmul %66, %68, %cst_88 {dimension_numbers = #tpu.dot_dimension_numbers<[1], [0], [0], [1], [0, 0, 1, 1], [], []>} : vector<128x3xf32>, vector<3x128xf32>, vector<128x128xf32> -> vector<128x128xf32>
      %70 = arith.addf %61, %69 : vector<128x128xf32>
      %c1_i32_89 = arith.constant 1 : i32
      %71 = arith.addi %33, %c1_i32_89 : i32
      %72 = arith.index_cast %71 : i32 to index
      %c1_90 = arith.constant 1 : index
      %c0_91 = arith.constant 0 : index
      %c0_92 = arith.constant 0 : index
      %73 = vector.load %arg1[%72, %c1_90, %c0_91, %c0_92] : memref<18x18x8x3xbf16, #tpu.memory_space<vmem>>, vector<1x16x8x3xbf16>
      %74 = vector.shape_cast %73 : vector<1x16x8x3xbf16> to vector<128x3xbf16>
      %75 = arith.extf %74 : vector<128x3xbf16> to vector<128x3xf32>
      %c4 = arith.constant 4 : index
      %c0_93 = arith.constant 0 : index
      %c0_94 = arith.constant 0 : index
      %76 = vector.load %arg2[%c4, %c0_93, %c0_94] : memref<9x3x128xf32, #tpu.memory_space<vmem>>, vector<1x3x128xf32>
      %77 = vector.shape_cast %76 : vector<1x3x128xf32> to vector<3x128xf32>
      %cst_95 = arith.constant dense<0.000000e+00> : vector<128x128xf32>
      %78 = tpu.matmul %75, %77, %cst_95 {dimension_numbers = #tpu.dot_dimension_numbers<[1], [0], [0], [1], [0, 0, 1, 1], [], []>} : vector<128x3xf32>, vector<3x128xf32>, vector<128x128xf32> -> vector<128x128xf32>
      %79 = arith.addf %70, %78 : vector<128x128xf32>
      %c1_i32_96 = arith.constant 1 : i32
      %80 = arith.addi %33, %c1_i32_96 : i32
      %81 = arith.index_cast %80 : i32 to index
      %c2_97 = arith.constant 2 : index
      %c0_98 = arith.constant 0 : index
      %c0_99 = arith.constant 0 : index
      %82 = vector.load %arg1[%81, %c2_97, %c0_98, %c0_99] : memref<18x18x8x3xbf16, #tpu.memory_space<vmem>>, vector<1x16x8x3xbf16>
      %83 = vector.shape_cast %82 : vector<1x16x8x3xbf16> to vector<128x3xbf16>
      %84 = arith.extf %83 : vector<128x3xbf16> to vector<128x3xf32>
      %c5_100 = arith.constant 5 : index
      %c0_101 = arith.constant 0 : index
      %c0_102 = arith.constant 0 : index
      %85 = vector.load %arg2[%c5_100, %c0_101, %c0_102] : memref<9x3x128xf32, #tpu.memory_space<vmem>>, vector<1x3x128xf32>
      %86 = vector.shape_cast %85 : vector<1x3x128xf32> to vector<3x128xf32>
      %cst_103 = arith.constant dense<0.000000e+00> : vector<128x128xf32>
      %87 = tpu.matmul %84, %86, %cst_103 {dimension_numbers = #tpu.dot_dimension_numbers<[1], [0], [0], [1], [0, 0, 1, 1], [], []>} : vector<128x3xf32>, vector<3x128xf32>, vector<128x128xf32> -> vector<128x128xf32>
      %88 = arith.addf %79, %87 : vector<128x128xf32>
      %c2_i32_104 = arith.constant 2 : i32
      %89 = arith.addi %33, %c2_i32_104 : i32
      %90 = arith.index_cast %89 : i32 to index
      %c0_105 = arith.constant 0 : index
      %c0_106 = arith.constant 0 : index
      %c0_107 = arith.constant 0 : index
      %91 = vector.load %arg1[%90, %c0_105, %c0_106, %c0_107] : memref<18x18x8x3xbf16, #tpu.memory_space<vmem>>, vector<1x16x8x3xbf16>
      %92 = vector.shape_cast %91 : vector<1x16x8x3xbf16> to vector<128x3xbf16>
      %93 = arith.extf %92 : vector<128x3xbf16> to vector<128x3xf32>
      %c6 = arith.constant 6 : index
      %c0_108 = arith.constant 0 : index
      %c0_109 = arith.constant 0 : index
      %94 = vector.load %arg2[%c6, %c0_108, %c0_109] : memref<9x3x128xf32, #tpu.memory_space<vmem>>, vector<1x3x128xf32>
      %95 = vector.shape_cast %94 : vector<1x3x128xf32> to vector<3x128xf32>
      %cst_110 = arith.constant dense<0.000000e+00> : vector<128x128xf32>
      %96 = tpu.matmul %93, %95, %cst_110 {dimension_numbers = #tpu.dot_dimension_numbers<[1], [0], [0], [1], [0, 0, 1, 1], [], []>} : vector<128x3xf32>, vector<3x128xf32>, vector<128x128xf32> -> vector<128x128xf32>
      %97 = arith.addf %88, %96 : vector<128x128xf32>
      %c2_i32_111 = arith.constant 2 : i32
      %98 = arith.addi %33, %c2_i32_111 : i32
      %99 = arith.index_cast %98 : i32 to index
      %c1_112 = arith.constant 1 : index
      %c0_113 = arith.constant 0 : index
      %c0_114 = arith.constant 0 : index
      %100 = vector.load %arg1[%99, %c1_112, %c0_113, %c0_114] : memref<18x18x8x3xbf16, #tpu.memory_space<vmem>>, vector<1x16x8x3xbf16>
      %101 = vector.shape_cast %100 : vector<1x16x8x3xbf16> to vector<128x3xbf16>
      %102 = arith.extf %101 : vector<128x3xbf16> to vector<128x3xf32>
      %c7 = arith.constant 7 : index
      %c0_115 = arith.constant 0 : index
      %c0_116 = arith.constant 0 : index
      %103 = vector.load %arg2[%c7, %c0_115, %c0_116] : memref<9x3x128xf32, #tpu.memory_space<vmem>>, vector<1x3x128xf32>
      %104 = vector.shape_cast %103 : vector<1x3x128xf32> to vector<3x128xf32>
      %cst_117 = arith.constant dense<0.000000e+00> : vector<128x128xf32>
      %105 = tpu.matmul %102, %104, %cst_117 {dimension_numbers = #tpu.dot_dimension_numbers<[1], [0], [0], [1], [0, 0, 1, 1], [], []>} : vector<128x3xf32>, vector<3x128xf32>, vector<128x128xf32> -> vector<128x128xf32>
      %106 = arith.addf %97, %105 : vector<128x128xf32>
      %c2_i32_118 = arith.constant 2 : i32
      %107 = arith.addi %33, %c2_i32_118 : i32
      %108 = arith.index_cast %107 : i32 to index
      %c2_119 = arith.constant 2 : index
      %c0_120 = arith.constant 0 : index
      %c0_121 = arith.constant 0 : index
      %109 = vector.load %arg1[%108, %c2_119, %c0_120, %c0_121] : memref<18x18x8x3xbf16, #tpu.memory_space<vmem>>, vector<1x16x8x3xbf16>
      %110 = vector.shape_cast %109 : vector<1x16x8x3xbf16> to vector<128x3xbf16>
      %111 = arith.extf %110 : vector<128x3xbf16> to vector<128x3xf32>
      %c8 = arith.constant 8 : index
      %c0_122 = arith.constant 0 : index
      %c0_123 = arith.constant 0 : index
      %112 = vector.load %arg2[%c8, %c0_122, %c0_123] : memref<9x3x128xf32, #tpu.memory_space<vmem>>, vector<1x3x128xf32>
      %113 = vector.shape_cast %112 : vector<1x3x128xf32> to vector<3x128xf32>
      %cst_124 = arith.constant dense<0.000000e+00> : vector<128x128xf32>
      %114 = tpu.matmul %111, %113, %cst_124 {dimension_numbers = #tpu.dot_dimension_numbers<[1], [0], [0], [1], [0, 0, 1, 1], [], []>} : vector<128x3xf32>, vector<3x128xf32>, vector<128x128xf32> -> vector<128x128xf32>
      %115 = arith.addf %106, %114 : vector<128x128xf32>
      %116 = vector.broadcast %0 : vector<1x128xf32> to vector<128x128xf32>
      %117 = arith.addf %115, %116 : vector<128x128xf32>
      %cst_125 = arith.constant 0.000000e+00 : f32
      %118 = vector.broadcast %cst_125 : f32 to vector<128x128xf32>
      %119 = arith.maximumf %117, %118 : vector<128x128xf32>
      %120 = vector.shape_cast %119 : vector<128x128xf32> to vector<8x2x8x128xf32>
      %121 = vector.extract_strided_slice %120 {offsets = [0, 0, 0, 0], sizes = [8, 1, 8, 128], strides = [1, 1, 1, 1]} : vector<8x2x8x128xf32> to vector<8x1x8x128xf32>
      %122 = vector.shape_cast %121 : vector<8x1x8x128xf32> to vector<8x8x128xf32>
      %123 = vector.extract_strided_slice %120 {offsets = [0, 1, 0, 0], sizes = [8, 1, 8, 128], strides = [1, 1, 1, 1]} : vector<8x2x8x128xf32> to vector<8x1x8x128xf32>
      %124 = vector.shape_cast %123 : vector<8x1x8x128xf32> to vector<8x8x128xf32>
      %125 = arith.maximumf %122, %124 : vector<8x8x128xf32>
      %c2_i32_126 = arith.constant 2 : i32
      %126 = arith.muli %c2_i32_126, %arg13 : i32
      %c1_i32_127 = arith.constant 1 : i32
      %127 = arith.addi %126, %c1_i32_127 : i32
      %cst_128 = arith.constant 0.000000e+00 : f32
      %128 = vector.broadcast %cst_128 : f32 to vector<128x128xf32>
      %c0_i32_129 = arith.constant 0 : i32
      %129 = arith.addi %127, %c0_i32_129 : i32
      %130 = arith.index_cast %129 : i32 to index
      %c0_130 = arith.constant 0 : index
      %c0_131 = arith.constant 0 : index
      %c0_132 = arith.constant 0 : index
      %131 = vector.load %arg1[%130, %c0_130, %c0_131, %c0_132] : memref<18x18x8x3xbf16, #tpu.memory_space<vmem>>, vector<1x16x8x3xbf16>
      %132 = vector.shape_cast %131 : vector<1x16x8x3xbf16> to vector<128x3xbf16>
      %133 = arith.extf %132 : vector<128x3xbf16> to vector<128x3xf32>
      %c0_133 = arith.constant 0 : index
      %c0_134 = arith.constant 0 : index
      %c0_135 = arith.constant 0 : index
      %134 = vector.load %arg2[%c0_133, %c0_134, %c0_135] : memref<9x3x128xf32, #tpu.memory_space<vmem>>, vector<1x3x128xf32>
      %135 = vector.shape_cast %134 : vector<1x3x128xf32> to vector<3x128xf32>
      %cst_136 = arith.constant dense<0.000000e+00> : vector<128x128xf32>
      %136 = tpu.matmul %133, %135, %cst_136 {dimension_numbers = #tpu.dot_dimension_numbers<[1], [0], [0], [1], [0, 0, 1, 1], [], []>} : vector<128x3xf32>, vector<3x128xf32>, vector<128x128xf32> -> vector<128x128xf32>
      %137 = arith.addf %128, %136 : vector<128x128xf32>
      %c0_i32_137 = arith.constant 0 : i32
      %138 = arith.addi %127, %c0_i32_137 : i32
      %139 = arith.index_cast %138 : i32 to index
      %c1_138 = arith.constant 1 : index
      %c0_139 = arith.constant 0 : index
      %c0_140 = arith.constant 0 : index
      %140 = vector.load %arg1[%139, %c1_138, %c0_139, %c0_140] : memref<18x18x8x3xbf16, #tpu.memory_space<vmem>>, vector<1x16x8x3xbf16>
      %141 = vector.shape_cast %140 : vector<1x16x8x3xbf16> to vector<128x3xbf16>
      %142 = arith.extf %141 : vector<128x3xbf16> to vector<128x3xf32>
      %c1_141 = arith.constant 1 : index
      %c0_142 = arith.constant 0 : index
      %c0_143 = arith.constant 0 : index
      %143 = vector.load %arg2[%c1_141, %c0_142, %c0_143] : memref<9x3x128xf32, #tpu.memory_space<vmem>>, vector<1x3x128xf32>
      %144 = vector.shape_cast %143 : vector<1x3x128xf32> to vector<3x128xf32>
      %cst_144 = arith.constant dense<0.000000e+00> : vector<128x128xf32>
      %145 = tpu.matmul %142, %144, %cst_144 {dimension_numbers = #tpu.dot_dimension_numbers<[1], [0], [0], [1], [0, 0, 1, 1], [], []>} : vector<128x3xf32>, vector<3x128xf32>, vector<128x128xf32> -> vector<128x128xf32>
      %146 = arith.addf %137, %145 : vector<128x128xf32>
      %c0_i32_145 = arith.constant 0 : i32
      %147 = arith.addi %127, %c0_i32_145 : i32
      %148 = arith.index_cast %147 : i32 to index
      %c2_146 = arith.constant 2 : index
      %c0_147 = arith.constant 0 : index
      %c0_148 = arith.constant 0 : index
      %149 = vector.load %arg1[%148, %c2_146, %c0_147, %c0_148] : memref<18x18x8x3xbf16, #tpu.memory_space<vmem>>, vector<1x16x8x3xbf16>
      %150 = vector.shape_cast %149 : vector<1x16x8x3xbf16> to vector<128x3xbf16>
      %151 = arith.extf %150 : vector<128x3xbf16> to vector<128x3xf32>
      %c2_149 = arith.constant 2 : index
      %c0_150 = arith.constant 0 : index
      %c0_151 = arith.constant 0 : index
      %152 = vector.load %arg2[%c2_149, %c0_150, %c0_151] : memref<9x3x128xf32, #tpu.memory_space<vmem>>, vector<1x3x128xf32>
      %153 = vector.shape_cast %152 : vector<1x3x128xf32> to vector<3x128xf32>
      %cst_152 = arith.constant dense<0.000000e+00> : vector<128x128xf32>
      %154 = tpu.matmul %151, %153, %cst_152 {dimension_numbers = #tpu.dot_dimension_numbers<[1], [0], [0], [1], [0, 0, 1, 1], [], []>} : vector<128x3xf32>, vector<3x128xf32>, vector<128x128xf32> -> vector<128x128xf32>
      %155 = arith.addf %146, %154 : vector<128x128xf32>
      %c1_i32_153 = arith.constant 1 : i32
      %156 = arith.addi %127, %c1_i32_153 : i32
      %157 = arith.index_cast %156 : i32 to index
      %c0_154 = arith.constant 0 : index
      %c0_155 = arith.constant 0 : index
      %c0_156 = arith.constant 0 : index
      %158 = vector.load %arg1[%157, %c0_154, %c0_155, %c0_156] : memref<18x18x8x3xbf16, #tpu.memory_space<vmem>>, vector<1x16x8x3xbf16>
      %159 = vector.shape_cast %158 : vector<1x16x8x3xbf16> to vector<128x3xbf16>
      %160 = arith.extf %159 : vector<128x3xbf16> to vector<128x3xf32>
      %c3_157 = arith.constant 3 : index
      %c0_158 = arith.constant 0 : index
      %c0_159 = arith.constant 0 : index
      %161 = vector.load %arg2[%c3_157, %c0_158, %c0_159] : memref<9x3x128xf32, #tpu.memory_space<vmem>>, vector<1x3x128xf32>
      %162 = vector.shape_cast %161 : vector<1x3x128xf32> to vector<3x128xf32>
      %cst_160 = arith.constant dense<0.000000e+00> : vector<128x128xf32>
      %163 = tpu.matmul %160, %162, %cst_160 {dimension_numbers = #tpu.dot_dimension_numbers<[1], [0], [0], [1], [0, 0, 1, 1], [], []>} : vector<128x3xf32>, vector<3x128xf32>, vector<128x128xf32> -> vector<128x128xf32>
      %164 = arith.addf %155, %163 : vector<128x128xf32>
      %c1_i32_161 = arith.constant 1 : i32
      %165 = arith.addi %127, %c1_i32_161 : i32
      %166 = arith.index_cast %165 : i32 to index
      %c1_162 = arith.constant 1 : index
      %c0_163 = arith.constant 0 : index
      %c0_164 = arith.constant 0 : index
      %167 = vector.load %arg1[%166, %c1_162, %c0_163, %c0_164] : memref<18x18x8x3xbf16, #tpu.memory_space<vmem>>, vector<1x16x8x3xbf16>
      %168 = vector.shape_cast %167 : vector<1x16x8x3xbf16> to vector<128x3xbf16>
      %169 = arith.extf %168 : vector<128x3xbf16> to vector<128x3xf32>
      %c4_165 = arith.constant 4 : index
      %c0_166 = arith.constant 0 : index
      %c0_167 = arith.constant 0 : index
      %170 = vector.load %arg2[%c4_165, %c0_166, %c0_167] : memref<9x3x128xf32, #tpu.memory_space<vmem>>, vector<1x3x128xf32>
      %171 = vector.shape_cast %170 : vector<1x3x128xf32> to vector<3x128xf32>
      %cst_168 = arith.constant dense<0.000000e+00> : vector<128x128xf32>
      %172 = tpu.matmul %169, %171, %cst_168 {dimension_numbers = #tpu.dot_dimension_numbers<[1], [0], [0], [1], [0, 0, 1, 1], [], []>} : vector<128x3xf32>, vector<3x128xf32>, vector<128x128xf32> -> vector<128x128xf32>
      %173 = arith.addf %164, %172 : vector<128x128xf32>
      %c1_i32_169 = arith.constant 1 : i32
      %174 = arith.addi %127, %c1_i32_169 : i32
      %175 = arith.index_cast %174 : i32 to index
      %c2_170 = arith.constant 2 : index
      %c0_171 = arith.constant 0 : index
      %c0_172 = arith.constant 0 : index
      %176 = vector.load %arg1[%175, %c2_170, %c0_171, %c0_172] : memref<18x18x8x3xbf16, #tpu.memory_space<vmem>>, vector<1x16x8x3xbf16>
      %177 = vector.shape_cast %176 : vector<1x16x8x3xbf16> to vector<128x3xbf16>
      %178 = arith.extf %177 : vector<128x3xbf16> to vector<128x3xf32>
      %c5_173 = arith.constant 5 : index
      %c0_174 = arith.constant 0 : index
      %c0_175 = arith.constant 0 : index
      %179 = vector.load %arg2[%c5_173, %c0_174, %c0_175] : memref<9x3x128xf32, #tpu.memory_space<vmem>>, vector<1x3x128xf32>
      %180 = vector.shape_cast %179 : vector<1x3x128xf32> to vector<3x128xf32>
      %cst_176 = arith.constant dense<0.000000e+00> : vector<128x128xf32>
      %181 = tpu.matmul %178, %180, %cst_176 {dimension_numbers = #tpu.dot_dimension_numbers<[1], [0], [0], [1], [0, 0, 1, 1], [], []>} : vector<128x3xf32>, vector<3x128xf32>, vector<128x128xf32> -> vector<128x128xf32>
      %182 = arith.addf %173, %181 : vector<128x128xf32>
      %c2_i32_177 = arith.constant 2 : i32
      %183 = arith.addi %127, %c2_i32_177 : i32
      %184 = arith.index_cast %183 : i32 to index
      %c0_178 = arith.constant 0 : index
      %c0_179 = arith.constant 0 : index
      %c0_180 = arith.constant 0 : index
      %185 = vector.load %arg1[%184, %c0_178, %c0_179, %c0_180] : memref<18x18x8x3xbf16, #tpu.memory_space<vmem>>, vector<1x16x8x3xbf16>
      %186 = vector.shape_cast %185 : vector<1x16x8x3xbf16> to vector<128x3xbf16>
      %187 = arith.extf %186 : vector<128x3xbf16> to vector<128x3xf32>
      %c6_181 = arith.constant 6 : index
      %c0_182 = arith.constant 0 : index
      %c0_183 = arith.constant 0 : index
      %188 = vector.load %arg2[%c6_181, %c0_182, %c0_183] : memref<9x3x128xf32, #tpu.memory_space<vmem>>, vector<1x3x128xf32>
      %189 = vector.shape_cast %188 : vector<1x3x128xf32> to vector<3x128xf32>
      %cst_184 = arith.constant dense<0.000000e+00> : vector<128x128xf32>
      %190 = tpu.matmul %187, %189, %cst_184 {dimension_numbers = #tpu.dot_dimension_numbers<[1], [0], [0], [1], [0, 0, 1, 1], [], []>} : vector<128x3xf32>, vector<3x128xf32>, vector<128x128xf32> -> vector<128x128xf32>
      %191 = arith.addf %182, %190 : vector<128x128xf32>
      %c2_i32_185 = arith.constant 2 : i32
      %192 = arith.addi %127, %c2_i32_185 : i32
      %193 = arith.index_cast %192 : i32 to index
      %c1_186 = arith.constant 1 : index
      %c0_187 = arith.constant 0 : index
      %c0_188 = arith.constant 0 : index
      %194 = vector.load %arg1[%193, %c1_186, %c0_187, %c0_188] : memref<18x18x8x3xbf16, #tpu.memory_space<vmem>>, vector<1x16x8x3xbf16>
      %195 = vector.shape_cast %194 : vector<1x16x8x3xbf16> to vector<128x3xbf16>
      %196 = arith.extf %195 : vector<128x3xbf16> to vector<128x3xf32>
      %c7_189 = arith.constant 7 : index
      %c0_190 = arith.constant 0 : index
      %c0_191 = arith.constant 0 : index
      %197 = vector.load %arg2[%c7_189, %c0_190, %c0_191] : memref<9x3x128xf32, #tpu.memory_space<vmem>>, vector<1x3x128xf32>
      %198 = vector.shape_cast %197 : vector<1x3x128xf32> to vector<3x128xf32>
      %cst_192 = arith.constant dense<0.000000e+00> : vector<128x128xf32>
      %199 = tpu.matmul %196, %198, %cst_192 {dimension_numbers = #tpu.dot_dimension_numbers<[1], [0], [0], [1], [0, 0, 1, 1], [], []>} : vector<128x3xf32>, vector<3x128xf32>, vector<128x128xf32> -> vector<128x128xf32>
      %200 = arith.addf %191, %199 : vector<128x128xf32>
      %c2_i32_193 = arith.constant 2 : i32
      %201 = arith.addi %127, %c2_i32_193 : i32
      %202 = arith.index_cast %201 : i32 to index
      %c2_194 = arith.constant 2 : index
      %c0_195 = arith.constant 0 : index
      %c0_196 = arith.constant 0 : index
      %203 = vector.load %arg1[%202, %c2_194, %c0_195, %c0_196] : memref<18x18x8x3xbf16, #tpu.memory_space<vmem>>, vector<1x16x8x3xbf16>
      %204 = vector.shape_cast %203 : vector<1x16x8x3xbf16> to vector<128x3xbf16>
      %205 = arith.extf %204 : vector<128x3xbf16> to vector<128x3xf32>
      %c8_197 = arith.constant 8 : index
      %c0_198 = arith.constant 0 : index
      %c0_199 = arith.constant 0 : index
      %206 = vector.load %arg2[%c8_197, %c0_198, %c0_199] : memref<9x3x128xf32, #tpu.memory_space<vmem>>, vector<1x3x128xf32>
      %207 = vector.shape_cast %206 : vector<1x3x128xf32> to vector<3x128xf32>
      %cst_200 = arith.constant dense<0.000000e+00> : vector<128x128xf32>
      %208 = tpu.matmul %205, %207, %cst_200 {dimension_numbers = #tpu.dot_dimension_numbers<[1], [0], [0], [1], [0, 0, 1, 1], [], []>} : vector<128x3xf32>, vector<3x128xf32>, vector<128x128xf32> -> vector<128x128xf32>
      %209 = arith.addf %200, %208 : vector<128x128xf32>
      %210 = vector.broadcast %0 : vector<1x128xf32> to vector<128x128xf32>
      %211 = arith.addf %209, %210 : vector<128x128xf32>
      %cst_201 = arith.constant 0.000000e+00 : f32
      %212 = vector.broadcast %cst_201 : f32 to vector<128x128xf32>
      %213 = arith.maximumf %211, %212 : vector<128x128xf32>
      %214 = vector.shape_cast %213 : vector<128x128xf32> to vector<8x2x8x128xf32>
      %215 = vector.extract_strided_slice %214 {offsets = [0, 0, 0, 0], sizes = [8, 1, 8, 128], strides = [1, 1, 1, 1]} : vector<8x2x8x128xf32> to vector<8x1x8x128xf32>
      %216 = vector.shape_cast %215 : vector<8x1x8x128xf32> to vector<8x8x128xf32>
      %217 = vector.extract_strided_slice %214 {offsets = [0, 1, 0, 0], sizes = [8, 1, 8, 128], strides = [1, 1, 1, 1]} : vector<8x2x8x128xf32> to vector<8x1x8x128xf32>
      %218 = vector.shape_cast %217 : vector<8x1x8x128xf32> to vector<8x8x128xf32>
      %219 = arith.maximumf %216, %218 : vector<8x8x128xf32>
      %220 = arith.maximumf %125, %219 : vector<8x8x128xf32>
      %221 = vector.shape_cast %220 : vector<8x8x128xf32> to vector<1x8x8x128xf32>
      %222 = arith.truncf %221 : vector<1x8x8x128xf32> to vector<1x8x8x128xbf16>
      %c1_i32_202 = arith.constant 1 : i32
      %223 = arith.addi %arg13, %c1_i32_202 : i32
      %224 = arith.index_cast %223 : i32 to index
      %c1_203 = arith.constant 1 : index
      %c0_204 = arith.constant 0 : index
      %c0_205 = arith.constant 0 : index
      %225 = vector.load %arg11[%224, %c1_203, %c0_204, %c0_205] : memref<10x10x8x128xbf16, #tpu.memory_space<vmem>>, vector<1x8x8x128xbf16>
      tpu.vector_store %arg11[%224, %c1_203, %c0_204, %c0_205], %222 {strides = array<i32>} : memref<10x10x8x128xbf16, #tpu.memory_space<vmem>>, vector<1x8x8x128xbf16>,
    }
    %c8_i32_19 = arith.constant 8 : i32
    %c0_20 = arith.constant 0 : index
    %c0_21 = arith.constant 0 : index
    %10 = vector.load %arg5[%c0_20, %c0_21] : memref<1x128xf32, #tpu.memory_space<vmem>>, vector<1x128xf32>
    %cst_22 = arith.constant 0.000000e+00 : bf16
    %11 = vector.broadcast %cst_22 : bf16 to vector<1x6x8x128xbf16>
    %c0_23 = arith.constant 0 : index
    %c0_24 = arith.constant 0 : index
    %c0_25 = arith.constant 0 : index
    %c0_26 = arith.constant 0 : index
    %12 = vector.load %arg12[%c0_23, %c0_24, %c0_25, %c0_26] : memref<6x6x8x128xbf16, #tpu.memory_space<vmem>>, vector<1x6x8x128xbf16>
    tpu.vector_store %arg12[%c0_23, %c0_24, %c0_25, %c0_26], %11 {strides = array<i32>} : memref<6x6x8x128xbf16, #tpu.memory_space<vmem>>, vector<1x6x8x128xbf16>,
    %cst_27 = arith.constant 0.000000e+00 : bf16
    %13 = vector.broadcast %cst_27 : bf16 to vector<1x6x8x128xbf16>
    %c5 = arith.constant 5 : index
    %c0_28 = arith.constant 0 : index
    %c0_29 = arith.constant 0 : index
    %c0_30 = arith.constant 0 : index
    %14 = vector.load %arg12[%c5, %c0_28, %c0_29, %c0_30] : memref<6x6x8x128xbf16, #tpu.memory_space<vmem>>, vector<1x6x8x128xbf16>
    tpu.vector_store %arg12[%c5, %c0_28, %c0_29, %c0_30], %13 {strides = array<i32>} : memref<6x6x8x128xbf16, #tpu.memory_space<vmem>>, vector<1x6x8x128xbf16>,
    %cst_31 = arith.constant 0.000000e+00 : bf16
    %15 = vector.broadcast %cst_31 : bf16 to vector<6x1x8x128xbf16>
    %c0_32 = arith.constant 0 : index
    %c0_33 = arith.constant 0 : index
    %c0_34 = arith.constant 0 : index
    %c0_35 = arith.constant 0 : index
    %16 = vector.load %arg12[%c0_32, %c0_33, %c0_34, %c0_35] : memref<6x6x8x128xbf16, #tpu.memory_space<vmem>>, vector<6x1x8x128xbf16>
    tpu.vector_store %arg12[%c0_32, %c0_33, %c0_34, %c0_35], %15 {strides = array<i32>} : memref<6x6x8x128xbf16, #tpu.memory_space<vmem>>, vector<6x1x8x128xbf16>,
    %cst_36 = arith.constant 0.000000e+00 : bf16
    %17 = vector.broadcast %cst_36 : bf16 to vector<6x1x8x128xbf16>
    %c0_37 = arith.constant 0 : index
    %c5_38 = arith.constant 5 : index
    %c0_39 = arith.constant 0 : index
    %c0_40 = arith.constant 0 : index
    %18 = vector.load %arg12[%c0_37, %c5_38, %c0_39, %c0_40] : memref<6x6x8x128xbf16, #tpu.memory_space<vmem>>, vector<6x1x8x128xbf16>
    tpu.vector_store %arg12[%c0_37, %c5_38, %c0_39, %c0_40], %17 {strides = array<i32>} : memref<6x6x8x128xbf16, #tpu.memory_space<vmem>>, vector<6x1x8x128xbf16>,
    %c0_i32_41 = arith.constant 0 : i32
    %c4_i32 = arith.constant 4 : i32
    %19 = arith.addi %c0_i32_41, %c4_i32 : i32
    %c1_i32_42 = arith.constant 1 : i32
    scf.for %arg13 = %c0_i32_41 to %19 step %c1_i32_42  : i32 {
      %c2_i32 = arith.constant 2 : i32
      %33 = arith.muli %c2_i32, %arg13 : i32
      %cst_59 = arith.constant 0.000000e+00 : f32
      %34 = vector.broadcast %cst_59 : f32 to vector<64x128xf32>
      %c0_i32_60 = arith.constant 0 : i32
      %35 = arith.addi %33, %c0_i32_60 : i32
      %36 = arith.index_cast %35 : i32 to index
      %c0_61 = arith.constant 0 : index
      %c0_62 = arith.constant 0 : index
      %c0_63 = arith.constant 0 : index
      %37 = vector.load %arg11[%36, %c0_61, %c0_62, %c0_63] : memref<10x10x8x128xbf16, #tpu.memory_space<vmem>>, vector<1x8x8x128xbf16>
      %38 = vector.shape_cast %37 : vector<1x8x8x128xbf16> to vector<64x128xbf16>
      %c0_64 = arith.constant 0 : index
      %c0_65 = arith.constant 0 : index
      %c0_66 = arith.constant 0 : index
      %39 = vector.load %arg4[%c0_64, %c0_65, %c0_66] : memref<9x128x128xbf16, #tpu.memory_space<vmem>>, vector<1x128x128xbf16>
      %40 = vector.shape_cast %39 : vector<1x128x128xbf16> to vector<128x128xbf16>
      %cst_67 = arith.constant dense<0.000000e+00> : vector<64x128xf32>
      %41 = tpu.matmul %38, %40, %cst_67 {dimension_numbers = #tpu.dot_dimension_numbers<[1], [0], [0], [1], [0, 0, 1, 1], [], []>} : vector<64x128xbf16>, vector<128x128xbf16>, vector<64x128xf32> -> vector<64x128xf32>
      %42 = arith.addf %34, %41 : vector<64x128xf32>
      %c0_i32_68 = arith.constant 0 : i32
      %43 = arith.addi %33, %c0_i32_68 : i32
      %44 = arith.index_cast %43 : i32 to index
      %c1 = arith.constant 1 : index
      %c0_69 = arith.constant 0 : index
      %c0_70 = arith.constant 0 : index
      %45 = vector.load %arg11[%44, %c1, %c0_69, %c0_70] : memref<10x10x8x128xbf16, #tpu.memory_space<vmem>>, vector<1x8x8x128xbf16>
      %46 = vector.shape_cast %45 : vector<1x8x8x128xbf16> to vector<64x128xbf16>
      %c1_71 = arith.constant 1 : index
      %c0_72 = arith.constant 0 : index
      %c0_73 = arith.constant 0 : index
      %47 = vector.load %arg4[%c1_71, %c0_72, %c0_73] : memref<9x128x128xbf16, #tpu.memory_space<vmem>>, vector<1x128x128xbf16>
      %48 = vector.shape_cast %47 : vector<1x128x128xbf16> to vector<128x128xbf16>
      %cst_74 = arith.constant dense<0.000000e+00> : vector<64x128xf32>
      %49 = tpu.matmul %46, %48, %cst_74 {dimension_numbers = #tpu.dot_dimension_numbers<[1], [0], [0], [1], [0, 0, 1, 1], [], []>} : vector<64x128xbf16>, vector<128x128xbf16>, vector<64x128xf32> -> vector<64x128xf32>
      %50 = arith.addf %42, %49 : vector<64x128xf32>
      %c0_i32_75 = arith.constant 0 : i32
      %51 = arith.addi %33, %c0_i32_75 : i32
      %52 = arith.index_cast %51 : i32 to index
      %c2 = arith.constant 2 : index
      %c0_76 = arith.constant 0 : index
      %c0_77 = arith.constant 0 : index
      %53 = vector.load %arg11[%52, %c2, %c0_76, %c0_77] : memref<10x10x8x128xbf16, #tpu.memory_space<vmem>>, vector<1x8x8x128xbf16>
      %54 = vector.shape_cast %53 : vector<1x8x8x128xbf16> to vector<64x128xbf16>
      %c2_78 = arith.constant 2 : index
      %c0_79 = arith.constant 0 : index
      %c0_80 = arith.constant 0 : index
      %55 = vector.load %arg4[%c2_78, %c0_79, %c0_80] : memref<9x128x128xbf16, #tpu.memory_space<vmem>>, vector<1x128x128xbf16>
      %56 = vector.shape_cast %55 : vector<1x128x128xbf16> to vector<128x128xbf16>
      %cst_81 = arith.constant dense<0.000000e+00> : vector<64x128xf32>
      %57 = tpu.matmul %54, %56, %cst_81 {dimension_numbers = #tpu.dot_dimension_numbers<[1], [0], [0], [1], [0, 0, 1, 1], [], []>} : vector<64x128xbf16>, vector<128x128xbf16>, vector<64x128xf32> -> vector<64x128xf32>
      %58 = arith.addf %50, %57 : vector<64x128xf32>
      %c1_i32_82 = arith.constant 1 : i32
      %59 = arith.addi %33, %c1_i32_82 : i32
      %60 = arith.index_cast %59 : i32 to index
      %c0_83 = arith.constant 0 : index
      %c0_84 = arith.constant 0 : index
      %c0_85 = arith.constant 0 : index
      %61 = vector.load %arg11[%60, %c0_83, %c0_84, %c0_85] : memref<10x10x8x128xbf16, #tpu.memory_space<vmem>>, vector<1x8x8x128xbf16>
      %62 = vector.shape_cast %61 : vector<1x8x8x128xbf16> to vector<64x128xbf16>
      %c3 = arith.constant 3 : index
      %c0_86 = arith.constant 0 : index
      %c0_87 = arith.constant 0 : index
      %63 = vector.load %arg4[%c3, %c0_86, %c0_87] : memref<9x128x128xbf16, #tpu.memory_space<vmem>>, vector<1x128x128xbf16>
      %64 = vector.shape_cast %63 : vector<1x128x128xbf16> to vector<128x128xbf16>
      %cst_88 = arith.constant dense<0.000000e+00> : vector<64x128xf32>
      %65 = tpu.matmul %62, %64, %cst_88 {dimension_numbers = #tpu.dot_dimension_numbers<[1], [0], [0], [1], [0, 0, 1, 1], [], []>} : vector<64x128xbf16>, vector<128x128xbf16>, vector<64x128xf32> -> vector<64x128xf32>
      %66 = arith.addf %58, %65 : vector<64x128xf32>
      %c1_i32_89 = arith.constant 1 : i32
      %67 = arith.addi %33, %c1_i32_89 : i32
      %68 = arith.index_cast %67 : i32 to index
      %c1_90 = arith.constant 1 : index
      %c0_91 = arith.constant 0 : index
      %c0_92 = arith.constant 0 : index
      %69 = vector.load %arg11[%68, %c1_90, %c0_91, %c0_92] : memref<10x10x8x128xbf16, #tpu.memory_space<vmem>>, vector<1x8x8x128xbf16>
      %70 = vector.shape_cast %69 : vector<1x8x8x128xbf16> to vector<64x128xbf16>
      %c4 = arith.constant 4 : index
      %c0_93 = arith.constant 0 : index
      %c0_94 = arith.constant 0 : index
      %71 = vector.load %arg4[%c4, %c0_93, %c0_94] : memref<9x128x128xbf16, #tpu.memory_space<vmem>>, vector<1x128x128xbf16>
      %72 = vector.shape_cast %71 : vector<1x128x128xbf16> to vector<128x128xbf16>
      %cst_95 = arith.constant dense<0.000000e+00> : vector<64x128xf32>
      %73 = tpu.matmul %70, %72, %cst_95 {dimension_numbers = #tpu.dot_dimension_numbers<[1], [0], [0], [1], [0, 0, 1, 1], [], []>} : vector<64x128xbf16>, vector<128x128xbf16>, vector<64x128xf32> -> vector<64x128xf32>
      %74 = arith.addf %66, %73 : vector<64x128xf32>
      %c1_i32_96 = arith.constant 1 : i32
      %75 = arith.addi %33, %c1_i32_96 : i32
      %76 = arith.index_cast %75 : i32 to index
      %c2_97 = arith.constant 2 : index
      %c0_98 = arith.constant 0 : index
      %c0_99 = arith.constant 0 : index
      %77 = vector.load %arg11[%76, %c2_97, %c0_98, %c0_99] : memref<10x10x8x128xbf16, #tpu.memory_space<vmem>>, vector<1x8x8x128xbf16>
      %78 = vector.shape_cast %77 : vector<1x8x8x128xbf16> to vector<64x128xbf16>
      %c5_100 = arith.constant 5 : index
      %c0_101 = arith.constant 0 : index
      %c0_102 = arith.constant 0 : index
      %79 = vector.load %arg4[%c5_100, %c0_101, %c0_102] : memref<9x128x128xbf16, #tpu.memory_space<vmem>>, vector<1x128x128xbf16>
      %80 = vector.shape_cast %79 : vector<1x128x128xbf16> to vector<128x128xbf16>
      %cst_103 = arith.constant dense<0.000000e+00> : vector<64x128xf32>
      %81 = tpu.matmul %78, %80, %cst_103 {dimension_numbers = #tpu.dot_dimension_numbers<[1], [0], [0], [1], [0, 0, 1, 1], [], []>} : vector<64x128xbf16>, vector<128x128xbf16>, vector<64x128xf32> -> vector<64x128xf32>
      %82 = arith.addf %74, %81 : vector<64x128xf32>
      %c2_i32_104 = arith.constant 2 : i32
      %83 = arith.addi %33, %c2_i32_104 : i32
      %84 = arith.index_cast %83 : i32 to index
      %c0_105 = arith.constant 0 : index
      %c0_106 = arith.constant 0 : index
      %c0_107 = arith.constant 0 : index
      %85 = vector.load %arg11[%84, %c0_105, %c0_106, %c0_107] : memref<10x10x8x128xbf16, #tpu.memory_space<vmem>>, vector<1x8x8x128xbf16>
      %86 = vector.shape_cast %85 : vector<1x8x8x128xbf16> to vector<64x128xbf16>
      %c6 = arith.constant 6 : index
      %c0_108 = arith.constant 0 : index
      %c0_109 = arith.constant 0 : index
      %87 = vector.load %arg4[%c6, %c0_108, %c0_109] : memref<9x128x128xbf16, #tpu.memory_space<vmem>>, vector<1x128x128xbf16>
      %88 = vector.shape_cast %87 : vector<1x128x128xbf16> to vector<128x128xbf16>
      %cst_110 = arith.constant dense<0.000000e+00> : vector<64x128xf32>
      %89 = tpu.matmul %86, %88, %cst_110 {dimension_numbers = #tpu.dot_dimension_numbers<[1], [0], [0], [1], [0, 0, 1, 1], [], []>} : vector<64x128xbf16>, vector<128x128xbf16>, vector<64x128xf32> -> vector<64x128xf32>
      %90 = arith.addf %82, %89 : vector<64x128xf32>
      %c2_i32_111 = arith.constant 2 : i32
      %91 = arith.addi %33, %c2_i32_111 : i32
      %92 = arith.index_cast %91 : i32 to index
      %c1_112 = arith.constant 1 : index
      %c0_113 = arith.constant 0 : index
      %c0_114 = arith.constant 0 : index
      %93 = vector.load %arg11[%92, %c1_112, %c0_113, %c0_114] : memref<10x10x8x128xbf16, #tpu.memory_space<vmem>>, vector<1x8x8x128xbf16>
      %94 = vector.shape_cast %93 : vector<1x8x8x128xbf16> to vector<64x128xbf16>
      %c7 = arith.constant 7 : index
      %c0_115 = arith.constant 0 : index
      %c0_116 = arith.constant 0 : index
      %95 = vector.load %arg4[%c7, %c0_115, %c0_116] : memref<9x128x128xbf16, #tpu.memory_space<vmem>>, vector<1x128x128xbf16>
      %96 = vector.shape_cast %95 : vector<1x128x128xbf16> to vector<128x128xbf16>
      %cst_117 = arith.constant dense<0.000000e+00> : vector<64x128xf32>
      %97 = tpu.matmul %94, %96, %cst_117 {dimension_numbers = #tpu.dot_dimension_numbers<[1], [0], [0], [1], [0, 0, 1, 1], [], []>} : vector<64x128xbf16>, vector<128x128xbf16>, vector<64x128xf32> -> vector<64x128xf32>
      %98 = arith.addf %90, %97 : vector<64x128xf32>
      %c2_i32_118 = arith.constant 2 : i32
      %99 = arith.addi %33, %c2_i32_118 : i32
      %100 = arith.index_cast %99 : i32 to index
      %c2_119 = arith.constant 2 : index
      %c0_120 = arith.constant 0 : index
      %c0_121 = arith.constant 0 : index
      %101 = vector.load %arg11[%100, %c2_119, %c0_120, %c0_121] : memref<10x10x8x128xbf16, #tpu.memory_space<vmem>>, vector<1x8x8x128xbf16>
      %102 = vector.shape_cast %101 : vector<1x8x8x128xbf16> to vector<64x128xbf16>
      %c8 = arith.constant 8 : index
      %c0_122 = arith.constant 0 : index
      %c0_123 = arith.constant 0 : index
      %103 = vector.load %arg4[%c8, %c0_122, %c0_123] : memref<9x128x128xbf16, #tpu.memory_space<vmem>>, vector<1x128x128xbf16>
      %104 = vector.shape_cast %103 : vector<1x128x128xbf16> to vector<128x128xbf16>
      %cst_124 = arith.constant dense<0.000000e+00> : vector<64x128xf32>
      %105 = tpu.matmul %102, %104, %cst_124 {dimension_numbers = #tpu.dot_dimension_numbers<[1], [0], [0], [1], [0, 0, 1, 1], [], []>} : vector<64x128xbf16>, vector<128x128xbf16>, vector<64x128xf32> -> vector<64x128xf32>
      %106 = arith.addf %98, %105 : vector<64x128xf32>
      %107 = vector.broadcast %10 : vector<1x128xf32> to vector<64x128xf32>
      %108 = arith.addf %106, %107 : vector<64x128xf32>
      %cst_125 = arith.constant 0.000000e+00 : f32
      %109 = vector.broadcast %cst_125 : f32 to vector<64x128xf32>
      %110 = arith.maximumf %108, %109 : vector<64x128xf32>
      %111 = vector.shape_cast %110 : vector<64x128xf32> to vector<4x2x8x128xf32>
      %112 = vector.extract_strided_slice %111 {offsets = [0, 0, 0, 0], sizes = [4, 1, 8, 128], strides = [1, 1, 1, 1]} : vector<4x2x8x128xf32> to vector<4x1x8x128xf32>
      %113 = vector.shape_cast %112 : vector<4x1x8x128xf32> to vector<4x8x128xf32>
      %114 = vector.extract_strided_slice %111 {offsets = [0, 1, 0, 0], sizes = [4, 1, 8, 128], strides = [1, 1, 1, 1]} : vector<4x2x8x128xf32> to vector<4x1x8x128xf32>
      %115 = vector.shape_cast %114 : vector<4x1x8x128xf32> to vector<4x8x128xf32>
      %116 = arith.maximumf %113, %115 : vector<4x8x128xf32>
      %c2_i32_126 = arith.constant 2 : i32
      %117 = arith.muli %c2_i32_126, %arg13 : i32
      %c1_i32_127 = arith.constant 1 : i32
      %118 = arith.addi %117, %c1_i32_127 : i32
      %cst_128 = arith.constant 0.000000e+00 : f32
      %119 = vector.broadcast %cst_128 : f32 to vector<64x128xf32>
      %c0_i32_129 = arith.constant 0 : i32
      %120 = arith.addi %118, %c0_i32_129 : i32
      %121 = arith.index_cast %120 : i32 to index
      %c0_130 = arith.constant 0 : index
      %c0_131 = arith.constant 0 : index
      %c0_132 = arith.constant 0 : index
      %122 = vector.load %arg11[%121, %c0_130, %c0_131, %c0_132] : memref<10x10x8x128xbf16, #tpu.memory_space<vmem>>, vector<1x8x8x128xbf16>
      %123 = vector.shape_cast %122 : vector<1x8x8x128xbf16> to vector<64x128xbf16>
      %c0_133 = arith.constant 0 : index
      %c0_134 = arith.constant 0 : index
      %c0_135 = arith.constant 0 : index
      %124 = vector.load %arg4[%c0_133, %c0_134, %c0_135] : memref<9x128x128xbf16, #tpu.memory_space<vmem>>, vector<1x128x128xbf16>
      %125 = vector.shape_cast %124 : vector<1x128x128xbf16> to vector<128x128xbf16>
      %cst_136 = arith.constant dense<0.000000e+00> : vector<64x128xf32>
      %126 = tpu.matmul %123, %125, %cst_136 {dimension_numbers = #tpu.dot_dimension_numbers<[1], [0], [0], [1], [0, 0, 1, 1], [], []>} : vector<64x128xbf16>, vector<128x128xbf16>, vector<64x128xf32> -> vector<64x128xf32>
      %127 = arith.addf %119, %126 : vector<64x128xf32>
      %c0_i32_137 = arith.constant 0 : i32
      %128 = arith.addi %118, %c0_i32_137 : i32
      %129 = arith.index_cast %128 : i32 to index
      %c1_138 = arith.constant 1 : index
      %c0_139 = arith.constant 0 : index
      %c0_140 = arith.constant 0 : index
      %130 = vector.load %arg11[%129, %c1_138, %c0_139, %c0_140] : memref<10x10x8x128xbf16, #tpu.memory_space<vmem>>, vector<1x8x8x128xbf16>
      %131 = vector.shape_cast %130 : vector<1x8x8x128xbf16> to vector<64x128xbf16>
      %c1_141 = arith.constant 1 : index
      %c0_142 = arith.constant 0 : index
      %c0_143 = arith.constant 0 : index
      %132 = vector.load %arg4[%c1_141, %c0_142, %c0_143] : memref<9x128x128xbf16, #tpu.memory_space<vmem>>, vector<1x128x128xbf16>
      %133 = vector.shape_cast %132 : vector<1x128x128xbf16> to vector<128x128xbf16>
      %cst_144 = arith.constant dense<0.000000e+00> : vector<64x128xf32>
      %134 = tpu.matmul %131, %133, %cst_144 {dimension_numbers = #tpu.dot_dimension_numbers<[1], [0], [0], [1], [0, 0, 1, 1], [], []>} : vector<64x128xbf16>, vector<128x128xbf16>, vector<64x128xf32> -> vector<64x128xf32>
      %135 = arith.addf %127, %134 : vector<64x128xf32>
      %c0_i32_145 = arith.constant 0 : i32
      %136 = arith.addi %118, %c0_i32_145 : i32
      %137 = arith.index_cast %136 : i32 to index
      %c2_146 = arith.constant 2 : index
      %c0_147 = arith.constant 0 : index
      %c0_148 = arith.constant 0 : index
      %138 = vector.load %arg11[%137, %c2_146, %c0_147, %c0_148] : memref<10x10x8x128xbf16, #tpu.memory_space<vmem>>, vector<1x8x8x128xbf16>
      %139 = vector.shape_cast %138 : vector<1x8x8x128xbf16> to vector<64x128xbf16>
      %c2_149 = arith.constant 2 : index
      %c0_150 = arith.constant 0 : index
      %c0_151 = arith.constant 0 : index
      %140 = vector.load %arg4[%c2_149, %c0_150, %c0_151] : memref<9x128x128xbf16, #tpu.memory_space<vmem>>, vector<1x128x128xbf16>
      %141 = vector.shape_cast %140 : vector<1x128x128xbf16> to vector<128x128xbf16>
      %cst_152 = arith.constant dense<0.000000e+00> : vector<64x128xf32>
      %142 = tpu.matmul %139, %141, %cst_152 {dimension_numbers = #tpu.dot_dimension_numbers<[1], [0], [0], [1], [0, 0, 1, 1], [], []>} : vector<64x128xbf16>, vector<128x128xbf16>, vector<64x128xf32> -> vector<64x128xf32>
      %143 = arith.addf %135, %142 : vector<64x128xf32>
      %c1_i32_153 = arith.constant 1 : i32
      %144 = arith.addi %118, %c1_i32_153 : i32
      %145 = arith.index_cast %144 : i32 to index
      %c0_154 = arith.constant 0 : index
      %c0_155 = arith.constant 0 : index
      %c0_156 = arith.constant 0 : index
      %146 = vector.load %arg11[%145, %c0_154, %c0_155, %c0_156] : memref<10x10x8x128xbf16, #tpu.memory_space<vmem>>, vector<1x8x8x128xbf16>
      %147 = vector.shape_cast %146 : vector<1x8x8x128xbf16> to vector<64x128xbf16>
      %c3_157 = arith.constant 3 : index
      %c0_158 = arith.constant 0 : index
      %c0_159 = arith.constant 0 : index
      %148 = vector.load %arg4[%c3_157, %c0_158, %c0_159] : memref<9x128x128xbf16, #tpu.memory_space<vmem>>, vector<1x128x128xbf16>
      %149 = vector.shape_cast %148 : vector<1x128x128xbf16> to vector<128x128xbf16>
      %cst_160 = arith.constant dense<0.000000e+00> : vector<64x128xf32>
      %150 = tpu.matmul %147, %149, %cst_160 {dimension_numbers = #tpu.dot_dimension_numbers<[1], [0], [0], [1], [0, 0, 1, 1], [], []>} : vector<64x128xbf16>, vector<128x128xbf16>, vector<64x128xf32> -> vector<64x128xf32>
      %151 = arith.addf %143, %150 : vector<64x128xf32>
      %c1_i32_161 = arith.constant 1 : i32
      %152 = arith.addi %118, %c1_i32_161 : i32
      %153 = arith.index_cast %152 : i32 to index
      %c1_162 = arith.constant 1 : index
      %c0_163 = arith.constant 0 : index
      %c0_164 = arith.constant 0 : index
      %154 = vector.load %arg11[%153, %c1_162, %c0_163, %c0_164] : memref<10x10x8x128xbf16, #tpu.memory_space<vmem>>, vector<1x8x8x128xbf16>
      %155 = vector.shape_cast %154 : vector<1x8x8x128xbf16> to vector<64x128xbf16>
      %c4_165 = arith.constant 4 : index
      %c0_166 = arith.constant 0 : index
      %c0_167 = arith.constant 0 : index
      %156 = vector.load %arg4[%c4_165, %c0_166, %c0_167] : memref<9x128x128xbf16, #tpu.memory_space<vmem>>, vector<1x128x128xbf16>
      %157 = vector.shape_cast %156 : vector<1x128x128xbf16> to vector<128x128xbf16>
      %cst_168 = arith.constant dense<0.000000e+00> : vector<64x128xf32>
      %158 = tpu.matmul %155, %157, %cst_168 {dimension_numbers = #tpu.dot_dimension_numbers<[1], [0], [0], [1], [0, 0, 1, 1], [], []>} : vector<64x128xbf16>, vector<128x128xbf16>, vector<64x128xf32> -> vector<64x128xf32>
      %159 = arith.addf %151, %158 : vector<64x128xf32>
      %c1_i32_169 = arith.constant 1 : i32
      %160 = arith.addi %118, %c1_i32_169 : i32
      %161 = arith.index_cast %160 : i32 to index
      %c2_170 = arith.constant 2 : index
      %c0_171 = arith.constant 0 : index
      %c0_172 = arith.constant 0 : index
      %162 = vector.load %arg11[%161, %c2_170, %c0_171, %c0_172] : memref<10x10x8x128xbf16, #tpu.memory_space<vmem>>, vector<1x8x8x128xbf16>
      %163 = vector.shape_cast %162 : vector<1x8x8x128xbf16> to vector<64x128xbf16>
      %c5_173 = arith.constant 5 : index
      %c0_174 = arith.constant 0 : index
      %c0_175 = arith.constant 0 : index
      %164 = vector.load %arg4[%c5_173, %c0_174, %c0_175] : memref<9x128x128xbf16, #tpu.memory_space<vmem>>, vector<1x128x128xbf16>
      %165 = vector.shape_cast %164 : vector<1x128x128xbf16> to vector<128x128xbf16>
      %cst_176 = arith.constant dense<0.000000e+00> : vector<64x128xf32>
      %166 = tpu.matmul %163, %165, %cst_176 {dimension_numbers = #tpu.dot_dimension_numbers<[1], [0], [0], [1], [0, 0, 1, 1], [], []>} : vector<64x128xbf16>, vector<128x128xbf16>, vector<64x128xf32> -> vector<64x128xf32>
      %167 = arith.addf %159, %166 : vector<64x128xf32>
      %c2_i32_177 = arith.constant 2 : i32
      %168 = arith.addi %118, %c2_i32_177 : i32
      %169 = arith.index_cast %168 : i32 to index
      %c0_178 = arith.constant 0 : index
      %c0_179 = arith.constant 0 : index
      %c0_180 = arith.constant 0 : index
      %170 = vector.load %arg11[%169, %c0_178, %c0_179, %c0_180] : memref<10x10x8x128xbf16, #tpu.memory_space<vmem>>, vector<1x8x8x128xbf16>
      %171 = vector.shape_cast %170 : vector<1x8x8x128xbf16> to vector<64x128xbf16>
      %c6_181 = arith.constant 6 : index
      %c0_182 = arith.constant 0 : index
      %c0_183 = arith.constant 0 : index
      %172 = vector.load %arg4[%c6_181, %c0_182, %c0_183] : memref<9x128x128xbf16, #tpu.memory_space<vmem>>, vector<1x128x128xbf16>
      %173 = vector.shape_cast %172 : vector<1x128x128xbf16> to vector<128x128xbf16>
      %cst_184 = arith.constant dense<0.000000e+00> : vector<64x128xf32>
      %174 = tpu.matmul %171, %173, %cst_184 {dimension_numbers = #tpu.dot_dimension_numbers<[1], [0], [0], [1], [0, 0, 1, 1], [], []>} : vector<64x128xbf16>, vector<128x128xbf16>, vector<64x128xf32> -> vector<64x128xf32>
      %175 = arith.addf %167, %174 : vector<64x128xf32>
      %c2_i32_185 = arith.constant 2 : i32
      %176 = arith.addi %118, %c2_i32_185 : i32
      %177 = arith.index_cast %176 : i32 to index
      %c1_186 = arith.constant 1 : index
      %c0_187 = arith.constant 0 : index
      %c0_188 = arith.constant 0 : index
      %178 = vector.load %arg11[%177, %c1_186, %c0_187, %c0_188] : memref<10x10x8x128xbf16, #tpu.memory_space<vmem>>, vector<1x8x8x128xbf16>
      %179 = vector.shape_cast %178 : vector<1x8x8x128xbf16> to vector<64x128xbf16>
      %c7_189 = arith.constant 7 : index
      %c0_190 = arith.constant 0 : index
      %c0_191 = arith.constant 0 : index
      %180 = vector.load %arg4[%c7_189, %c0_190, %c0_191] : memref<9x128x128xbf16, #tpu.memory_space<vmem>>, vector<1x128x128xbf16>
      %181 = vector.shape_cast %180 : vector<1x128x128xbf16> to vector<128x128xbf16>
      %cst_192 = arith.constant dense<0.000000e+00> : vector<64x128xf32>
      %182 = tpu.matmul %179, %181, %cst_192 {dimension_numbers = #tpu.dot_dimension_numbers<[1], [0], [0], [1], [0, 0, 1, 1], [], []>} : vector<64x128xbf16>, vector<128x128xbf16>, vector<64x128xf32> -> vector<64x128xf32>
      %183 = arith.addf %175, %182 : vector<64x128xf32>
      %c2_i32_193 = arith.constant 2 : i32
      %184 = arith.addi %118, %c2_i32_193 : i32
      %185 = arith.index_cast %184 : i32 to index
      %c2_194 = arith.constant 2 : index
      %c0_195 = arith.constant 0 : index
      %c0_196 = arith.constant 0 : index
      %186 = vector.load %arg11[%185, %c2_194, %c0_195, %c0_196] : memref<10x10x8x128xbf16, #tpu.memory_space<vmem>>, vector<1x8x8x128xbf16>
      %187 = vector.shape_cast %186 : vector<1x8x8x128xbf16> to vector<64x128xbf16>
      %c8_197 = arith.constant 8 : index
      %c0_198 = arith.constant 0 : index
      %c0_199 = arith.constant 0 : index
      %188 = vector.load %arg4[%c8_197, %c0_198, %c0_199] : memref<9x128x128xbf16, #tpu.memory_space<vmem>>, vector<1x128x128xbf16>
      %189 = vector.shape_cast %188 : vector<1x128x128xbf16> to vector<128x128xbf16>
      %cst_200 = arith.constant dense<0.000000e+00> : vector<64x128xf32>
      %190 = tpu.matmul %187, %189, %cst_200 {dimension_numbers = #tpu.dot_dimension_numbers<[1], [0], [0], [1], [0, 0, 1, 1], [], []>} : vector<64x128xbf16>, vector<128x128xbf16>, vector<64x128xf32> -> vector<64x128xf32>
      %191 = arith.addf %183, %190 : vector<64x128xf32>
      %192 = vector.broadcast %10 : vector<1x128xf32> to vector<64x128xf32>
      %193 = arith.addf %191, %192 : vector<64x128xf32>
      %cst_201 = arith.constant 0.000000e+00 : f32
      %194 = vector.broadcast %cst_201 : f32 to vector<64x128xf32>
      %195 = arith.maximumf %193, %194 : vector<64x128xf32>
      %196 = vector.shape_cast %195 : vector<64x128xf32> to vector<4x2x8x128xf32>
      %197 = vector.extract_strided_slice %196 {offsets = [0, 0, 0, 0], sizes = [4, 1, 8, 128], strides = [1, 1, 1, 1]} : vector<4x2x8x128xf32> to vector<4x1x8x128xf32>
      %198 = vector.shape_cast %197 : vector<4x1x8x128xf32> to vector<4x8x128xf32>
      %199 = vector.extract_strided_slice %196 {offsets = [0, 1, 0, 0], sizes = [4, 1, 8, 128], strides = [1, 1, 1, 1]} : vector<4x2x8x128xf32> to vector<4x1x8x128xf32>
      %200 = vector.shape_cast %199 : vector<4x1x8x128xf32> to vector<4x8x128xf32>
      %201 = arith.maximumf %198, %200 : vector<4x8x128xf32>
      %202 = arith.maximumf %116, %201 : vector<4x8x128xf32>
      %203 = vector.shape_cast %202 : vector<4x8x128xf32> to vector<1x4x8x128xf32>
      %204 = arith.truncf %203 : vector<1x4x8x128xf32> to vector<1x4x8x128xbf16>
      %c1_i32_202 = arith.constant 1 : i32
      %205 = arith.addi %arg13, %c1_i32_202 : i32
      %206 = arith.index_cast %205 : i32 to index
      %c1_203 = arith.constant 1 : index
      %c0_204 = arith.constant 0 : index
      %c0_205 = arith.constant 0 : index
      %207 = vector.load %arg12[%206, %c1_203, %c0_204, %c0_205] : memref<6x6x8x128xbf16, #tpu.memory_space<vmem>>, vector<1x4x8x128xbf16>
      tpu.vector_store %arg12[%206, %c1_203, %c0_204, %c0_205], %204 {strides = array<i32>} : memref<6x6x8x128xbf16, #tpu.memory_space<vmem>>, vector<1x4x8x128xbf16>,
    }
    %c4_i32_43 = arith.constant 4 : i32
    %c0_44 = arith.constant 0 : index
    %c0_45 = arith.constant 0 : index
    %20 = vector.load %arg7[%c0_44, %c0_45] : memref<1x128xf32, #tpu.memory_space<vmem>>, vector<1x128xf32>
    %cst_46 = arith.constant 0.000000e+00 : f32
    %21 = vector.broadcast %cst_46 : f32 to vector<8x128xf32>
    %c0_i32_47 = arith.constant 0 : i32
    %c4_i32_48 = arith.constant 4 : i32
    %22 = arith.addi %c0_i32_47, %c4_i32_48 : i32
    %c1_i32_49 = arith.constant 1 : i32
    %23 = scf.for %arg13 = %c0_i32_47 to %22 step %c1_i32_49 iter_args(%arg14 = %21) -> (vector<8x128xf32>)  : i32 {
      %cst_59 = arith.constant 0.000000e+00 : f32
      %33 = vector.broadcast %cst_59 : f32 to vector<32x128xf32>
      %c0_i32_60 = arith.constant 0 : i32
      %34 = arith.addi %arg13, %c0_i32_60 : i32
      %35 = arith.index_cast %34 : i32 to index
      %c0_61 = arith.constant 0 : index
      %c0_62 = arith.constant 0 : index
      %c0_63 = arith.constant 0 : index
      %36 = vector.load %arg12[%35, %c0_61, %c0_62, %c0_63] : memref<6x6x8x128xbf16, #tpu.memory_space<vmem>>, vector<1x4x8x128xbf16>
      %37 = vector.shape_cast %36 : vector<1x4x8x128xbf16> to vector<32x128xbf16>
      %c0_64 = arith.constant 0 : index
      %c0_65 = arith.constant 0 : index
      %c0_66 = arith.constant 0 : index
      %38 = vector.load %arg6[%c0_64, %c0_65, %c0_66] : memref<9x128x128xbf16, #tpu.memory_space<vmem>>, vector<1x128x128xbf16>
      %39 = vector.shape_cast %38 : vector<1x128x128xbf16> to vector<128x128xbf16>
      %cst_67 = arith.constant dense<0.000000e+00> : vector<32x128xf32>
      %40 = tpu.matmul %37, %39, %cst_67 {dimension_numbers = #tpu.dot_dimension_numbers<[1], [0], [0], [1], [0, 0, 1, 1], [], []>} : vector<32x128xbf16>, vector<128x128xbf16>, vector<32x128xf32> -> vector<32x128xf32>
      %41 = arith.addf %33, %40 : vector<32x128xf32>
      %c0_i32_68 = arith.constant 0 : i32
      %42 = arith.addi %arg13, %c0_i32_68 : i32
      %43 = arith.index_cast %42 : i32 to index
      %c1 = arith.constant 1 : index
      %c0_69 = arith.constant 0 : index
      %c0_70 = arith.constant 0 : index
      %44 = vector.load %arg12[%43, %c1, %c0_69, %c0_70] : memref<6x6x8x128xbf16, #tpu.memory_space<vmem>>, vector<1x4x8x128xbf16>
      %45 = vector.shape_cast %44 : vector<1x4x8x128xbf16> to vector<32x128xbf16>
      %c1_71 = arith.constant 1 : index
      %c0_72 = arith.constant 0 : index
      %c0_73 = arith.constant 0 : index
      %46 = vector.load %arg6[%c1_71, %c0_72, %c0_73] : memref<9x128x128xbf16, #tpu.memory_space<vmem>>, vector<1x128x128xbf16>
      %47 = vector.shape_cast %46 : vector<1x128x128xbf16> to vector<128x128xbf16>
      %cst_74 = arith.constant dense<0.000000e+00> : vector<32x128xf32>
      %48 = tpu.matmul %45, %47, %cst_74 {dimension_numbers = #tpu.dot_dimension_numbers<[1], [0], [0], [1], [0, 0, 1, 1], [], []>} : vector<32x128xbf16>, vector<128x128xbf16>, vector<32x128xf32> -> vector<32x128xf32>
      %49 = arith.addf %41, %48 : vector<32x128xf32>
      %c0_i32_75 = arith.constant 0 : i32
      %50 = arith.addi %arg13, %c0_i32_75 : i32
      %51 = arith.index_cast %50 : i32 to index
      %c2 = arith.constant 2 : index
      %c0_76 = arith.constant 0 : index
      %c0_77 = arith.constant 0 : index
      %52 = vector.load %arg12[%51, %c2, %c0_76, %c0_77] : memref<6x6x8x128xbf16, #tpu.memory_space<vmem>>, vector<1x4x8x128xbf16>
      %53 = vector.shape_cast %52 : vector<1x4x8x128xbf16> to vector<32x128xbf16>
      %c2_78 = arith.constant 2 : index
      %c0_79 = arith.constant 0 : index
      %c0_80 = arith.constant 0 : index
      %54 = vector.load %arg6[%c2_78, %c0_79, %c0_80] : memref<9x128x128xbf16, #tpu.memory_space<vmem>>, vector<1x128x128xbf16>
      %55 = vector.shape_cast %54 : vector<1x128x128xbf16> to vector<128x128xbf16>
      %cst_81 = arith.constant dense<0.000000e+00> : vector<32x128xf32>
      %56 = tpu.matmul %53, %55, %cst_81 {dimension_numbers = #tpu.dot_dimension_numbers<[1], [0], [0], [1], [0, 0, 1, 1], [], []>} : vector<32x128xbf16>, vector<128x128xbf16>, vector<32x128xf32> -> vector<32x128xf32>
      %57 = arith.addf %49, %56 : vector<32x128xf32>
      %c1_i32_82 = arith.constant 1 : i32
      %58 = arith.addi %arg13, %c1_i32_82 : i32
      %59 = arith.index_cast %58 : i32 to index
      %c0_83 = arith.constant 0 : index
      %c0_84 = arith.constant 0 : index
      %c0_85 = arith.constant 0 : index
      %60 = vector.load %arg12[%59, %c0_83, %c0_84, %c0_85] : memref<6x6x8x128xbf16, #tpu.memory_space<vmem>>, vector<1x4x8x128xbf16>
      %61 = vector.shape_cast %60 : vector<1x4x8x128xbf16> to vector<32x128xbf16>
      %c3 = arith.constant 3 : index
      %c0_86 = arith.constant 0 : index
      %c0_87 = arith.constant 0 : index
      %62 = vector.load %arg6[%c3, %c0_86, %c0_87] : memref<9x128x128xbf16, #tpu.memory_space<vmem>>, vector<1x128x128xbf16>
      %63 = vector.shape_cast %62 : vector<1x128x128xbf16> to vector<128x128xbf16>
      %cst_88 = arith.constant dense<0.000000e+00> : vector<32x128xf32>
      %64 = tpu.matmul %61, %63, %cst_88 {dimension_numbers = #tpu.dot_dimension_numbers<[1], [0], [0], [1], [0, 0, 1, 1], [], []>} : vector<32x128xbf16>, vector<128x128xbf16>, vector<32x128xf32> -> vector<32x128xf32>
      %65 = arith.addf %57, %64 : vector<32x128xf32>
      %c1_i32_89 = arith.constant 1 : i32
      %66 = arith.addi %arg13, %c1_i32_89 : i32
      %67 = arith.index_cast %66 : i32 to index
      %c1_90 = arith.constant 1 : index
      %c0_91 = arith.constant 0 : index
      %c0_92 = arith.constant 0 : index
      %68 = vector.load %arg12[%67, %c1_90, %c0_91, %c0_92] : memref<6x6x8x128xbf16, #tpu.memory_space<vmem>>, vector<1x4x8x128xbf16>
      %69 = vector.shape_cast %68 : vector<1x4x8x128xbf16> to vector<32x128xbf16>
      %c4 = arith.constant 4 : index
      %c0_93 = arith.constant 0 : index
      %c0_94 = arith.constant 0 : index
      %70 = vector.load %arg6[%c4, %c0_93, %c0_94] : memref<9x128x128xbf16, #tpu.memory_space<vmem>>, vector<1x128x128xbf16>
      %71 = vector.shape_cast %70 : vector<1x128x128xbf16> to vector<128x128xbf16>
      %cst_95 = arith.constant dense<0.000000e+00> : vector<32x128xf32>
      %72 = tpu.matmul %69, %71, %cst_95 {dimension_numbers = #tpu.dot_dimension_numbers<[1], [0], [0], [1], [0, 0, 1, 1], [], []>} : vector<32x128xbf16>, vector<128x128xbf16>, vector<32x128xf32> -> vector<32x128xf32>
      %73 = arith.addf %65, %72 : vector<32x128xf32>
      %c1_i32_96 = arith.constant 1 : i32
      %74 = arith.addi %arg13, %c1_i32_96 : i32
      %75 = arith.index_cast %74 : i32 to index
      %c2_97 = arith.constant 2 : index
      %c0_98 = arith.constant 0 : index
      %c0_99 = arith.constant 0 : index
      %76 = vector.load %arg12[%75, %c2_97, %c0_98, %c0_99] : memref<6x6x8x128xbf16, #tpu.memory_space<vmem>>, vector<1x4x8x128xbf16>
      %77 = vector.shape_cast %76 : vector<1x4x8x128xbf16> to vector<32x128xbf16>
      %c5_100 = arith.constant 5 : index
      %c0_101 = arith.constant 0 : index
      %c0_102 = arith.constant 0 : index
      %78 = vector.load %arg6[%c5_100, %c0_101, %c0_102] : memref<9x128x128xbf16, #tpu.memory_space<vmem>>, vector<1x128x128xbf16>
      %79 = vector.shape_cast %78 : vector<1x128x128xbf16> to vector<128x128xbf16>
      %cst_103 = arith.constant dense<0.000000e+00> : vector<32x128xf32>
      %80 = tpu.matmul %77, %79, %cst_103 {dimension_numbers = #tpu.dot_dimension_numbers<[1], [0], [0], [1], [0, 0, 1, 1], [], []>} : vector<32x128xbf16>, vector<128x128xbf16>, vector<32x128xf32> -> vector<32x128xf32>
      %81 = arith.addf %73, %80 : vector<32x128xf32>
      %c2_i32 = arith.constant 2 : i32
      %82 = arith.addi %arg13, %c2_i32 : i32
      %83 = arith.index_cast %82 : i32 to index
      %c0_104 = arith.constant 0 : index
      %c0_105 = arith.constant 0 : index
      %c0_106 = arith.constant 0 : index
      %84 = vector.load %arg12[%83, %c0_104, %c0_105, %c0_106] : memref<6x6x8x128xbf16, #tpu.memory_space<vmem>>, vector<1x4x8x128xbf16>
      %85 = vector.shape_cast %84 : vector<1x4x8x128xbf16> to vector<32x128xbf16>
      %c6 = arith.constant 6 : index
      %c0_107 = arith.constant 0 : index
      %c0_108 = arith.constant 0 : index
      %86 = vector.load %arg6[%c6, %c0_107, %c0_108] : memref<9x128x128xbf16, #tpu.memory_space<vmem>>, vector<1x128x128xbf16>
      %87 = vector.shape_cast %86 : vector<1x128x128xbf16> to vector<128x128xbf16>
      %cst_109 = arith.constant dense<0.000000e+00> : vector<32x128xf32>
      %88 = tpu.matmul %85, %87, %cst_109 {dimension_numbers = #tpu.dot_dimension_numbers<[1], [0], [0], [1], [0, 0, 1, 1], [], []>} : vector<32x128xbf16>, vector<128x128xbf16>, vector<32x128xf32> -> vector<32x128xf32>
      %89 = arith.addf %81, %88 : vector<32x128xf32>
      %c2_i32_110 = arith.constant 2 : i32
      %90 = arith.addi %arg13, %c2_i32_110 : i32
      %91 = arith.index_cast %90 : i32 to index
      %c1_111 = arith.constant 1 : index
      %c0_112 = arith.constant 0 : index
      %c0_113 = arith.constant 0 : index
      %92 = vector.load %arg12[%91, %c1_111, %c0_112, %c0_113] : memref<6x6x8x128xbf16, #tpu.memory_space<vmem>>, vector<1x4x8x128xbf16>
      %93 = vector.shape_cast %92 : vector<1x4x8x128xbf16> to vector<32x128xbf16>
      %c7 = arith.constant 7 : index
      %c0_114 = arith.constant 0 : index
      %c0_115 = arith.constant 0 : index
      %94 = vector.load %arg6[%c7, %c0_114, %c0_115] : memref<9x128x128xbf16, #tpu.memory_space<vmem>>, vector<1x128x128xbf16>
      %95 = vector.shape_cast %94 : vector<1x128x128xbf16> to vector<128x128xbf16>
      %cst_116 = arith.constant dense<0.000000e+00> : vector<32x128xf32>
      %96 = tpu.matmul %93, %95, %cst_116 {dimension_numbers = #tpu.dot_dimension_numbers<[1], [0], [0], [1], [0, 0, 1, 1], [], []>} : vector<32x128xbf16>, vector<128x128xbf16>, vector<32x128xf32> -> vector<32x128xf32>
      %97 = arith.addf %89, %96 : vector<32x128xf32>
      %c2_i32_117 = arith.constant 2 : i32
      %98 = arith.addi %arg13, %c2_i32_117 : i32
      %99 = arith.index_cast %98 : i32 to index
      %c2_118 = arith.constant 2 : index
      %c0_119 = arith.constant 0 : index
      %c0_120 = arith.constant 0 : index
      %100 = vector.load %arg12[%99, %c2_118, %c0_119, %c0_120] : memref<6x6x8x128xbf16, #tpu.memory_space<vmem>>, vector<1x4x8x128xbf16>
      %101 = vector.shape_cast %100 : vector<1x4x8x128xbf16> to vector<32x128xbf16>
      %c8 = arith.constant 8 : index
      %c0_121 = arith.constant 0 : index
      %c0_122 = arith.constant 0 : index
      %102 = vector.load %arg6[%c8, %c0_121, %c0_122] : memref<9x128x128xbf16, #tpu.memory_space<vmem>>, vector<1x128x128xbf16>
      %103 = vector.shape_cast %102 : vector<1x128x128xbf16> to vector<128x128xbf16>
      %cst_123 = arith.constant dense<0.000000e+00> : vector<32x128xf32>
      %104 = tpu.matmul %101, %103, %cst_123 {dimension_numbers = #tpu.dot_dimension_numbers<[1], [0], [0], [1], [0, 0, 1, 1], [], []>} : vector<32x128xbf16>, vector<128x128xbf16>, vector<32x128xf32> -> vector<32x128xf32>
      %105 = arith.addf %97, %104 : vector<32x128xf32>
      %106 = vector.broadcast %20 : vector<1x128xf32> to vector<32x128xf32>
      %107 = arith.addf %105, %106 : vector<32x128xf32>
      %cst_124 = arith.constant 0.000000e+00 : f32
      %108 = vector.broadcast %cst_124 : f32 to vector<32x128xf32>
      %109 = arith.maximumf %107, %108 : vector<32x128xf32>
      %110 = vector.shape_cast %109 : vector<32x128xf32> to vector<4x8x128xf32>
      %cst_125 = arith.constant dense<0.000000e+00> : vector<8x128xf32>
      %111 = vector.multi_reduction <add>, %110, %cst_125 [0] : vector<4x8x128xf32> to vector<8x128xf32>
      %112 = arith.addf %arg14, %111 : vector<8x128xf32>
      scf.yield %112 : vector<8x128xf32>
    }
    %c4_i32_50 = arith.constant 4 : i32
    %cst_51 = arith.constant 6.250000e-02 : f32
    %24 = vector.broadcast %cst_51 : f32 to vector<8x128xf32>
    %25 = arith.mulf %23, %24 : vector<8x128xf32>
    %26 = arith.truncf %25 : vector<8x128xf32> to vector<8x128xbf16>
    %c0_52 = arith.constant 0 : index
    %c0_53 = arith.constant 0 : index
    %27 = vector.load %arg8[%c0_52, %c0_53] : memref<128x512xbf16, #tpu.memory_space<vmem>>, vector<128x512xbf16>
    %cst_54 = arith.constant dense<0.000000e+00> : vector<8x512xf32>
    %28 = tpu.matmul %26, %27, %cst_54 {dimension_numbers = #tpu.dot_dimension_numbers<[1], [0], [0], [1], [0, 0, 1, 1], [], []>} : vector<8x128xbf16>, vector<128x512xbf16>, vector<8x512xf32> -> vector<8x512xf32>
    %c0_55 = arith.constant 0 : index
    %c0_56 = arith.constant 0 : index
    %29 = vector.load %arg9[%c0_55, %c0_56] : memref<1x512xf32, #tpu.memory_space<vmem>>, vector<1x512xf32>
    %30 = vector.broadcast %29 : vector<1x512xf32> to vector<8x512xf32>
    %31 = arith.addf %28, %30 : vector<8x512xf32>
    %c0_57 = arith.constant 0 : index
    %c0_58 = arith.constant 0 : index
    %32 = vector.load %arg10[%c0_57, %c0_58] : memref<8x512xf32, #tpu.memory_space<vmem>>, vector<8x512xf32>
    tpu.vector_store %arg10[%c0_57, %c0_58], %31 {strides = array<i32>} : memref<8x512xf32, #tpu.memory_space<vmem>>, vector<8x512xf32>,
    return
  }
  func.func @transform_0(%arg0: i32) -> (i32, i32, i32, i32) {
    %c0_i32 = arith.constant 0 : i32
    %c0_i32_0 = arith.constant 0 : i32
    %c0_i32_1 = arith.constant 0 : i32
    %c0_i32_2 = arith.constant 0 : i32
    return %c0_i32, %c0_i32_0, %arg0, %c0_i32_1 : i32, i32, i32, i32
  }
  func.func @transform_1(%arg0: i32) -> (i32, i32, i32) {
    %c0_i32 = arith.constant 0 : i32
    %c0_i32_0 = arith.constant 0 : i32
    %c0_i32_1 = arith.constant 0 : i32
    %c0_i32_2 = arith.constant 0 : i32
    return %c0_i32, %c0_i32_0, %c0_i32_1 : i32, i32, i32
  }
  func.func @transform_2(%arg0: i32) -> (i32, i32) {
    %c0_i32 = arith.constant 0 : i32
    %c0_i32_0 = arith.constant 0 : i32
    %c0_i32_1 = arith.constant 0 : i32
    return %c0_i32, %c0_i32_0 : i32, i32
  }
  func.func @transform_3(%arg0: i32) -> (i32, i32, i32) {
    %c0_i32 = arith.constant 0 : i32
    %c0_i32_0 = arith.constant 0 : i32
    %c0_i32_1 = arith.constant 0 : i32
    %c0_i32_2 = arith.constant 0 : i32
    return %c0_i32, %c0_i32_0, %c0_i32_1 : i32, i32, i32
  }
  func.func @transform_4(%arg0: i32) -> (i32, i32) {
    %c0_i32 = arith.constant 0 : i32
    %c0_i32_0 = arith.constant 0 : i32
    %c0_i32_1 = arith.constant 0 : i32
    return %c0_i32, %c0_i32_0 : i32, i32
  }
  func.func @transform_5(%arg0: i32) -> (i32, i32, i32) {
    %c0_i32 = arith.constant 0 : i32
    %c0_i32_0 = arith.constant 0 : i32
    %c0_i32_1 = arith.constant 0 : i32
    %c0_i32_2 = arith.constant 0 : i32
    return %c0_i32, %c0_i32_0, %c0_i32_1 : i32, i32, i32
  }
  func.func @transform_6(%arg0: i32) -> (i32, i32) {
    %c0_i32 = arith.constant 0 : i32
    %c0_i32_0 = arith.constant 0 : i32
    %c0_i32_1 = arith.constant 0 : i32
    return %c0_i32, %c0_i32_0 : i32, i32
  }
  func.func @transform_7(%arg0: i32) -> (i32, i32) {
    %c0_i32 = arith.constant 0 : i32
    %c0_i32_0 = arith.constant 0 : i32
    %c0_i32_1 = arith.constant 0 : i32
    return %c0_i32, %c0_i32_0 : i32, i32
  }
  func.func @transform_8(%arg0: i32) -> (i32, i32) {
    %c0_i32 = arith.constant 0 : i32
    %c0_i32_0 = arith.constant 0 : i32
    %c0_i32_1 = arith.constant 0 : i32
    return %c0_i32, %c0_i32_0 : i32, i32
  }
  func.func @transform_9(%arg0: i32) -> (i32, i32) {
    %c0_i32 = arith.constant 0 : i32
    %c0_i32_0 = arith.constant 0 : i32
    return %arg0, %c0_i32 : i32, i32
  }
}

module attributes {stable_mosaic.version = 11 : i64} {
  func.func @_lstm_fc_kernel(%arg0: memref<4x8x512xf32, #tpu.memory_space<vmem>>, %arg1: memref<128x512xf32, #tpu.memory_space<vmem>>, %arg2: memref<8x7xf32, #tpu.memory_space<vmem>>, %arg3: memref<128x2xf32, #tpu.memory_space<vmem>>, %arg4: memref<7x2xf32, #tpu.memory_space<vmem>>, %arg5: memref<1x2xf32, #tpu.memory_space<vmem>>, %arg6: memref<2x2xf32, #tpu.memory_space<vmem>>) attributes {dimension_semantics = [], scalar_prefetch = 0 : i64, scratch_operands = 0 : i64, tpu.core_type = #tpu.core_type<tc>} {
    %c0 = arith.constant 0 : index
    %c0_0 = arith.constant 0 : index
    %0 = vector.load %arg1[%c0, %c0_0] : memref<128x512xf32, #tpu.memory_space<vmem>>, vector<128x512xf32>
    %cst = arith.constant 0.000000e+00 : f32
    %1 = vector.broadcast %cst : f32 to vector<8x128xf32>
    %cst_1 = arith.constant 0.000000e+00 : f32
    %2 = vector.broadcast %cst_1 : f32 to vector<8x128xf32>
    %c0_2 = arith.constant 0 : index
    %c0_3 = arith.constant 0 : index
    %c0_4 = arith.constant 0 : index
    %3 = vector.load %arg0[%c0_2, %c0_3, %c0_4] : memref<4x8x512xf32, #tpu.memory_space<vmem>>, vector<1x8x512xf32>
    %4 = vector.shape_cast %3 : vector<1x8x512xf32> to vector<8x512xf32>
    %cst_5 = arith.constant dense<0.000000e+00> : vector<8x512xf32>
    %5 = tpu.matmul %1, %0, %cst_5 {dimension_numbers = #tpu.dot_dimension_numbers<[1], [0], [0], [1], [0, 0, 1, 1], [], []>} : vector<8x128xf32>, vector<128x512xf32>, vector<8x512xf32> -> vector<8x512xf32>
    %6 = arith.addf %4, %5 : vector<8x512xf32>
    %7 = vector.extract_strided_slice %6 {offsets = [0, 0], sizes = [8, 128], strides = [1, 1]} : vector<8x512xf32> to vector<8x128xf32>
    %8 = arith.negf %7 : vector<8x128xf32>
    %9 = math.exp %8 : vector<8x128xf32>
    %cst_6 = arith.constant 1.000000e+00 : f32
    %10 = vector.broadcast %cst_6 : f32 to vector<8x128xf32>
    %11 = arith.addf %10, %9 : vector<8x128xf32>
    %12 = arith.divf %10, %11 : vector<8x128xf32>
    %13 = vector.extract_strided_slice %6 {offsets = [0, 128], sizes = [8, 128], strides = [1, 1]} : vector<8x512xf32> to vector<8x128xf32>
    %14 = arith.negf %13 : vector<8x128xf32>
    %15 = math.exp %14 : vector<8x128xf32>
    %cst_7 = arith.constant 1.000000e+00 : f32
    %16 = vector.broadcast %cst_7 : f32 to vector<8x128xf32>
    %17 = arith.addf %16, %15 : vector<8x128xf32>
    %18 = arith.divf %16, %17 : vector<8x128xf32>
    %19 = vector.extract_strided_slice %6 {offsets = [0, 256], sizes = [8, 128], strides = [1, 1]} : vector<8x512xf32> to vector<8x128xf32>
    %20 = math.tanh %19 : vector<8x128xf32>
    %21 = vector.extract_strided_slice %6 {offsets = [0, 384], sizes = [8, 128], strides = [1, 1]} : vector<8x512xf32> to vector<8x128xf32>
    %22 = arith.negf %21 : vector<8x128xf32>
    %23 = math.exp %22 : vector<8x128xf32>
    %cst_8 = arith.constant 1.000000e+00 : f32
    %24 = vector.broadcast %cst_8 : f32 to vector<8x128xf32>
    %25 = arith.addf %24, %23 : vector<8x128xf32>
    %26 = arith.divf %24, %25 : vector<8x128xf32>
    %27 = arith.mulf %18, %2 : vector<8x128xf32>
    %28 = arith.mulf %12, %20 : vector<8x128xf32>
    %29 = arith.addf %27, %28 : vector<8x128xf32>
    %30 = math.tanh %29 : vector<8x128xf32>
    %31 = arith.mulf %26, %30 : vector<8x128xf32>
    %c1 = arith.constant 1 : index
    %c0_9 = arith.constant 0 : index
    %c0_10 = arith.constant 0 : index
    %32 = vector.load %arg0[%c1, %c0_9, %c0_10] : memref<4x8x512xf32, #tpu.memory_space<vmem>>, vector<1x8x512xf32>
    %33 = vector.shape_cast %32 : vector<1x8x512xf32> to vector<8x512xf32>
    %cst_11 = arith.constant dense<0.000000e+00> : vector<8x512xf32>
    %34 = tpu.matmul %31, %0, %cst_11 {dimension_numbers = #tpu.dot_dimension_numbers<[1], [0], [0], [1], [0, 0, 1, 1], [], []>} : vector<8x128xf32>, vector<128x512xf32>, vector<8x512xf32> -> vector<8x512xf32>
    %35 = arith.addf %33, %34 : vector<8x512xf32>
    %36 = vector.extract_strided_slice %35 {offsets = [0, 0], sizes = [8, 128], strides = [1, 1]} : vector<8x512xf32> to vector<8x128xf32>
    %37 = arith.negf %36 : vector<8x128xf32>
    %38 = math.exp %37 : vector<8x128xf32>
    %cst_12 = arith.constant 1.000000e+00 : f32
    %39 = vector.broadcast %cst_12 : f32 to vector<8x128xf32>
    %40 = arith.addf %39, %38 : vector<8x128xf32>
    %41 = arith.divf %39, %40 : vector<8x128xf32>
    %42 = vector.extract_strided_slice %35 {offsets = [0, 128], sizes = [8, 128], strides = [1, 1]} : vector<8x512xf32> to vector<8x128xf32>
    %43 = arith.negf %42 : vector<8x128xf32>
    %44 = math.exp %43 : vector<8x128xf32>
    %cst_13 = arith.constant 1.000000e+00 : f32
    %45 = vector.broadcast %cst_13 : f32 to vector<8x128xf32>
    %46 = arith.addf %45, %44 : vector<8x128xf32>
    %47 = arith.divf %45, %46 : vector<8x128xf32>
    %48 = vector.extract_strided_slice %35 {offsets = [0, 256], sizes = [8, 128], strides = [1, 1]} : vector<8x512xf32> to vector<8x128xf32>
    %49 = math.tanh %48 : vector<8x128xf32>
    %50 = vector.extract_strided_slice %35 {offsets = [0, 384], sizes = [8, 128], strides = [1, 1]} : vector<8x512xf32> to vector<8x128xf32>
    %51 = arith.negf %50 : vector<8x128xf32>
    %52 = math.exp %51 : vector<8x128xf32>
    %cst_14 = arith.constant 1.000000e+00 : f32
    %53 = vector.broadcast %cst_14 : f32 to vector<8x128xf32>
    %54 = arith.addf %53, %52 : vector<8x128xf32>
    %55 = arith.divf %53, %54 : vector<8x128xf32>
    %56 = arith.mulf %47, %29 : vector<8x128xf32>
    %57 = arith.mulf %41, %49 : vector<8x128xf32>
    %58 = arith.addf %56, %57 : vector<8x128xf32>
    %59 = math.tanh %58 : vector<8x128xf32>
    %60 = arith.mulf %55, %59 : vector<8x128xf32>
    %c2 = arith.constant 2 : index
    %c0_15 = arith.constant 0 : index
    %c0_16 = arith.constant 0 : index
    %61 = vector.load %arg0[%c2, %c0_15, %c0_16] : memref<4x8x512xf32, #tpu.memory_space<vmem>>, vector<1x8x512xf32>
    %62 = vector.shape_cast %61 : vector<1x8x512xf32> to vector<8x512xf32>
    %cst_17 = arith.constant dense<0.000000e+00> : vector<8x512xf32>
    %63 = tpu.matmul %60, %0, %cst_17 {dimension_numbers = #tpu.dot_dimension_numbers<[1], [0], [0], [1], [0, 0, 1, 1], [], []>} : vector<8x128xf32>, vector<128x512xf32>, vector<8x512xf32> -> vector<8x512xf32>
    %64 = arith.addf %62, %63 : vector<8x512xf32>
    %65 = vector.extract_strided_slice %64 {offsets = [0, 0], sizes = [8, 128], strides = [1, 1]} : vector<8x512xf32> to vector<8x128xf32>
    %66 = arith.negf %65 : vector<8x128xf32>
    %67 = math.exp %66 : vector<8x128xf32>
    %cst_18 = arith.constant 1.000000e+00 : f32
    %68 = vector.broadcast %cst_18 : f32 to vector<8x128xf32>
    %69 = arith.addf %68, %67 : vector<8x128xf32>
    %70 = arith.divf %68, %69 : vector<8x128xf32>
    %71 = vector.extract_strided_slice %64 {offsets = [0, 128], sizes = [8, 128], strides = [1, 1]} : vector<8x512xf32> to vector<8x128xf32>
    %72 = arith.negf %71 : vector<8x128xf32>
    %73 = math.exp %72 : vector<8x128xf32>
    %cst_19 = arith.constant 1.000000e+00 : f32
    %74 = vector.broadcast %cst_19 : f32 to vector<8x128xf32>
    %75 = arith.addf %74, %73 : vector<8x128xf32>
    %76 = arith.divf %74, %75 : vector<8x128xf32>
    %77 = vector.extract_strided_slice %64 {offsets = [0, 256], sizes = [8, 128], strides = [1, 1]} : vector<8x512xf32> to vector<8x128xf32>
    %78 = math.tanh %77 : vector<8x128xf32>
    %79 = vector.extract_strided_slice %64 {offsets = [0, 384], sizes = [8, 128], strides = [1, 1]} : vector<8x512xf32> to vector<8x128xf32>
    %80 = arith.negf %79 : vector<8x128xf32>
    %81 = math.exp %80 : vector<8x128xf32>
    %cst_20 = arith.constant 1.000000e+00 : f32
    %82 = vector.broadcast %cst_20 : f32 to vector<8x128xf32>
    %83 = arith.addf %82, %81 : vector<8x128xf32>
    %84 = arith.divf %82, %83 : vector<8x128xf32>
    %85 = arith.mulf %76, %58 : vector<8x128xf32>
    %86 = arith.mulf %70, %78 : vector<8x128xf32>
    %87 = arith.addf %85, %86 : vector<8x128xf32>
    %88 = math.tanh %87 : vector<8x128xf32>
    %89 = arith.mulf %84, %88 : vector<8x128xf32>
    %c3 = arith.constant 3 : index
    %c0_21 = arith.constant 0 : index
    %c0_22 = arith.constant 0 : index
    %90 = vector.load %arg0[%c3, %c0_21, %c0_22] : memref<4x8x512xf32, #tpu.memory_space<vmem>>, vector<1x8x512xf32>
    %91 = vector.shape_cast %90 : vector<1x8x512xf32> to vector<8x512xf32>
    %cst_23 = arith.constant dense<0.000000e+00> : vector<8x512xf32>
    %92 = tpu.matmul %89, %0, %cst_23 {dimension_numbers = #tpu.dot_dimension_numbers<[1], [0], [0], [1], [0, 0, 1, 1], [], []>} : vector<8x128xf32>, vector<128x512xf32>, vector<8x512xf32> -> vector<8x512xf32>
    %93 = arith.addf %91, %92 : vector<8x512xf32>
    %94 = vector.extract_strided_slice %93 {offsets = [0, 0], sizes = [8, 128], strides = [1, 1]} : vector<8x512xf32> to vector<8x128xf32>
    %95 = arith.negf %94 : vector<8x128xf32>
    %96 = math.exp %95 : vector<8x128xf32>
    %cst_24 = arith.constant 1.000000e+00 : f32
    %97 = vector.broadcast %cst_24 : f32 to vector<8x128xf32>
    %98 = arith.addf %97, %96 : vector<8x128xf32>
    %99 = arith.divf %97, %98 : vector<8x128xf32>
    %100 = vector.extract_strided_slice %93 {offsets = [0, 128], sizes = [8, 128], strides = [1, 1]} : vector<8x512xf32> to vector<8x128xf32>
    %101 = arith.negf %100 : vector<8x128xf32>
    %102 = math.exp %101 : vector<8x128xf32>
    %cst_25 = arith.constant 1.000000e+00 : f32
    %103 = vector.broadcast %cst_25 : f32 to vector<8x128xf32>
    %104 = arith.addf %103, %102 : vector<8x128xf32>
    %105 = arith.divf %103, %104 : vector<8x128xf32>
    %106 = vector.extract_strided_slice %93 {offsets = [0, 256], sizes = [8, 128], strides = [1, 1]} : vector<8x512xf32> to vector<8x128xf32>
    %107 = math.tanh %106 : vector<8x128xf32>
    %108 = vector.extract_strided_slice %93 {offsets = [0, 384], sizes = [8, 128], strides = [1, 1]} : vector<8x512xf32> to vector<8x128xf32>
    %109 = arith.negf %108 : vector<8x128xf32>
    %110 = math.exp %109 : vector<8x128xf32>
    %cst_26 = arith.constant 1.000000e+00 : f32
    %111 = vector.broadcast %cst_26 : f32 to vector<8x128xf32>
    %112 = arith.addf %111, %110 : vector<8x128xf32>
    %113 = arith.divf %111, %112 : vector<8x128xf32>
    %114 = arith.mulf %105, %87 : vector<8x128xf32>
    %115 = arith.mulf %99, %107 : vector<8x128xf32>
    %116 = arith.addf %114, %115 : vector<8x128xf32>
    %117 = math.tanh %116 : vector<8x128xf32>
    %118 = arith.mulf %113, %117 : vector<8x128xf32>
    %c0_27 = arith.constant 0 : index
    %c0_28 = arith.constant 0 : index
    %119 = vector.load %arg3[%c0_27, %c0_28] : memref<128x2xf32, #tpu.memory_space<vmem>>, vector<128x2xf32>
    %cst_29 = arith.constant dense<0.000000e+00> : vector<8x2xf32>
    %120 = tpu.matmul %118, %119, %cst_29 {dimension_numbers = #tpu.dot_dimension_numbers<[1], [0], [0], [1], [0, 0, 1, 1], [], []>} : vector<8x128xf32>, vector<128x2xf32>, vector<8x2xf32> -> vector<8x2xf32>
    %c0_30 = arith.constant 0 : index
    %c0_31 = arith.constant 0 : index
    %121 = vector.load %arg2[%c0_30, %c0_31] : memref<8x7xf32, #tpu.memory_space<vmem>>, vector<8x7xf32>
    %c0_32 = arith.constant 0 : index
    %c0_33 = arith.constant 0 : index
    %122 = vector.load %arg4[%c0_32, %c0_33] : memref<7x2xf32, #tpu.memory_space<vmem>>, vector<7x2xf32>
    %cst_34 = arith.constant dense<0.000000e+00> : vector<8x2xf32>
    %123 = tpu.matmul %121, %122, %cst_34 {dimension_numbers = #tpu.dot_dimension_numbers<[1], [0], [0], [1], [0, 0, 1, 1], [], []>} : vector<8x7xf32>, vector<7x2xf32>, vector<8x2xf32> -> vector<8x2xf32>
    %124 = arith.addf %120, %123 : vector<8x2xf32>
    %c0_35 = arith.constant 0 : index
    %c0_36 = arith.constant 0 : index
    %125 = vector.load %arg5[%c0_35, %c0_36] : memref<1x2xf32, #tpu.memory_space<vmem>>, vector<1x2xf32>
    %126 = vector.broadcast %125 : vector<1x2xf32> to vector<8x2xf32>
    %127 = arith.addf %124, %126 : vector<8x2xf32>
    %128 = vector.extract_strided_slice %127 {offsets = [0, 0], sizes = [2, 2], strides = [1, 1]} : vector<8x2xf32> to vector<2x2xf32>
    %c0_37 = arith.constant 0 : index
    %c0_38 = arith.constant 0 : index
    %129 = vector.load %arg6[%c0_37, %c0_38] : memref<2x2xf32, #tpu.memory_space<vmem>>, vector<2x2xf32>
    tpu.vector_store %arg6[%c0_37, %c0_38], %128 {strides = array<i32>} : memref<2x2xf32, #tpu.memory_space<vmem>>, vector<2x2xf32>,
    return
  }
}

</mosaic_0001>

<bundles_post_ra>
// kernel: drowsiness_cnn_lstm_forward.3
= control target key start
LH: loop header
LB: loop body
LE: loop exit
PB: predicated region body
PF: predicated region fallthrough
CT: control target
= control target key end

     0   :  { %v1435_v7 = vmov 0.0   ;;  %s2000_s0 = inlined_call_operand.vmem [shape: f32[4,8,512], index: 0, kind: input, shape index: {}]   ;;  %s2001_s1 = inlined_call_operand.vmem [shape: f32[128,512], index: 1, kind: input, shape index: {}]   ;;  %s2002_s2 = inlined_call_operand.vmem [shape: f32[8,7], index: 2, kind: input, shape index: {}]   ;;  %s2003_s3 = inlined_call_operand.vmem [shape: f32[128,2], index: 3, kind: input, shape index: {}]   ;;  %s2004_s4 = inlined_call_operand.vmem [shape: f32[7,2], index: 4, kind: input, shape index: {}]   ;;  %s2005_s5 = inlined_call_operand.vmem [shape: f32[1,2], index: 5, kind: input, shape index: {}]   ;;  %s2006_s6 = inlined_call_operand.hbm [shape: f32[2,2], index: 6, kind: output, shape index: {}]  }
   0x1   :  { %v25_v0 = vld [vmem:[%s2001_s1 + $0x8] sm:$0xff]  ;;  %v24_v2 = vld [vmem:[%s2001_s1] sm:$0xff]  ;;  %156 = vmatprep.mubr.f32.mxu0 %v1435_v7  ;;  %227 = vmatprep.mubr.f32.mxu1 %v1435_v7  ;;  %v27_v19 = vld [vmem:[%s2001_s1 + $0x18] sm:$0xff] }
   0x2   :  { %v29_v1 = vld [vmem:[%s2001_s1 + $0x28] sm:$0xff]  ;;  %v28_v4 = vld [vmem:[%s2001_s1 + $0x20] sm:$0xff]  ;;  %v31_v20 = vld [vmem:[%s2001_s1 + $0x38] sm:$0xff] }
   0x3   :  { %v1483_v3 = vpack.c.bf16 %v29_v1, %v25_v0  ;;  %v33_v5 = vld [vmem:[%s2001_s1 + $0x48] sm:$0xff]  ;;  %v1496_v8 = vpack.c.bf16 %v28_v4, %v24_v2  ;;  %v32_v10 = vld [vmem:[%s2001_s1 + $0x40] sm:$0xff]  ;;  %v1537_v22 = vpack.c.bf16 %v31_v20, %v27_v19  ;;  %v26_v23 = vld [vmem:[%s2001_s1 + $0x10] sm:$0xff] }
   0x4   :  { %v37_v6 = vld [vmem:[%s2001_s1 + $0x68] sm:$0xff]  ;;  %v36_v11 = vld [vmem:[%s2001_s1 + $0x60] sm:$0xff]  ;;  %v30_v24 = vld [vmem:[%s2001_s1 + $0x30] sm:$0xff] }
   0x5   :  { %v1498_v9 = vpack.c.bf16 %v37_v6, %v33_v5  ;;  %v41_v12 = vld [vmem:[%s2001_s1 + $0x88] sm:$0xff]  ;;  %1064 = vmatprep.subr.bf16.mxu0 %v1483_v3  ;;  %v1514_v14 = vpack.c.bf16 %v36_v11, %v32_v10  ;;  %v40_v15 = vld [vmem:[%s2001_s1 + $0x80] sm:$0xff]  ;;  %v1545_v25 = vpack.c.bf16 %v30_v24, %v26_v23  ;;  %1096 = vmatprep.subr.bf16.mxu1 %v1537_v22  ;;  %v35_v27 = vld [vmem:[%s2001_s1 + $0x58] sm:$0xff] }
   0x6   :  { %v45_v13 = vld [vmem:[%s2001_s1 + $0xa8] sm:$0xff]  ;;  %1066 = vmatpush1.bf16.msra.mxu0 %v1496_v8  ;;  %v44_v16 = vld [vmem:[%s2001_s1 + $0xa0] sm:$0xff]  ;;  %v39_v28 = vld [vmem:[%s2001_s1 + $0x78] sm:$0xff] }
   0x7   :  { %1068 = vmatprep.subr.bf16.mxu0 %v1498_v9  ;;  %v1523_v17 = vpack.c.bf16 %v45_v13, %v41_v12  ;;  %v49_v18 = vld [vmem:[%s2001_s1 + $0xc8] sm:$0xff]  ;;  %v1548_v26 = vpack.c.bf16 %v44_v16, %v40_v15  ;;  %v34_v29 = vld [vmem:[%s2001_s1 + $0x50] sm:$0xff]  ;;  %v48_v31 = vld [vmem:[%s2001_s1 + $0xc0] sm:$0xff]  ;;  %1098 = vmatpush1.bf16.msra.mxu1 %v1545_v25  ;;  %v1570_v33 = vpack.c.bf16 %v39_v28, %v35_v27 }
   0x8   :  { %v53_v21 = vld [vmem:[%s2001_s1 + $0xe8] sm:$0xff]  ;;  %v52_v32 = vld [vmem:[%s2001_s1 + $0xe0] sm:$0xff]  ;;  %v38_v34 = vld [vmem:[%s2001_s1 + $0x70] sm:$0xff] }
   0x9   :  { %v1561_v30 = vpack.c.bf16 %v53_v21, %v49_v18  ;;  %v57_v35 = vld [vmem:[%s2001_s1 + $0x108] sm:$0xff]  ;;  %v1581_v37 = vpack.c.bf16 %v38_v34, %v34_v29  ;;  %v43_v38 = vld [vmem:[%s2001_s1 + $0x98] sm:$0xff]  ;;  %1100 = vmatprep.subr.bf16.mxu1 %v1570_v33  ;;  %v42_v40 = vld [vmem:[%s2001_s1 + $0x90] sm:$0xff]  ;;  %v1597_v42 = vpack.c.bf16 %v52_v32, %v48_v31 }
   0xa   :  { %1070 = vmatpush1.bf16.msra.mxu0 %v1514_v14  ;;  %v61_v36 = vld [vmem:[%s2001_s1 + $0x128] sm:$0xff]  ;;  %v47_v39 = vld [vmem:[%s2001_s1 + $0xb8] sm:$0xff]  ;;  %v46_v41 = vld [vmem:[%s2001_s1 + $0xb0] sm:$0xff] }
   0xb   :  { %1072 = vmatprep.subr.bf16.mxu0 %v1523_v17  ;;  %v56_v43 = vld [vmem:[%s2001_s1 + $0x100] sm:$0xff]  ;;  %v1605_v45 = vpack.c.bf16 %v47_v39, %v43_v38  ;;  %v1608_v46 = vpack.c.bf16 %v61_v36, %v57_v35  ;;  %1102 = vmatpush1.bf16.msra.mxu1 %v1581_v37  ;;  %v65_v47 = vld [vmem:[%s2001_s1 + $0x148] sm:$0xff]  ;;  %v1614_v48 = vpack.c.bf16 %v46_v41, %v42_v40  ;;  %v51_v49 = vld [vmem:[%s2001_s1 + $0xd8] sm:$0xff] }
   0xc   :  { %v60_v44 = vld [vmem:[%s2001_s1 + $0x120] sm:$0xff]  ;;  %v55_v50 = vld [vmem:[%s2001_s1 + $0xf8] sm:$0xff]  ;;  %v69_v51 = vld [vmem:[%s2001_s1 + $0x168] sm:$0xff] }
   0xd   :  { %1104 = vmatprep.subr.bf16.mxu1 %v1605_v45  ;;  %v1626_v52 = vpack.c.bf16 %v55_v50, %v51_v49  ;;  %v50_v53 = vld [vmem:[%s2001_s1 + $0xd0] sm:$0xff]  ;;  %v1635_v55 = vpack.c.bf16 %v60_v44, %v56_v43  ;;  %v59_v56 = vld [vmem:[%s2001_s1 + $0x118] sm:$0xff]  ;;  %v1644_v58 = vpack.c.bf16 %v69_v51, %v65_v47  ;;  %v64_v59 = vld [vmem:[%s2001_s1 + $0x140] sm:$0xff] }
   0xe   :  { %1074 = vmatpush1.bf16.msra.mxu0 %v1548_v26  ;;  %v54_v54 = vld [vmem:[%s2001_s1 + $0xf0] sm:$0xff]  ;;  %v63_v57 = vld [vmem:[%s2001_s1 + $0x138] sm:$0xff]  ;;  %v68_v60 = vld [vmem:[%s2001_s1 + $0x160] sm:$0xff] }
   0xf   :  { %1076 = vmatprep.subr.bf16.mxu0 %v1561_v30  ;;  %1106 = vmatpush1.bf16.msra.mxu1 %v1614_v48  ;;  %v73_v61 = vld [vmem:[%s2001_s1 + $0x188] sm:$0xff]  ;;  %v1656_v62 = vpack.c.bf16 %v54_v54, %v50_v53  ;;  %v1662_v0 = vpack.c.bf16 %v63_v57, %v59_v56  ;;  %v58_v1 = vld [vmem:[%s2001_s1 + $0x110] sm:$0xff]  ;;  %v67_v4 = vld [vmem:[%s2001_s1 + $0x158] sm:$0xff]  ;;  %v1677_v6 = vpack.c.bf16 %v68_v60, %v64_v59 }
  0x10   :  { %v77_v63 = vld [vmem:[%s2001_s1 + $0x1a8] sm:$0xff]  ;;  %1108 = vmatprep.subr.bf16.mxu1 %v1626_v52  ;;  %v62_v2 = vld [vmem:[%s2001_s1 + $0x130] sm:$0xff]  ;;  %v71_v5 = vld [vmem:[%s2001_s1 + $0x178] sm:$0xff] }
  0x11   :  { %v72_v10 = vld [vmem:[%s2001_s1 + $0x180] sm:$0xff]  ;;  %v1683_v11 = vpack.c.bf16 %v77_v63, %v73_v61  ;;  %v81_v13 = vld [vmem:[%s2001_s1 + $0x1c8] sm:$0xff]  ;;  %v1692_v15 = vpack.c.bf16 %v62_v2, %v58_v1 }
  0x12   :  { %1078 = vmatpush1.bf16.msra.mxu0 %v1597_v42  ;;  %v76_v12 = vld [vmem:[%s2001_s1 + $0x1a0] sm:$0xff] }
  0x13   :  { %1080 = vmatprep.subr.bf16.mxu0 %v1608_v46  ;;  %1110 = vmatpush1.bf16.msra.mxu1 %v1656_v62 }
  0x16   :  { %1082 = vmatpush1.bf16.msra.mxu0 %v1635_v55 }
  0x17   :  { %1084 = vmatprep.subr.bf16.mxu0 %v1644_v58 }
  0x18   :  { %11 = vsyncpa [#allocation3], 0  ;;  %v85_v16 = vld [vmem:[%s2001_s1 + $0x1e8] sm:$0xff]  ;;  %1112 = vmatprep.subr.bf16.mxu1 %v1662_v0  ;;  %v1698_v18 = vpack.c.bf16 %v71_v5, %v67_v4  ;;  %v66_v19 = vld [vmem:[%s2001_s1 + $0x150] sm:$0xff]  ;;  %v1713_v24 = vpack.c.bf16 %v76_v12, %v72_v10  ;;  %vm809_vm0 = vcmask 1046528   ;;  %vm805_vm1 = vcmask 56320  }
  0x19   :  { %v70_v20 = vld [vmem:[%s2001_s1 + $0x170] sm:$0xff]  ;;  %v75_v21 = vld [vmem:[%s2001_s1 + $0x198] sm:$0xff]  ;;  %v1716_v27 = vpack.c.bf16 %v85_v16, %v81_v13  ;;  %v80_v28 = vld [vmem:[%s2001_s1 + $0x1c0] sm:$0xff]  ;;  %1114 = vmatpush1.bf16.msra.mxu1 %v1692_v15  ;;  %vm1437_vm2 = vmmov 0   ;;  %s1438_s20 = smov [#allocation2]   ;;  %vm961_vm3 = vcmask 9216  }
  0x1a   :  { %v79_v23 = vld [vmem:[%s2001_s1 + $0x1b8] sm:$0xff]  ;;  %1086 = vmatpush1.bf16.msra.mxu0 %v1677_v6  ;;  %v84_v29 = vld [vmem:[%s2001_s1 + $0x1e0] sm:$0xff]  ;;  %v1725_v31 = vpack.c.bf16 %v70_v20, %v66_v19  ;;  %1116 = vmatprep.subr.bf16.mxu1 %v1698_v18  ;;  %v74_v34 = vld [vmem:[%s2001_s1 + $0x190] sm:$0xff]  ;;  %s969_s21 = sshll.u32 %s1438_s20, 4  ;;  %s970_s21 = int_to_ptr.vmem [resolvable:$true] %s969_s21 }
  0x1b   :  { %1088 = vmatprep.subr.bf16.mxu0 %v1683_v11  ;;  %v1728_v32 = vpack.c.bf16 %v79_v23, %v75_v21  ;;  %v78_v35 = vld [vmem:[%s2001_s1 + $0x1b0] sm:$0xff]  ;;  %v83_v36 = vld [vmem:[%s2001_s1 + $0x1d8] sm:$0xff]  ;;  %v1743_v39 = vpack.c.bf16 %v84_v29, %v80_v28  ;;  %v88_v49 = vld [vmem:[%s2000_s0] sm:$0xff]  ;;  %s1411_s22 = scalar_lea.vmem %s970_s21, 32  ;;  %p1416_p1 = scmp.lt.s32.totalorder %s970_s21, %s970_s21 }
  0x1c   :  { %v87_v38 = vld [vmem:[%s2001_s1 + $0x1f8] sm:$0xff]  ;;  %v1747_v40 = vpack.c.bf16 %v78_v35, %v74_v34  ;;  %v82_v43 = vld [vmem:[%s2001_s1 + $0x1d0] sm:$0xff]  ;;  %v89_v50 = vld [vmem:[%s2000_s0 + $0x8] sm:$0xff]  ;;  %p1412_p0 = scmp.ne.s32.totalorder %s970_s21, %s1411_s22  ;;  %p1417_p2 = scmp.lt.s32.totalorder %s1411_s22, %s1411_s22 }
  0x1d   :  { %1118 = vmatpush1.bf16.msra.mxu1 %v1725_v31  ;;  %v1750_v41 = vpack.c.bf16 %v87_v38, %v83_v36  ;;  %v86_v44 = vld [vmem:[%s2001_s1 + $0x1f0] sm:$0xff]  ;;  %v91_v60 = vld [vmem:[%s2000_s0 + $0x18] sm:$0xff] }
  0x1e   :  { %1090 = vmatpush1.bf16.msra.mxu0 %v1713_v24  ;;  %1120 = vmatprep.subr.bf16.mxu1 %v1728_v32  ;;  %v1760_v47 = vpack.c.bf16 %v86_v44, %v82_v43  ;;  %v90_v2 = vld [vmem:[%s2000_s0 + $0x10] sm:$0xff]  ;;  %v980_v44 = vld [vmem:[%s2000_s0 + $0x20] sm:$0xff]  ;;  %p1418_p3 = por %p1417_p2, %p1416_p1 }
  0x1f   :  { %1092 = vmatprep.subr.bf16.mxu0 %v1716_v27 }
  0x20   :  { %p1419_p4 = pnand %p1418_p3, %p1412_p0 }
  0x21   :  { %1122 = vmatpush1.bf16.msra.mxu1 %v1747_v40 }
  0x22   :  { %1094 = vmatpush1.bf16.msra.mxu0 %v1743_v39  ;;  %1124 = vmatprep.subr.bf16.mxu1 %v1750_v41 }
  0x23   :  { %1128 = vmatprep.subr.bf16.mxu0 %v1483_v3 }
  0x25   :  { %157 = vmatmul.mubr.f32.vlgmr.msra.gmra.mrb[0].mxu0 %v1435_v7  ;;  %1126 = vmatpush1.bf16.msra.mxu1 %v1760_v47 }
  0x26   :  { %1130 = vmatpush1.bf16.msra.mxu0 %v1496_v8  ;;  %331 = vmatprep.mubr.f32.mxu0 %v1435_v7 }
  0x27   :  { %1132 = vmatprep.subr.bf16.mxu0 %v1498_v9  ;;  %1160 = vmatprep.subr.bf16.mxu1 %v1537_v22 }
  0x28   :  { %228 = vmatmul.mubr.f32.vlgmr.msra.gmra.mrb[0].mxu1 %v1435_v7 }
  0x29   :  { %1162 = vmatpush1.bf16.msra.mxu1 %v1545_v25  ;;  %402 = vmatprep.mubr.f32.mxu1 %v1435_v7 }
  0x2a   :  { %1134 = vmatpush1.bf16.msra.mxu0 %v1514_v14  ;;  %1164 = vmatprep.subr.bf16.mxu1 %v1570_v33 }
  0x2b   :  { %1136 = vmatprep.subr.bf16.mxu0 %v1523_v17 }
  0x2d   :  { %1166 = vmatpush1.bf16.msra.mxu1 %v1581_v37 }
  0x2e   :  { %1138 = vmatpush1.bf16.msra.mxu0 %v1548_v26  ;;  %1168 = vmatprep.subr.bf16.mxu1 %v1605_v45 }
  0x2f   :  { %1140 = vmatprep.subr.bf16.mxu0 %v1561_v30 }
  0x31   :  { %1170 = vmatpush1.bf16.msra.mxu1 %v1614_v48 }
  0x32   :  { %1142 = vmatpush1.bf16.msra.mxu0 %v1597_v42  ;;  %1172 = vmatprep.subr.bf16.mxu1 %v1626_v52 }
  0x33   :  { %1144 = vmatprep.subr.bf16.mxu0 %v1608_v46 }
  0x35   :  { %1174 = vmatpush1.bf16.msra.mxu1 %v1656_v62 }
  0x36   :  { %1146 = vmatpush1.bf16.msra.mxu0 %v1635_v55  ;;  %1176 = vmatprep.subr.bf16.mxu1 %v1662_v0 }
  0x37   :  { %1148 = vmatprep.subr.bf16.mxu0 %v1644_v58 }
  0x39   :  { %1178 = vmatpush1.bf16.msra.mxu1 %v1692_v15 }
  0x3a   :  { %1150 = vmatpush1.bf16.msra.mxu0 %v1677_v6  ;;  %1180 = vmatprep.subr.bf16.mxu1 %v1698_v18 }
  0x3b   :  { %1152 = vmatprep.subr.bf16.mxu0 %v1683_v11 }
  0x3d   :  { %1182 = vmatpush1.bf16.msra.mxu1 %v1725_v31 }
  0x3e   :  { %1154 = vmatpush1.bf16.msra.mxu0 %v1713_v24  ;;  %1184 = vmatprep.subr.bf16.mxu1 %v1728_v32 }
  0x3f   :  { %1156 = vmatprep.subr.bf16.mxu0 %v1716_v27 }
  0x41   :  { %1186 = vmatpush1.bf16.msra.mxu1 %v1747_v40 }
  0x42   :  { %1158 = vmatpush1.bf16.msra.mxu0 %v1743_v39  ;;  %1188 = vmatprep.subr.bf16.mxu1 %v1750_v41 }
  0x43   :  { %1192 = vmatprep.subr.bf16.mxu0 %v1483_v3 }
  0x45   :  { %1190 = vmatpush1.bf16.msra.mxu1 %v1760_v47 }
  0x46   :  { %1224 = vmatprep.subr.bf16.mxu1 %v1537_v22 }
  0xf8   :  { %v158_v51 = vpop.f32.mrb[0].mxu0 }
  0xf9   :  { %v234_v53 = vadd.f32 %v158_v51, %v88_v49  ;;  %v160_v54 = vpop.f32.mrb[1].mxu0  ;;  %v981_v49 = vld [vmem:[%s2000_s0 + $0x28] sm:$0xff] }
  0xfa   :  { %v235_v56 = vadd.f32 %v160_v54, %v89_v50 }
  0xfb   :  { %v977_v57 = vmul.f32 -1.442695, %v234_v53  ;;  %v229_v61 = vpop.f32.mrb[0].mxu1 }
  0xfc   :  { %v978_v59 = vmul.f32 -1.442695, %v235_v56  ;;  %v231_v63 = vpop.f32.mrb[1].mxu1  ;;  %v236_v5 = vadd.f32 %v229_v61, %v90_v2  ;;  %v982_v61 = vld [vmem:[%s2000_s0 + $0x30] sm:$0xff] }
  0xfd   :  { %1347 = vpow2.f32 %v977_v57  ;;  %v237_v1 = vadd.f32 %v231_v63, %v91_v60 }
  0xfe   :  { %1349 = vpow2.f32 %v978_v59 }
  0xff   :  { %v979_v4 = vmul.f32 -1.442695, %v237_v1 }
 0x101   :  { %1351 = vpow2.f32 %v979_v4 }
 0x102   :  { %1353 = vtanh.f32 %v236_v5 }
 0x107   :  { %v1348_v10 = vpop.eup %1347 }
 0x108   :  { %v1350_v12 = vpop.eup %1349  ;;  %v241_v13 = vadd.f32 1.0, %v1348_v10 }
 0x109   :  { %v247_v16 = vadd.f32 1.0, %v1350_v12 }
 0x10a   :  { %1355 = vrcp.f32 %v241_v13 }
 0x10b   :  { %1357 = vrcp.f32 %v247_v16  ;;  %v1352_v19 = vpop.eup %1351 }
 0x10c   :  { %v1354_v20 = vpop.eup %1353  ;;  %v254_v23 = vadd.f32 1.0, %v1352_v19 }
 0x10e   :  { %1359 = vrcp.f32 %v254_v23 }
 0x114   :  { %v1356_v21 = vpop.eup %1355 }
 0x115   :  { %v1358_v28 = vpop.eup %1357  ;;  %v258_v29 = vmul.f32 %v1356_v21, %v1354_v20 }
 0x116   :  { %v257_v34 = vmul.f32 0.0, %v1358_v28 }
 0x118   :  { %v1814_v35 = vadd.f32 %v258_v29, %v257_v34  ;;  %v1360_v36 = vpop.eup %1359 }
 0x11a   :  { %1361 = vtanh.f32 %v1814_v35 }
 0x124   :  { %v1362_v38 = vpop.eup %1361 }
 0x125   :  { %v261_v43 = vmul.f32 %v1362_v38, %v1360_v36  ;;  %v788_v38 = vld [vmem:[%s2003_s3 + $0x8] sm:$0xff] }
 0x127   :  { %332 = vmatmul.mubr.f32.vlgmr.msra.gmra.mrb[2].mxu0 %v261_v43  ;;  %403 = vmatmul.mubr.f32.vlgmr.msra.gmra.mrb[2].mxu1 %v261_v43 }
 0x128   :  { %1194 = vmatpush1.bf16.msra.mxu0 %v1496_v8  ;;  %1226 = vmatpush1.bf16.msra.mxu1 %v1545_v25 }
 0x129   :  { %1196 = vmatprep.subr.bf16.mxu0 %v1498_v9  ;;  %1228 = vmatprep.subr.bf16.mxu1 %v1570_v33 }
 0x12a   :  { %506 = vmatprep.mubr.f32.mxu0 %v1435_v7  ;;  %577 = vmatprep.mubr.f32.mxu1 %v1435_v7 }
 0x12c   :  { %1198 = vmatpush1.bf16.msra.mxu0 %v1514_v14  ;;  %1230 = vmatpush1.bf16.msra.mxu1 %v1581_v37 }
 0x12d   :  { %1200 = vmatprep.subr.bf16.mxu0 %v1523_v17  ;;  %1232 = vmatprep.subr.bf16.mxu1 %v1605_v45 }
 0x130   :  { %1202 = vmatpush1.bf16.msra.mxu0 %v1548_v26  ;;  %1234 = vmatpush1.bf16.msra.mxu1 %v1614_v48 }
 0x131   :  { %1204 = vmatprep.subr.bf16.mxu0 %v1561_v30  ;;  %1236 = vmatprep.subr.bf16.mxu1 %v1626_v52 }
 0x134   :  { %1206 = vmatpush1.bf16.msra.mxu0 %v1597_v42  ;;  %1238 = vmatpush1.bf16.msra.mxu1 %v1656_v62 }
 0x135   :  { %1208 = vmatprep.subr.bf16.mxu0 %v1608_v46  ;;  %1240 = vmatprep.subr.bf16.mxu1 %v1662_v0 }
 0x138   :  { %1210 = vmatpush1.bf16.msra.mxu0 %v1635_v55  ;;  %1242 = vmatpush1.bf16.msra.mxu1 %v1692_v15 }
 0x139   :  { %1212 = vmatprep.subr.bf16.mxu0 %v1644_v58  ;;  %1244 = vmatprep.subr.bf16.mxu1 %v1698_v18 }
 0x13c   :  { %1214 = vmatpush1.bf16.msra.mxu0 %v1677_v6  ;;  %1246 = vmatpush1.bf16.msra.mxu1 %v1725_v31 }
 0x13d   :  { %1216 = vmatprep.subr.bf16.mxu0 %v1683_v11  ;;  %1248 = vmatprep.subr.bf16.mxu1 %v1728_v32 }
 0x140   :  { %1218 = vmatpush1.bf16.msra.mxu0 %v1713_v24  ;;  %1250 = vmatpush1.bf16.msra.mxu1 %v1747_v40 }
 0x141   :  { %1220 = vmatprep.subr.bf16.mxu0 %v1716_v27  ;;  %1252 = vmatprep.subr.bf16.mxu1 %v1750_v41 }
 0x144   :  { %1222 = vmatpush1.bf16.msra.mxu0 %v1743_v39  ;;  %1254 = vmatpush1.bf16.msra.mxu1 %v1760_v47 }
 0x145   :  { %1256 = vmatprep.subr.bf16.mxu0 %v1483_v3  ;;  %1288 = vmatprep.subr.bf16.mxu1 %v1537_v22  ;;  %v983_v3 = vld [vmem:[%s2000_s0 + $0x38] sm:$0xff] }
 0x1fa   :  { %v333_v50 = vpop.f32.mrb[2].mxu0  ;;  %v404_v51 = vpop.f32.mrb[2].mxu1 }
 0x1fb   :  { %v409_v53 = vadd.f32 %v980_v44, %v333_v50  ;;  %v335_v54 = vpop.f32.mrb[3].mxu0  ;;  %v406_v56 = vpop.f32.mrb[3].mxu1  ;;  %v411_v1 = vadd.f32 %v982_v61, %v404_v51  ;;  %v1436_v44 = vmov 0.0|0.0   ;;  %v790_v50 = vld [vmem:[%s2003_s3 + $0x18] sm:$0xff] }
 0x1fc   :  { %v410_v57 = vadd.f32 %v981_v49, %v335_v54  ;;  %v412_v22 = vadd.f32 %v983_v3, %v406_v56  ;;  %v789_v49 = vld [vmem:[%s2003_s3 + $0x10] sm:$0xff]  ;;  %v792_v54 = vld [vmem:[%s2003_s3 + $0x28] sm:$0xff]  ;;  %v795_v3 = vld [vmem:[%s2003_s3 + $0x40] sm:$0xff] }
 0x1fd   :  { %v984_v59 = vmul.f32 -1.442695, %v409_v53  ;;  %v1323_v51 = vpack.c.bf16 %v790_v50, %v789_v49  ;;  %v791_v53 = vld [vmem:[%s2003_s3 + $0x20] sm:$0xff] }
 0x1fe   :  { %v985_v60 = vmul.f32 -1.442695, %v410_v57  ;;  %v986_v63 = vmul.f32 -1.442695, %v412_v22  ;;  %v1326_v56 = vpack.c.bf16 %v792_v54, %v791_v53  ;;  %v793_v57 = vld [vmem:[%s2003_s3 + $0x30] sm:$0xff]  ;;  %v796_v22 = vld [vmem:[%s2003_s3 + $0x48] sm:$0xff] }
 0x1ff   :  { %1363 = vpow2.f32 %v984_v59  ;;  %v794_v59 = vld [vmem:[%s2003_s3 + $0x38] sm:$0xff]  ;;  %v1332_v61 = vpack.c.bf16 %v796_v22, %v795_v3 }
 0x200   :  { %1365 = vpow2.f32 %v985_v60  ;;  %v1329_v60 = vpack.c.bf16 %v794_v59, %v793_v57 }
 0x201   :  { %1367 = vpow2.f32 %v986_v63  ;;  %v797_v63 = vld [vmem:[%s2003_s3 + $0x50] sm:$0xff] }
 0x202   :  { %1369 = vtanh.f32 %v411_v1  ;;  %v798_v1 = vld [vmem:[%s2003_s3 + $0x58] sm:$0xff] }
 0x209   :  { %v1364_v2 = vpop.eup %1363 }
 0x20a   :  { %v1366_v4 = vpop.eup %1365  ;;  %v416_v5 = vadd.f32 1.0, %v1364_v2  ;;  %v799_v2 = vld [vmem:[%s2003_s3 + $0x60] sm:$0xff] }
 0x20b   :  { %v422_v10 = vadd.f32 1.0, %v1366_v4  ;;  %v1368_v12 = vpop.eup %1367  ;;  %v1335_v4 = vpack.c.bf16 %v798_v1, %v797_v63 }
 0x20c   :  { %1371 = vrcp.f32 %v416_v5  ;;  %v1370_v13 = vpop.eup %1369  ;;  %v429_v21 = vadd.f32 1.0, %v1368_v12  ;;  %v800_v5 = vld [vmem:[%s2003_s3 + $0x68] sm:$0xff]  ;;  %v803_v12 = vld [vmem:[%s2002_s2] sm:$0xff] }
 0x20d   :  { %1373 = vrcp.f32 %v422_v10  ;;  %v804_v10 = vld [vmem:[%s2004_s4] sm:$0x7f] }
 0x20e   :  { %1375 = vrcp.f32 %v429_v21  ;;  %v995_v21 = vld [vmem:[%s2000_s0 + $0x68] sm:$0xff] }
 0x216   :  { %v1372_v16 = vpop.eup %1371 }
 0x217   :  { %v1374_v19 = vpop.eup %1373  ;;  %v433_v20 = vmul.f32 %v1372_v16, %v1370_v13  ;;  %v1338_v13 = vpack.c.bf16 %v800_v5, %v799_v2  ;;  %v801_v16 = vld [vmem:[%s2003_s3 + $0x70] sm:$0xff] }
 0x218   :  { %v432_v23 = vmul.f32 %v1374_v19, %v1814_v35  ;;  %v1376_v29 = vpop.eup %1375  ;;  %v787_v35 = vld [vmem:[%s2003_s3] sm:$0xff]  ;;  %v802_v19 = vld [vmem:[%s2003_s3 + $0x78] sm:$0xff] }
 0x219   :  { %v1320_v43 = vpack.c.bf16 %v788_v38, %v787_v35 }
 0x21a   :  { %v1864_v28 = vadd.f32 %v433_v20, %v432_v23  ;;  %v1341_v20 = vpack.c.bf16 %v802_v19, %v801_v16 }
 0x21c   :  { %1377 = vtanh.f32 %v1864_v28 }
 0x226   :  { %v1378_v34 = vpop.eup %1377 }
 0x227   :  { %v436_v36 = vmul.f32 %v1378_v34, %v1376_v29 }
 0x229   :  { %507 = vmatmul.mubr.f32.vlgmr.msra.gmra.mrb[4].mxu0 %v436_v36  ;;  %578 = vmatmul.mubr.f32.vlgmr.msra.gmra.mrb[4].mxu1 %v436_v36 }
 0x22a   :  { %1258 = vmatpush1.bf16.msra.mxu0 %v1496_v8  ;;  %1290 = vmatpush1.bf16.msra.mxu1 %v1545_v25  ;;  %v987_v8 = vld [vmem:[%s2000_s0 + $0x40] sm:$0xff] }
 0x22b   :  { %1260 = vmatprep.subr.bf16.mxu0 %v1498_v9  ;;  %1292 = vmatprep.subr.bf16.mxu1 %v1570_v33  ;;  %v988_v9 = vld [vmem:[%s2000_s0 + $0x48] sm:$0xff] }
 0x22c   :  { %681 = vmatprep.mubr.f32.mxu0 %v1435_v7  ;;  %752 = vmatprep.mubr.f32.mxu1 %v1435_v7 }
 0x22e   :  { %1262 = vmatpush1.bf16.msra.mxu0 %v1514_v14  ;;  %1294 = vmatpush1.bf16.msra.mxu1 %v1581_v37 }
 0x22f   :  { %1264 = vmatprep.subr.bf16.mxu0 %v1523_v17  ;;  %1296 = vmatprep.subr.bf16.mxu1 %v1605_v45  ;;  %v990_v45 = vld [vmem:[%s2000_s0 + $0x58] sm:$0xff] }
 0x232   :  { %1266 = vmatpush1.bf16.msra.mxu0 %v1548_v26  ;;  %1298 = vmatpush1.bf16.msra.mxu1 %v1614_v48  ;;  %v989_v48 = vld [vmem:[%s2000_s0 + $0x50] sm:$0xff] }
 0x233   :  { %1268 = vmatprep.subr.bf16.mxu0 %v1561_v30  ;;  %1300 = vmatprep.subr.bf16.mxu1 %v1626_v52 }
 0x236   :  { %1270 = vmatpush1.bf16.msra.mxu0 %v1597_v42  ;;  %1302 = vmatpush1.bf16.msra.mxu1 %v1656_v62 }
 0x237   :  { %1272 = vmatprep.subr.bf16.mxu0 %v1608_v46  ;;  %1304 = vmatprep.subr.bf16.mxu1 %v1662_v0 }
 0x23a   :  { %1274 = vmatpush1.bf16.msra.mxu0 %v1635_v55  ;;  %1306 = vmatpush1.bf16.msra.mxu1 %v1692_v15 }
 0x23b   :  { %1276 = vmatprep.subr.bf16.mxu0 %v1644_v58  ;;  %1308 = vmatprep.subr.bf16.mxu1 %v1698_v18 }
 0x23e   :  { %1278 = vmatpush1.bf16.msra.mxu0 %v1677_v6  ;;  %1310 = vmatpush1.bf16.msra.mxu1 %v1725_v31 }
 0x23f   :  { %1280 = vmatprep.subr.bf16.mxu0 %v1683_v11  ;;  %1312 = vmatprep.subr.bf16.mxu1 %v1728_v32 }
 0x242   :  { %1282 = vmatpush1.bf16.msra.mxu0 %v1713_v24  ;;  %1314 = vmatpush1.bf16.msra.mxu1 %v1747_v40 }
 0x243   :  { %1284 = vmatprep.subr.bf16.mxu0 %v1716_v27  ;;  %1316 = vmatprep.subr.bf16.mxu1 %v1750_v41 }
 0x246   :  { %1286 = vmatpush1.bf16.msra.mxu0 %v1743_v39  ;;  %1318 = vmatpush1.bf16.msra.mxu1 %v1760_v47 }
 0x247   :  { %1023 = vmatprep.subr.mxu0 %v1435_v7  ;;  %1319 = vmatprep.subr.bf16.mxu1 %v1436_v44 }
 0x2fc   :  { %v508_v14 = vpop.f32.mrb[4].mxu0  ;;  %v579_v17 = vpop.f32.mrb[4].mxu1 }
 0x2fd   :  { %v584_v25 = vadd.f32 %v987_v8, %v508_v14  ;;  %v510_v26 = vpop.f32.mrb[5].mxu0  ;;  %v581_v30 = vpop.f32.mrb[5].mxu1  ;;  %v586_v55 = vadd.f32 %v989_v48, %v579_v17  ;;  %v997_v17 = vld [vmem:[%s2000_s0 + $0x78] sm:$0xff] }
 0x2fe   :  { %v585_v33 = vadd.f32 %v988_v9, %v510_v26  ;;  %v587_v46 = vadd.f32 %v990_v45, %v581_v30  ;;  %v996_v26 = vld [vmem:[%s2000_s0 + $0x70] sm:$0xff] }
 0x2ff   :  { %v991_v37 = vmul.f32 -1.442695, %v584_v25 }
 0x300   :  { %v992_v42 = vmul.f32 -1.442695, %v585_v33  ;;  %v993_v52 = vmul.f32 -1.442695, %v587_v46 }
 0x301   :  { %1379 = vpow2.f32 %v991_v37 }
 0x302   :  { %1381 = vpow2.f32 %v992_v42 }
 0x303   :  { %1383 = vpow2.f32 %v993_v52 }
 0x304   :  { %1385 = vtanh.f32 %v586_v55 }
 0x30b   :  { %v1380_v58 = vpop.eup %1379 }
 0x30c   :  { %v1382_v62 = vpop.eup %1381  ;;  %v591_v0 = vadd.f32 1.0, %v1380_v58 }
 0x30d   :  { %v597_v6 = vadd.f32 1.0, %v1382_v62  ;;  %v1384_v11 = vpop.eup %1383 }
 0x30e   :  { %1387 = vrcp.f32 %v591_v0  ;;  %v1386_v15 = vpop.eup %1385  ;;  %v604_v31 = vadd.f32 1.0, %v1384_v11 }
 0x30f   :  { %1389 = vrcp.f32 %v597_v6 }
 0x310   :  { %1391 = vrcp.f32 %v604_v31 }
 0x318   :  { %v1388_v18 = vpop.eup %1387 }
 0x319   :  { %v1390_v24 = vpop.eup %1389  ;;  %v608_v27 = vmul.f32 %v1388_v18, %v1386_v15 }
 0x31a   :  { %v607_v32 = vmul.f32 %v1390_v24, %v1864_v28  ;;  %v1392_v40 = vpop.eup %1391 }
 0x31c   :  { %v1913_v39 = vadd.f32 %v608_v27, %v607_v32 }
 0x31e   :  { %1393 = vtanh.f32 %v1913_v39 }
 0x328   :  { %v1394_v41 = vpop.eup %1393 }
 0x329   :  { %v611_v47 = vmul.f32 %v1394_v41, %v1392_v40  ;;  %v1003_v40 = vld [vmem:[%s2005_s5] ss:$0 sm:$0xff] }
 0x32b   :  { %682 = vmatmul.mubr.f32.vlgmr.msra.gmra.mrb[6].mxu0 %v611_v47  ;;  %753 = vmatmul.mubr.f32.vlgmr.msra.gmra.mrb[6].mxu1 %v611_v47 }
 0x32c   :  { %1321 = vmatpush3.bf16.msra.mxu1 %v1320_v43  ;;  %1025 = vmatprep.mubr.msk.f32.mxu0 %vm1437_vm2, %v1435_v7 }
 0x32d   :  { %1322 = vmatprep.subr.bf16.mxu1 %v1436_v44  ;;  %1060 = vmatprep.mubr.msk.f32.mxu1 %vm1437_vm2, %v1435_v7  ;;  %v994_v7 = vld [vmem:[%s2000_s0 + $0x60] sm:$0xff] }
 0x32e   :  { %1024 = vmatpush3.msk.msra.mxu0 %vm809_vm0, %v804_v10 }
 0x32f   :  { %1026 = vmatmul.mubr.msk.f32.vlgmr.msra.gmra.mrb[8].mxu0 %vm805_vm1, %v803_v12 }
 0x330   :  { %1324 = vmatpush3.bf16.msra.mxu1 %v1323_v51 }
 0x331   :  { %1325 = vmatprep.subr.bf16.mxu1 %v1436_v44 }
 0x334   :  { %1327 = vmatpush3.bf16.msra.mxu1 %v1326_v56 }
 0x335   :  { %1328 = vmatprep.subr.bf16.mxu1 %v1436_v44 }
 0x338   :  { %1330 = vmatpush3.bf16.msra.mxu1 %v1329_v60 }
 0x339   :  { %1331 = vmatprep.subr.bf16.mxu1 %v1436_v44 }
 0x33c   :  { %1333 = vmatpush3.bf16.msra.mxu1 %v1332_v61 }
 0x33d   :  { %1334 = vmatprep.subr.bf16.mxu1 %v1436_v44 }
 0x340   :  { %1336 = vmatpush3.bf16.msra.mxu1 %v1335_v4 }
 0x341   :  { %1337 = vmatprep.subr.bf16.mxu1 %v1436_v44 }
 0x344   :  { %1339 = vmatpush3.bf16.msra.mxu1 %v1338_v13 }
 0x345   :  { %1340 = vmatprep.subr.bf16.mxu1 %v1436_v44 }
 0x348   :  { %1342 = vmatpush3.bf16.msra.mxu1 %v1341_v20 }
 0x3fe   :  { %v683_v23 = vpop.f32.mrb[6].mxu0  ;;  %v754_v28 = vpop.f32.mrb[6].mxu1 }
 0x3ff   :  { %v759_v29 = vadd.f32 %v994_v7, %v683_v23  ;;  %v685_v34 = vpop.f32.mrb[7].mxu0  ;;  %v756_v36 = vpop.f32.mrb[7].mxu1  ;;  %v761_v33 = vadd.f32 %v996_v26, %v754_v28 }
 0x400   :  { %v760_v8 = vadd.f32 %v995_v21, %v685_v34  ;;  %v762_v25 = vadd.f32 %v997_v17, %v756_v36 }
 0x401   :  { %v998_v9 = vmul.f32 -1.442695, %v759_v29 }
 0x402   :  { %v999_v14 = vmul.f32 -1.442695, %v760_v8  ;;  %v1000_v30 = vmul.f32 -1.442695, %v762_v25  ;;  %v879_v27 = vpop.f32.mrb[8].mxu0 }
 0x403   :  { %1395 = vpow2.f32 %v998_v9  ;;  %v1027_v31 = vpop.f32.mrb[9].mxu0 }
 0x404   :  { %1397 = vpow2.f32 %v999_v14 }
 0x405   :  { %1399 = vpow2.f32 %v1000_v30 }
 0x406   :  { %1401 = vtanh.f32 %v761_v33 }
 0x40d   :  { %v1396_v37 = vpop.eup %1395 }
 0x40e   :  { %v1398_v42 = vpop.eup %1397  ;;  %v766_v45 = vadd.f32 1.0, %v1396_v37 }
 0x40f   :  { %v772_v46 = vadd.f32 1.0, %v1398_v42  ;;  %v1400_v48 = vpop.eup %1399 }
 0x410   :  { %1403 = vrcp.f32 %v766_v45  ;;  %v1402_v52 = vpop.eup %1401  ;;  %v779_v0 = vadd.f32 1.0, %v1400_v48 }
 0x411   :  { %1405 = vrcp.f32 %v772_v46 }
 0x412   :  { %1407 = vrcp.f32 %v779_v0 }
 0x41a   :  { %v1404_v55 = vpop.eup %1403 }
 0x41b   :  { %v1406_v58 = vpop.eup %1405  ;;  %v783_v62 = vmul.f32 %v1404_v55, %v1402_v52 }
 0x41c   :  { %v782_v6 = vmul.f32 %v1406_v58, %v1913_v39  ;;  %v1408_v15 = vpop.eup %1407 }
 0x41e   :  { %v784_v11 = vadd.f32 %v783_v62, %v782_v6 }
 0x420   :  { %1409 = vtanh.f32 %v784_v11 }
 0x42a   :  { %v1410_v18 = vpop.eup %1409 }
 0x42b   :  { %v786_v24 = vmul.f32 %v1410_v18, %v1408_v15 }
 0x42d   :  { %1061 = vmatmul.mubr.f32.vlgmr.msra.gmra.mrb[8].mxu1 %v786_v24 }
 0x500   :  { %v949_v32 = vpop.f32.mrb[8].mxu1 }
 0x501   :  { %v950_v41 = vadd.f32 %v949_v32, %v879_v27  ;;  %v1062_v47 = vpop.f32.mrb[9].mxu1 }
 0x503   :  { %v960_v39 = vadd.f32 %v1003_v40, %v950_v41 }
 0x505   :  { %962 = vst.msk [vmem:[#allocation2] sm:$0x3] %vm961_vm3, %v960_v39 }
 0x506   :  { %1422 = shalt.err (!%p1419_p4)
}
 0x507   :  { %s1423_s25 = scalar_lea.hbm %s2006_s6, 32 }
 0x508   :  { %p1424_p5 = scmp.ne.s32.totalorder %s2006_s6, %s1423_s25  ;;  %p1427_p6 = scmp.lt.u32.totalorder %s1423_s25, %s2006_s6 }
 0x50a   :  { %p1429_p7 = pnand %p1427_p6, %p1424_p5 }
 0x50c   :  { %1432 = shalt.err (!%p1429_p7)
}
 0x50d   :  { %972 = dma.vmem_to_hbm [thread:$0]  %s970_s21, 32, %s2006_s6, [#allocation3]  }
 0x50e   :  { %1433 = dma.done.wait [#allocation3], 32  }
 0x50f   :  { %1434 = vsyncadd [#allocation3], 4294967264 }
 0x510   :  { %976 = vsyncpa [#allocation3], 1 }

// kernel: drowsiness_cnn_lstm_forward.2
= control target key start
LH: loop header
LB: loop body
LE: loop exit
PB: predicated region body
PF: predicated region fallthrough
CT: control target
= control target key end

     0   :  { %v12290_v1 = vmov 0   ;;  %s14073_s0 = inlined_call_operand.vmem [shape: bf16[18,18,8,3], index: 0, kind: input, shape index: {}]   ;;  %s14074_s1 = inlined_call_operand.vmem [shape: f32[9,3,128], index: 1, kind: input, shape index: {}]   ;;  %s14075_s2 = inlined_call_operand.vmem [shape: f32[1,128], index: 2, kind: input, shape index: {}]   ;;  %s14076_s3 = inlined_call_operand.vmem [shape: bf16[9,128,128], index: 3, kind: input, shape index: {}]   ;;  %s14077_s4 = inlined_call_operand.vmem [shape: f32[1,128], index: 4, kind: input, shape index: {}]   ;;  %s14078_s5 = inlined_call_operand.vmem [shape: bf16[9,128,128], index: 5, kind: input, shape index: {}]   ;;  %s14079_s6 = inlined_call_operand.vmem [shape: f32[1,128], index: 6, kind: input, shape index: {}]   ;;  %s14080_s7 = inlined_call_operand.vmem [shape: bf16[128,512], index: 7, kind: input, shape index: {}]   ;;  %s14081_s8 = inlined_call_operand.vmem [shape: f32[1,512], index: 8, kind: input, shape index: {}]   ;;  %s14082_s9 = inlined_call_operand.vmem [shape: f32[8,512], index: 9, kind: output, shape index: {}]  }
   0x1   :  { %v12344_v0 = vld [vmem:[%s14075_s2] ss:$0 sm:$0xff]  ;;  %34 = vst [vmem:[#allocation2] sm:$0xf] %v12290_v1  ;;  %35 = vst [vmem:[#allocation2 + $0x4] sm:$0xf] %v12290_v1 }
   0x2   :  { %36 = vst [vmem:[#allocation2 + $0x8] sm:$0xf] %v12290_v1  ;;  %37 = vst [vmem:[#allocation2 + $0xc] sm:$0xf] %v12290_v1  ;;  %s12386_s2 = smov 0  }
   0x3   :  { %38 = vst [vmem:[#allocation2 + $0x10] sm:$0xf] %v12290_v1  ;;  %39 = vst [vmem:[#allocation2 + $0x14] sm:$0xf] %v12290_v1 }
   0x4   :  { %40 = vst [vmem:[#allocation2 + $0x18] sm:$0xf] %v12290_v1  ;;  %41 = vst [vmem:[#allocation2 + $0x1c] sm:$0xf] %v12290_v1 }
   0x5   :  { %42 = vst [vmem:[#allocation2 + $0x20] sm:$0xf] %v12290_v1  ;;  %43 = vst [vmem:[#allocation2 + $0x24] sm:$0xf] %v12290_v1 }
   0x6   :  { %45 = vst [vmem:[#allocation2 + $0x168] sm:$0xf] %v12290_v1  ;;  %46 = vst [vmem:[#allocation2 + $0x16c] sm:$0xf] %v12290_v1 }
   0x7   :  { %47 = vst [vmem:[#allocation2 + $0x170] sm:$0xf] %v12290_v1  ;;  %48 = vst [vmem:[#allocation2 + $0x174] sm:$0xf] %v12290_v1 }
   0x8   :  { %49 = vst [vmem:[#allocation2 + $0x178] sm:$0xf] %v12290_v1  ;;  %50 = vst [vmem:[#allocation2 + $0x17c] sm:$0xf] %v12290_v1 }
   0x9   :  { %51 = vst [vmem:[#allocation2 + $0x180] sm:$0xf] %v12290_v1  ;;  %52 = vst [vmem:[#allocation2 + $0x184] sm:$0xf] %v12290_v1 }
   0xa   :  { %53 = vst [vmem:[#allocation2 + $0x188] sm:$0xf] %v12290_v1  ;;  %54 = vst [vmem:[#allocation2 + $0x18c] sm:$0xf] %v12290_v1 }
   0xb   :  { %56 = vst [vmem:[#allocation2 + $0x28] sm:$0xf] %v12290_v1  ;;  %57 = vst [vmem:[#allocation2 + $0x50] sm:$0xf] %v12290_v1 }
   0xc   :  { %58 = vst [vmem:[#allocation2 + $0x78] sm:$0xf] %v12290_v1  ;;  %59 = vst [vmem:[#allocation2 + $0xa0] sm:$0xf] %v12290_v1 }
   0xd   :  { %60 = vst [vmem:[#allocation2 + $0xc8] sm:$0xf] %v12290_v1  ;;  %61 = vst [vmem:[#allocation2 + $0xf0] sm:$0xf] %v12290_v1 }
   0xe   :  { %62 = vst [vmem:[#allocation2 + $0x118] sm:$0xf] %v12290_v1  ;;  %63 = vst [vmem:[#allocation2 + $0x140] sm:$0xf] %v12290_v1 }
   0xf   :  { %67 = vst [vmem:[#allocation2 + $0x4c] sm:$0xf] %v12290_v1  ;;  %68 = vst [vmem:[#allocation2 + $0x74] sm:$0xf] %v12290_v1 }
  0x10   :  { %69 = vst [vmem:[#allocation2 + $0x9c] sm:$0xf] %v12290_v1  ;;  %70 = vst [vmem:[#allocation2 + $0xc4] sm:$0xf] %v12290_v1 }
  0x11   :  { %71 = vst [vmem:[#allocation2 + $0xec] sm:$0xf] %v12290_v1  ;;  %72 = vst [vmem:[#allocation2 + $0x114] sm:$0xf] %v12290_v1 }
  0x12   :  { %73 = vst [vmem:[#allocation2 + $0x13c] sm:$0xf] %v12290_v1  ;;  %74 = vst [vmem:[#allocation2 + $0x164] sm:$0xf] %v12290_v1 }
  0x13   :  { %55 = vst [vmem:[#allocation2] sm:$0xf] %v12290_v1  ;;  %64 = vst [vmem:[#allocation2 + $0x168] sm:$0xf] %v12290_v1 }
  0x14   :  { %66 = vst [vmem:[#allocation2 + $0x24] sm:$0xf] %v12290_v1  ;;  %75 = vst [vmem:[#allocation2 + $0x18c] sm:$0xf] %v12290_v1 }
  0x15 LB: > { %v8203_v2 = vld [vmem:[%s14074_s1 + $0x4] sm:$0x7]  ;;  %vm205_vm0 = vcmask 1042432   ;;  %v118_v3 = vld [vmem:[%s14074_s1] sm:$0x7]  ;;  %s9373_s15 = smul.u32 144, %s12276_s2  ;;  %s12276_s2 = sphi %s12386_s2, %s81_s2  }
  0x16   : > { %10471 = vmatprep.subr.msk.mxu0 %vm205_vm0, %v8203_v2  ;;  %10705 = vmatprep.subr.msk.mxu1 %vm205_vm0, %v8203_v2  ;;  %vm156_vm1 = vcmask 23552   ;;  %v12441_v17 = vld [vmem:[%s14074_s1 + $0x8] sm:$0x7]  ;;  %v8291_v59 = vld [vmem:[%s14074_s1 + $0xc] sm:$0x7]  ;;  %s8703_s12 = smul.u32 40, %s12276_s2 }
  0x17   : > { %10472 = vmatpush3.msk.msra.mxu0 %vm205_vm0, %v8203_v2  ;;  %10706 = vmatpush3.msk.msra.mxu1 %vm205_vm0, %v8203_v2  ;;  %s12407_s18 = scalar_lea.vmem %s14073_s0, %s9373_s15  ;;  %v8328_v60 = vld [vmem:[%s14074_s1 + $0x10] sm:$0x7]  ;;  %s81_s2 = sadd.s32 1, %s12276_s2  }
  0x18   : > { %10497 = vmatprep.subr.msk.mxu0 %vm205_vm0, %v118_v3  ;;  %10731 = vmatprep.subr.msk.mxu1 %vm205_vm0, %v118_v3  ;;  %v12410_v4 = vld [vmem:[%s12407_s18 + $0x4] ss:$72 sps:$4 sm:$0xff]   ;;  %v9794_v6 = vld [vmem:[%s12407_s18 + $0x50] sm:$0xff]   ;;  %v9795_v12 = vld [vmem:[%s12407_s18 + $0x58] sm:$0xff]   ;;  %s13247_s13 = scalar_lea.vmem [#allocation2], %s8703_s12  ;;  %p78_p0 = scmp.ge.s32.totalorder %s81_s2, 8  }
  0x19   : > { %v9771_v5 = vld [vmem:[%s12407_s18 + $0x8] sm:$0xff]   ;;  %v138_v7 = vunpack.c.l.bf16 %v12410_v4  ;;  %v1068_v8 = vunpack.c.h.bf16 %v12410_v4  ;;  %v12418_v10 = vunpack.c.l.bf16 %v9794_v6  ;;  %v9772_v11 = vld [vmem:[%s12407_s18 + $0x10] sm:$0xff]   ;;  %v12424_v14 = vunpack.c.h.bf16 %v9794_v6  ;;  %v9773_v20 = vld [vmem:[%s12407_s18 + $0x18] sm:$0xff]   ;;  %4078 = vst [vmem:[#allocation3] sm:$0xf] (%p78_p0), %v12290_v1  ;;  %s13306_s0 = smov (%p78_p0), 0  }
  0x1a   : > { %v12416_v9 = vunpack.c.l.bf16 %v9771_v5  ;;  %v12422_v13 = vunpack.c.h.bf16 %v9771_v5  ;;  %v12434_v15 = vunpack.c.l.bf16 %v9772_v11  ;;  %v12436_v16 = vunpack.c.l.bf16 %v9795_v12  ;;  %v9796_v21 = vld [vmem:[%s12407_s18 + $0x60] sm:$0xff]   ;;  %v9797_v27 = vld [vmem:[%s12407_s18 + $0x68] sm:$0xff]   ;;  %v9798_v33 = vld [vmem:[%s12407_s18 + $0x70] sm:$0xff]   ;;  %4083 = vst [vmem:[#allocation3 + $0x14] sm:$0xf] (%p78_p0), %v12290_v1 }
  0x1b   : > { %10473 = vmatprep.mubr.msk.f32.mxu0 %vm156_vm1, %v138_v7  ;;  %10707 = vmatprep.mubr.msk.f32.mxu1 %vm156_vm1, %v1068_v8  ;;  %v12445_v18 = vunpack.c.h.bf16 %v9772_v11  ;;  %v12447_v19 = vunpack.c.h.bf16 %v9795_v12  ;;  %v12463_v22 = vunpack.c.l.bf16 %v9773_v20  ;;  %v12465_v23 = vunpack.c.l.bf16 %v9796_v21  ;;  %v9774_v26 = vld [vmem:[%s12407_s18 + $0x20] sm:$0xff]   ;;  %v9775_v32 = vld [vmem:[%s12407_s18 + $0x28] sm:$0xff]   ;;  %v9776_v38 = vld [vmem:[%s12407_s18 + $0x30] sm:$0xff]   ;;  %4085 = vst [vmem:[#allocation3 + $0x78] sm:$0xf] (%p78_p0), %v12290_v1 }
  0x1c   : > { %10474 = vmatmul.mubr.msk.f32.vlgmr.msra.gmra.mrb[0].mxu0 %vm156_vm1, %v12416_v9  ;;  %10708 = vmatmul.mubr.msk.f32.vlgmr.msra.gmra.mrb[0].mxu1 %vm156_vm1, %v12418_v10  ;;  %v12471_v24 = vunpack.c.h.bf16 %v9773_v20  ;;  %v12473_v25 = vunpack.c.h.bf16 %v9796_v21  ;;  %v12481_v28 = vunpack.c.l.bf16 %v9774_v26  ;;  %v12483_v29 = vunpack.c.l.bf16 %v9797_v27  ;;  %v9799_v39 = vld [vmem:[%s12407_s18 + $0x78] sm:$0xff]   ;;  %v9800_v45 = vld [vmem:[%s12407_s18 + $0x80] sm:$0xff]   ;;  %v12552_v52 = vld [vmem:[%s12407_s18 + $0x48] sm:$0xff]   ;;  %4090 = vst [vmem:[#allocation3 + $0x8c] sm:$0xf] (%p78_p0), %v12290_v1 }
  0x1d   : > { %10498 = vmatpush3.msk.msra.mxu0 %vm205_vm0, %v118_v3  ;;  %10732 = vmatpush3.msk.msra.mxu1 %vm205_vm0, %v118_v3  ;;  %v12489_v30 = vunpack.c.h.bf16 %v9774_v26  ;;  %v12491_v31 = vunpack.c.h.bf16 %v9797_v27  ;;  %v12499_v34 = vunpack.c.l.bf16 %v9775_v32  ;;  %v12501_v35 = vunpack.c.l.bf16 %v9798_v33  ;;  %v9777_v44 = vld [vmem:[%s12407_s18 + $0x38] sm:$0xff]   ;;  %v12548_v50 = vld [vmem:[%s12407_s18 + $0x40] ss:$72 sps:$4 sm:$0xff]   ;;  %v12708_v3 = vld [vmem:[%s12407_s18 + $0x90] sm:$0xff]   ;;  %4079 = vst [vmem:[#allocation3 + $0x4] sm:$0xf] (%p78_p0), %v12290_v1 }
  0x1e   : > { %10476 = vmatprep.mubr.msk.f32.mxu0 %vm156_vm1, %v12422_v13  ;;  %10710 = vmatprep.mubr.msk.f32.mxu1 %vm156_vm1, %v12424_v14  ;;  %v12507_v36 = vunpack.c.h.bf16 %v9775_v32  ;;  %v12509_v37 = vunpack.c.h.bf16 %v9798_v33  ;;  %v12517_v40 = vunpack.c.l.bf16 %v9776_v38  ;;  %v12519_v41 = vunpack.c.l.bf16 %v9799_v39  ;;  %v9377_v51 = vld [vmem:[%s12407_s18] sm:$0xff]   ;;  %v12696_v62 = vld [vmem:[%s12407_s18 + $0x88] sm:$0xff]   ;;  %4080 = vst [vmem:[#allocation3 + $0x8] sm:$0xf] (%p78_p0), %v12290_v1  ;;  %4081 = vst [vmem:[#allocation3 + $0xc] sm:$0xf] (%p78_p0), %v12290_v1 }
  0x1f   : > { %10523 = vmatprep.subr.msk.mxu0 %vm205_vm0, %v12441_v17  ;;  %10757 = vmatprep.subr.msk.mxu1 %vm205_vm0, %v12441_v17  ;;  %v12525_v42 = vunpack.c.h.bf16 %v9776_v38  ;;  %v12527_v43 = vunpack.c.h.bf16 %v9799_v39  ;;  %v12535_v46 = vunpack.c.l.bf16 %v9777_v44  ;;  %v12537_v47 = vunpack.c.l.bf16 %v9800_v45  ;;  %v9785_v61 = vld [vmem:[%s12407_s18 + $0x40] sm:$0xff]   ;;  %v9812_v20 = vld [vmem:[%s12407_s18 + $0xa8] sm:$0xff]   ;;  %4082 = vst [vmem:[#allocation3 + $0x10] sm:$0xf] (%p78_p0), %v12290_v1  ;;  %4086 = vst [vmem:[#allocation3 + $0x7c] sm:$0xf] (%p78_p0), %v12290_v1 }
  0x20   : > { %10477 = vmatmul.mubr.msk.f32.gmra.mrb[2].mxu0 %vm156_vm1, %v12434_v15  ;;  %10711 = vmatmul.mubr.msk.f32.gmra.mrb[2].mxu1 %vm156_vm1, %v12436_v16  ;;  %v12543_v48 = vunpack.c.h.bf16 %v9777_v44  ;;  %v12545_v49 = vunpack.c.h.bf16 %v9800_v45  ;;  %v153_v53 = vunpack.c.l.bf16 %v12548_v50  ;;  %v1083_v54 = vunpack.c.h.bf16 %v12548_v50  ;;  %v9815_v33 = vld [vmem:[%s12407_s18 + $0xc0] sm:$0xff]   ;;  %v9816_v38 = vld [vmem:[%s12407_s18 + $0xc8] sm:$0xff]   ;;  %v9836_v50 = vld [vmem:[%s12407_s18 + $0xf8] sm:$0xff]   ;;  %4087 = vst [vmem:[#allocation3 + $0x80] sm:$0xf] (%p78_p0), %v12290_v1 }
  0x21   : > { %10479 = vmatprep.mubr.msk.f32.mxu0 %vm156_vm1, %v12445_v18  ;;  %10713 = vmatprep.mubr.msk.f32.mxu1 %vm156_vm1, %v12447_v19  ;;  %v9378_v55 = vunpack.c.l.bf16 %v9377_v51  ;;  %v9470_v56 = vunpack.c.l.bf16 %v12552_v52  ;;  %v9379_v57 = vunpack.c.h.bf16 %v9377_v51  ;;  %v9471_v58 = vunpack.c.h.bf16 %v12552_v52  ;;  %4088 = vst [vmem:[#allocation3 + $0x84] sm:$0xf] (%p78_p0), %v12290_v1  ;;  %4089 = vst [vmem:[#allocation3 + $0x88] sm:$0xf] (%p78_p0), %v12290_v1 }
  0x22   : > { %v9466_v63 = vunpack.c.l.bf16 %v9785_v61  ;;  %v9558_v2 = vunpack.c.l.bf16 %v12696_v62  ;;  %v9467_v5 = vunpack.c.h.bf16 %v9785_v61  ;;  %v9559_v6 = vunpack.c.h.bf16 %v12696_v62  ;;  %v8634_v62 = vld [vmem:[%s12407_s18 + $0xdc] ss:$60 sps:$4 sm:$0xff]   ;;  %4092 = vst [vmem:[#allocation3 + $0x18] sm:$0xf] (%p78_p0), %v12290_v1  ;;  %4093 = vst [vmem:[#allocation3 + $0x30] sm:$0xf] (%p78_p0), %v12290_v1 }
  0x23   : > { %v9562_v7 = vunpack.c.l.bf16 %v12708_v3  ;;  %v9563_v11 = vunpack.c.h.bf16 %v12708_v3  ;;  %v12774_v26 = vunpack.c.h.bf16 %v9812_v20  ;;  %v12813_v39 = vunpack.c.h.bf16 %v9815_v33  ;;  %4094 = vst [vmem:[#allocation3 + $0x48] sm:$0xf] (%p78_p0), %v12290_v1  ;;  %4095 = vst [vmem:[#allocation3 + $0x60] sm:$0xf] (%p78_p0), %v12290_v1 }
  0x24   : > { %10480 = vmatmul.mubr.msk.f32.gmra.mrb[4].mxu0 %vm156_vm1, %v12463_v22  ;;  %10714 = vmatmul.mubr.msk.f32.gmra.mrb[4].mxu1 %vm156_vm1, %v12465_v23  ;;  %v12828_v44 = vunpack.c.h.bf16 %v9816_v38  ;;  %v13047_v52 = vunpack.c.l.bf16 %v9836_v50  ;;  %v3554_v3 = vunpack.c.h.bf16 %v8634_v62  ;;  %4099 = vst [vmem:[#allocation3 + $0x2c] sm:$0xf] (%p78_p0), %v12290_v1  ;;  %4100 = vst [vmem:[#allocation3 + $0x44] sm:$0xf] (%p78_p0), %v12290_v1 }
  0x25   : > { %10482 = vmatprep.mubr.msk.f32.mxu0 %vm156_vm1, %v12471_v24  ;;  %10716 = vmatprep.mubr.msk.f32.mxu1 %vm156_vm1, %v12473_v25  ;;  %4101 = vst [vmem:[#allocation3 + $0x5c] sm:$0xf] (%p78_p0), %v12290_v1  ;;  %4102 = vst [vmem:[#allocation3 + $0x74] sm:$0xf] (%p78_p0), %v12290_v1 }
  0x26   :  { %4091 = vst [vmem:[#allocation3] sm:$0xf] (%p78_p0), %v12290_v1  ;;  %4098 = vst [vmem:[#allocation3 + $0x14] sm:$0xf] (%p78_p0), %v12290_v1 }
  0x27   :  { %4096 = vst [vmem:[#allocation3 + $0x78] sm:$0xf] (%p78_p0), %v12290_v1  ;;  %4103 = vst [vmem:[#allocation3 + $0x8c] sm:$0xf] (%p78_p0), %v12290_v1 }
  0x28   : > { %10483 = vmatmul.mubr.msk.f32.gmra.mrb[6].mxu0 %vm156_vm1, %v12481_v28  ;;  %10717 = vmatmul.mubr.msk.f32.gmra.mrb[6].mxu1 %vm156_vm1, %v12483_v29 }
  0x29   : > { %10485 = vmatprep.mubr.msk.f32.mxu0 %vm156_vm1, %v12489_v30  ;;  %10719 = vmatprep.mubr.msk.f32.mxu1 %vm156_vm1, %v12491_v31 }
  0x2c   : > { %10486 = vmatmul.mubr.msk.f32.gmra.mrb[8].mxu0 %vm156_vm1, %v12499_v34  ;;  %10720 = vmatmul.mubr.msk.f32.gmra.mrb[8].mxu1 %vm156_vm1, %v12501_v35 }
  0x2d   : > { %10488 = vmatprep.mubr.msk.f32.mxu0 %vm156_vm1, %v12507_v36  ;;  %10722 = vmatprep.mubr.msk.f32.mxu1 %vm156_vm1, %v12509_v37 }
  0x30   : > { %10489 = vmatmul.mubr.msk.f32.gmra.mrb[10].mxu0 %vm156_vm1, %v12517_v40  ;;  %10723 = vmatmul.mubr.msk.f32.gmra.mrb[10].mxu1 %vm156_vm1, %v12519_v41 }
  0x31   : > { %10491 = vmatprep.mubr.msk.f32.mxu0 %vm156_vm1, %v12525_v42  ;;  %10725 = vmatprep.mubr.msk.f32.mxu1 %vm156_vm1, %v12527_v43 }
  0x34   : > { %10492 = vmatmul.mubr.msk.f32.gmra.mrb[12].mxu0 %vm156_vm1, %v12535_v46  ;;  %10726 = vmatmul.mubr.msk.f32.gmra.mrb[12].mxu1 %vm156_vm1, %v12537_v47 }
  0x35   : > { %10494 = vmatprep.mubr.msk.f32.mxu0 %vm156_vm1, %v12543_v48  ;;  %10728 = vmatprep.mubr.msk.f32.mxu1 %vm156_vm1, %v12545_v49 }
  0x38   : > { %10495 = vmatmul.mubr.msk.f32.gmra.mrb[14].mxu0 %vm156_vm1, %v153_v53  ;;  %10729 = vmatmul.mubr.msk.f32.gmra.mrb[14].mxu1 %vm156_vm1, %v1083_v54  ;;  %v9837_v53 = vld [vmem:[%s12407_s18 + $0x100] sm:$0xff]  }
  0x39   : > { %10499 = vmatprep.mubr.msk.f32.mxu0 %vm156_vm1, %v9378_v55  ;;  %10733 = vmatprep.mubr.msk.f32.mxu1 %vm156_vm1, %v9470_v56  ;;  %v13060_v55 = vunpack.c.l.bf16 %v9837_v53 }
  0x3c   : > { %10500 = vmatmul.mubr.msk.f32.vlgmr.msra.gmra.mrb[0].mxu0 %vm156_vm1, %v9379_v57  ;;  %10734 = vmatmul.mubr.msk.f32.vlgmr.msra.gmra.mrb[0].mxu1 %vm156_vm1, %v9471_v58  ;;  %v13067_v57 = vunpack.c.h.bf16 %v9837_v53 }
  0x3d   : > { %10524 = vmatpush3.msk.msra.mxu0 %vm205_vm0, %v12441_v17  ;;  %10758 = vmatpush3.msk.msra.mxu1 %vm205_vm0, %v12441_v17  ;;  %v8365_v17 = vld [vmem:[%s14074_s1 + $0x14] sm:$0x7] }
  0x3e   : > { %10502 = vmatprep.mubr.msk.f32.mxu0 %vm156_vm1, %v12416_v9  ;;  %10736 = vmatprep.mubr.msk.f32.mxu1 %vm156_vm1, %v12418_v10 }
  0x3f   : > { %10549 = vmatprep.subr.msk.mxu0 %vm205_vm0, %v8291_v59  ;;  %10783 = vmatprep.subr.msk.mxu1 %vm205_vm0, %v8291_v59 }
  0x40   : > { %10503 = vmatmul.mubr.msk.f32.gmra.mrb[2].mxu0 %vm156_vm1, %v12422_v13  ;;  %10737 = vmatmul.mubr.msk.f32.gmra.mrb[2].mxu1 %vm156_vm1, %v12424_v14 }
  0x41   : > { %10505 = vmatprep.mubr.msk.f32.mxu0 %vm156_vm1, %v12434_v15  ;;  %10739 = vmatprep.mubr.msk.f32.mxu1 %vm156_vm1, %v12436_v16 }
  0x44   : > { %10506 = vmatmul.mubr.msk.f32.gmra.mrb[4].mxu0 %vm156_vm1, %v12445_v18  ;;  %10740 = vmatmul.mubr.msk.f32.gmra.mrb[4].mxu1 %vm156_vm1, %v12447_v19 }
  0x45   : > { %10508 = vmatprep.mubr.msk.f32.mxu0 %vm156_vm1, %v12463_v22  ;;  %10742 = vmatprep.mubr.msk.f32.mxu1 %vm156_vm1, %v12465_v23 }
  0x48   : > { %10509 = vmatmul.mubr.msk.f32.gmra.mrb[6].mxu0 %vm156_vm1, %v12471_v24  ;;  %10743 = vmatmul.mubr.msk.f32.gmra.mrb[6].mxu1 %vm156_vm1, %v12473_v25 }
  0x49   : > { %10511 = vmatprep.mubr.msk.f32.mxu0 %vm156_vm1, %v12481_v28  ;;  %10745 = vmatprep.mubr.msk.f32.mxu1 %vm156_vm1, %v12483_v29 }
  0x4c   : > { %10512 = vmatmul.mubr.msk.f32.gmra.mrb[8].mxu0 %vm156_vm1, %v12489_v30  ;;  %10746 = vmatmul.mubr.msk.f32.gmra.mrb[8].mxu1 %vm156_vm1, %v12491_v31 }
  0x4d   : > { %10514 = vmatprep.mubr.msk.f32.mxu0 %vm156_vm1, %v12499_v34  ;;  %10748 = vmatprep.mubr.msk.f32.mxu1 %vm156_vm1, %v12501_v35 }
  0x50   : > { %10515 = vmatmul.mubr.msk.f32.gmra.mrb[10].mxu0 %vm156_vm1, %v12507_v36  ;;  %10749 = vmatmul.mubr.msk.f32.gmra.mrb[10].mxu1 %vm156_vm1, %v12509_v37 }
  0x51   : > { %10517 = vmatprep.mubr.msk.f32.mxu0 %vm156_vm1, %v12517_v40  ;;  %10751 = vmatprep.mubr.msk.f32.mxu1 %vm156_vm1, %v12519_v41 }
  0x54   : > { %10518 = vmatmul.mubr.msk.f32.gmra.mrb[12].mxu0 %vm156_vm1, %v12525_v42  ;;  %10752 = vmatmul.mubr.msk.f32.gmra.mrb[12].mxu1 %vm156_vm1, %v12527_v43 }
  0x55   : > { %10520 = vmatprep.mubr.msk.f32.mxu0 %vm156_vm1, %v12535_v46  ;;  %10754 = vmatprep.mubr.msk.f32.mxu1 %vm156_vm1, %v12537_v47 }
  0x58   : > { %10521 = vmatmul.mubr.msk.f32.gmra.mrb[14].mxu0 %vm156_vm1, %v12543_v48  ;;  %10755 = vmatmul.mubr.msk.f32.gmra.mrb[14].mxu1 %vm156_vm1, %v12545_v49 }
  0x59   : > { %10525 = vmatprep.mubr.msk.f32.mxu0 %vm156_vm1, %v12416_v9  ;;  %10759 = vmatprep.mubr.msk.f32.mxu1 %vm156_vm1, %v12418_v10  ;;  %v9810_v9 = vld [vmem:[%s12407_s18 + $0x98] sm:$0xff]  }
  0x5a   : > { %v12732_v12 = vunpack.c.l.bf16 %v9810_v9 }
  0x5c   : > { %10526 = vmatmul.mubr.msk.f32.vlgmr.msra.gmra.mrb[0].mxu0 %vm156_vm1, %v12422_v13  ;;  %10760 = vmatmul.mubr.msk.f32.vlgmr.msra.gmra.mrb[0].mxu1 %vm156_vm1, %v12424_v14  ;;  %v9811_v13 = vld [vmem:[%s12407_s18 + $0xa0] sm:$0xff]  }
  0x5d   : > { %10550 = vmatpush3.msk.msra.mxu0 %vm205_vm0, %v8291_v59  ;;  %10784 = vmatpush3.msk.msra.mxu1 %vm205_vm0, %v8291_v59  ;;  %v12761_v21 = vunpack.c.h.bf16 %v9811_v13  ;;  %v9839_v59 = vld [vmem:[%s12407_s18 + $0x110] sm:$0xff]  }
  0x5e   : > { %10528 = vmatprep.mubr.msk.f32.mxu0 %vm156_vm1, %v12434_v15  ;;  %10762 = vmatprep.mubr.msk.f32.mxu1 %vm156_vm1, %v12436_v16  ;;  %v12741_v15 = vunpack.c.h.bf16 %v9810_v9  ;;  %v13086_v61 = vunpack.c.l.bf16 %v9839_v59 }
  0x5f   : > { %10575 = vmatprep.subr.msk.mxu0 %vm205_vm0, %v8328_v60  ;;  %10809 = vmatprep.subr.msk.mxu1 %vm205_vm0, %v8328_v60 }
  0x60   : > { %10529 = vmatmul.mubr.msk.f32.gmra.mrb[2].mxu0 %vm156_vm1, %v12445_v18  ;;  %10763 = vmatmul.mubr.msk.f32.gmra.mrb[2].mxu1 %vm156_vm1, %v12447_v19  ;;  %v12748_v18 = vunpack.c.l.bf16 %v9811_v13 }
  0x61   : > { %10531 = vmatprep.mubr.msk.f32.mxu0 %vm156_vm1, %v12463_v22  ;;  %10765 = vmatprep.mubr.msk.f32.mxu1 %vm156_vm1, %v12465_v23  ;;  %v12767_v22 = vunpack.c.l.bf16 %v9812_v20 }
  0x64   : > { %10532 = vmatmul.mubr.msk.f32.gmra.mrb[4].mxu0 %vm156_vm1, %v12471_v24  ;;  %10766 = vmatmul.mubr.msk.f32.gmra.mrb[4].mxu1 %vm156_vm1, %v12473_v25  ;;  %v9813_v24 = vld [vmem:[%s12407_s18 + $0xb0] sm:$0xff]  }
  0x65   : > { %10534 = vmatprep.mubr.msk.f32.mxu0 %vm156_vm1, %v12481_v28  ;;  %10768 = vmatprep.mubr.msk.f32.mxu1 %vm156_vm1, %v12483_v29  ;;  %v12780_v27 = vunpack.c.l.bf16 %v9813_v24  ;;  %v9814_v28 = vld [vmem:[%s12407_s18 + $0xb8] sm:$0xff]  }
  0x66   : > { %v12793_v32 = vunpack.c.l.bf16 %v9814_v28 }
  0x68   : > { %10535 = vmatmul.mubr.msk.f32.gmra.mrb[6].mxu0 %vm156_vm1, %v12489_v30  ;;  %10769 = vmatmul.mubr.msk.f32.gmra.mrb[6].mxu1 %vm156_vm1, %v12491_v31  ;;  %v12787_v30 = vunpack.c.h.bf16 %v9813_v24 }
  0x69   : > { %10537 = vmatprep.mubr.msk.f32.mxu0 %vm156_vm1, %v12499_v34  ;;  %10771 = vmatprep.mubr.msk.f32.mxu1 %vm156_vm1, %v12501_v35  ;;  %v12800_v34 = vunpack.c.h.bf16 %v9814_v28 }
  0x6c   : > { %10538 = vmatmul.mubr.msk.f32.gmra.mrb[8].mxu0 %vm156_vm1, %v12507_v36  ;;  %10772 = vmatmul.mubr.msk.f32.gmra.mrb[8].mxu1 %vm156_vm1, %v12509_v37  ;;  %v12806_v36 = vunpack.c.l.bf16 %v9815_v33 }
  0x6d   : > { %10540 = vmatprep.mubr.msk.f32.mxu0 %vm156_vm1, %v12517_v40  ;;  %10774 = vmatprep.mubr.msk.f32.mxu1 %vm156_vm1, %v12519_v41  ;;  %v12819_v40 = vunpack.c.l.bf16 %v9816_v38 }
  0x70   : > { %10541 = vmatmul.mubr.msk.f32.gmra.mrb[10].mxu0 %vm156_vm1, %v12525_v42  ;;  %10775 = vmatmul.mubr.msk.f32.gmra.mrb[10].mxu1 %vm156_vm1, %v12527_v43  ;;  %v12822_v42 = vld [vmem:[%s12407_s18 + $0x94] ss:$60 sps:$4 sm:$0xff]  }
  0x71   : > { %10543 = vmatprep.mubr.msk.f32.mxu0 %vm156_vm1, %v12535_v46  ;;  %10777 = vmatprep.mubr.msk.f32.mxu1 %vm156_vm1, %v12537_v47  ;;  %v1816_v45 = vunpack.c.l.bf16 %v12822_v42  ;;  %v8401_v46 = vld [vmem:[%s14074_s1 + $0x18] sm:$0x7]  ;;  %v1831_v4 = vunpack.c.h.bf16 %v12822_v42 }
  0x74   : > { %10544 = vmatmul.mubr.msk.f32.gmra.mrb[12].mxu0 %vm156_vm1, %v12543_v48  ;;  %10778 = vmatmul.mubr.msk.f32.gmra.mrb[12].mxu1 %vm156_vm1, %v12545_v49 }
  0x75   : > { %10546 = vmatprep.mubr.msk.f32.mxu0 %vm156_vm1, %v9466_v63  ;;  %10780 = vmatprep.mubr.msk.f32.mxu1 %vm156_vm1, %v9558_v2  ;;  %v13093_v63 = vunpack.c.h.bf16 %v9839_v59 }
  0x78   : > { %10547 = vmatmul.mubr.msk.f32.gmra.mrb[14].mxu0 %vm156_vm1, %v9467_v5  ;;  %10781 = vmatmul.mubr.msk.f32.gmra.mrb[14].mxu1 %vm156_vm1, %v9559_v6  ;;  %v9854_v5 = vld [vmem:[%s12407_s18 + $0x118] sm:$0xff]  }
  0x79   : > { %10551 = vmatprep.mubr.msk.f32.mxu0 %vm156_vm1, %v9470_v56  ;;  %10785 = vmatprep.mubr.msk.f32.mxu1 %vm156_vm1, %v9562_v7  ;;  %v9838_v56 = vld [vmem:[%s12407_s18 + $0x108] sm:$0xff]  }
  0x7c   : > { %10552 = vmatmul.mubr.msk.f32.vlgmr.msra.gmra.mrb[0].mxu0 %vm156_vm1, %v9471_v58  ;;  %10786 = vmatmul.mubr.msk.f32.vlgmr.msra.gmra.mrb[0].mxu1 %vm156_vm1, %v9563_v11  ;;  %v13073_v58 = vunpack.c.l.bf16 %v9838_v56 }
  0x7d   : > { %10576 = vmatpush3.msk.msra.mxu0 %vm205_vm0, %v8328_v60  ;;  %10810 = vmatpush3.msk.msra.mxu1 %vm205_vm0, %v8328_v60  ;;  %v13080_v60 = vunpack.c.h.bf16 %v9838_v56 }
  0x7e   : > { %10554 = vmatprep.mubr.msk.f32.mxu0 %vm156_vm1, %v12418_v10  ;;  %10788 = vmatprep.mubr.msk.f32.mxu1 %vm156_vm1, %v12732_v12 }
  0x7f   : > { %10601 = vmatprep.subr.msk.mxu0 %vm205_vm0, %v8365_v17  ;;  %10835 = vmatprep.subr.msk.mxu1 %vm205_vm0, %v8365_v17 }
  0x80   : > { %10555 = vmatmul.mubr.msk.f32.gmra.mrb[2].mxu0 %vm156_vm1, %v12424_v14  ;;  %10789 = vmatmul.mubr.msk.f32.gmra.mrb[2].mxu1 %vm156_vm1, %v12741_v15 }
  0x81   : > { %10557 = vmatprep.mubr.msk.f32.mxu0 %vm156_vm1, %v12436_v16  ;;  %10791 = vmatprep.mubr.msk.f32.mxu1 %vm156_vm1, %v12748_v18 }
  0x84   : > { %10558 = vmatmul.mubr.msk.f32.gmra.mrb[4].mxu0 %vm156_vm1, %v12447_v19  ;;  %10792 = vmatmul.mubr.msk.f32.gmra.mrb[4].mxu1 %vm156_vm1, %v12761_v21 }
  0x85   : > { %10560 = vmatprep.mubr.msk.f32.mxu0 %vm156_vm1, %v12465_v23  ;;  %10794 = vmatprep.mubr.msk.f32.mxu1 %vm156_vm1, %v12767_v22 }
  0x88   : > { %10561 = vmatmul.mubr.msk.f32.gmra.mrb[6].mxu0 %vm156_vm1, %v12473_v25  ;;  %10795 = vmatmul.mubr.msk.f32.gmra.mrb[6].mxu1 %vm156_vm1, %v12774_v26 }
  0x89   : > { %10563 = vmatprep.mubr.msk.f32.mxu0 %vm156_vm1, %v12483_v29  ;;  %10797 = vmatprep.mubr.msk.f32.mxu1 %vm156_vm1, %v12780_v27 }
  0x8c   : > { %10564 = vmatmul.mubr.msk.f32.gmra.mrb[8].mxu0 %vm156_vm1, %v12491_v31  ;;  %10798 = vmatmul.mubr.msk.f32.gmra.mrb[8].mxu1 %vm156_vm1, %v12787_v30 }
  0x8d   : > { %10566 = vmatprep.mubr.msk.f32.mxu0 %vm156_vm1, %v12501_v35  ;;  %10800 = vmatprep.mubr.msk.f32.mxu1 %vm156_vm1, %v12793_v32 }
  0x90   : > { %10567 = vmatmul.mubr.msk.f32.gmra.mrb[10].mxu0 %vm156_vm1, %v12509_v37  ;;  %10801 = vmatmul.mubr.msk.f32.gmra.mrb[10].mxu1 %vm156_vm1, %v12800_v34 }
  0x91   : > { %10569 = vmatprep.mubr.msk.f32.mxu0 %vm156_vm1, %v12519_v41  ;;  %10803 = vmatprep.mubr.msk.f32.mxu1 %vm156_vm1, %v12806_v36 }
  0x94   : > { %10570 = vmatmul.mubr.msk.f32.gmra.mrb[12].mxu0 %vm156_vm1, %v12527_v43  ;;  %10804 = vmatmul.mubr.msk.f32.gmra.mrb[12].mxu1 %vm156_vm1, %v12813_v39 }
  0x95   : > { %10572 = vmatprep.mubr.msk.f32.mxu0 %vm156_vm1, %v12537_v47  ;;  %10806 = vmatprep.mubr.msk.f32.mxu1 %vm156_vm1, %v12819_v40 }
  0x98   : > { %10573 = vmatmul.mubr.msk.f32.gmra.mrb[14].mxu0 %vm156_vm1, %v12545_v49  ;;  %10807 = vmatmul.mubr.msk.f32.gmra.mrb[14].mxu1 %vm156_vm1, %v12828_v44 }
  0x99   : > { %10577 = vmatprep.mubr.msk.f32.mxu0 %vm156_vm1, %v1068_v8  ;;  %10811 = vmatprep.mubr.msk.f32.mxu1 %vm156_vm1, %v1816_v45  ;;  %v8438_v8 = vld [vmem:[%s14074_s1 + $0x1c] sm:$0x7] }
  0x9c   : > { %10578 = vmatmul.mubr.msk.f32.vlgmr.msra.gmra.mrb[0].mxu0 %vm156_vm1, %v12418_v10  ;;  %10812 = vmatmul.mubr.msk.f32.vlgmr.msra.gmra.mrb[0].mxu1 %vm156_vm1, %v12732_v12 }
  0x9d   : > { %10602 = vmatpush3.msk.msra.mxu0 %vm205_vm0, %v8365_v17  ;;  %10836 = vmatpush3.msk.msra.mxu1 %vm205_vm0, %v8365_v17 }
  0x9e   : > { %10580 = vmatprep.mubr.msk.f32.mxu0 %vm156_vm1, %v12424_v14  ;;  %10814 = vmatprep.mubr.msk.f32.mxu1 %vm156_vm1, %v12741_v15 }
  0x9f   : > { %10627 = vmatprep.subr.msk.mxu0 %vm205_vm0, %v8401_v46  ;;  %10861 = vmatprep.subr.msk.mxu1 %vm205_vm0, %v8401_v46 }
  0xa0   : > { %10581 = vmatmul.mubr.msk.f32.gmra.mrb[2].mxu0 %vm156_vm1, %v12436_v16  ;;  %10815 = vmatmul.mubr.msk.f32.gmra.mrb[2].mxu1 %vm156_vm1, %v12748_v18 }
  0xa1   : > { %10583 = vmatprep.mubr.msk.f32.mxu0 %vm156_vm1, %v12447_v19  ;;  %10817 = vmatprep.mubr.msk.f32.mxu1 %vm156_vm1, %v12761_v21 }
  0xa4   : > { %10584 = vmatmul.mubr.msk.f32.gmra.mrb[4].mxu0 %vm156_vm1, %v12465_v23  ;;  %10818 = vmatmul.mubr.msk.f32.gmra.mrb[4].mxu1 %vm156_vm1, %v12767_v22 }
  0xa5   : > { %10586 = vmatprep.mubr.msk.f32.mxu0 %vm156_vm1, %v12473_v25  ;;  %10820 = vmatprep.mubr.msk.f32.mxu1 %vm156_vm1, %v12774_v26 }
  0xa8   : > { %10587 = vmatmul.mubr.msk.f32.gmra.mrb[6].mxu0 %vm156_vm1, %v12483_v29  ;;  %10821 = vmatmul.mubr.msk.f32.gmra.mrb[6].mxu1 %vm156_vm1, %v12780_v27 }
  0xa9   : > { %10589 = vmatprep.mubr.msk.f32.mxu0 %vm156_vm1, %v12491_v31  ;;  %10823 = vmatprep.mubr.msk.f32.mxu1 %vm156_vm1, %v12787_v30 }
  0xac   : > { %10590 = vmatmul.mubr.msk.f32.gmra.mrb[8].mxu0 %vm156_vm1, %v12501_v35  ;;  %10824 = vmatmul.mubr.msk.f32.gmra.mrb[8].mxu1 %vm156_vm1, %v12793_v32 }
  0xad   : > { %10592 = vmatprep.mubr.msk.f32.mxu0 %vm156_vm1, %v12509_v37  ;;  %10826 = vmatprep.mubr.msk.f32.mxu1 %vm156_vm1, %v12800_v34 }
  0xb0   : > { %10593 = vmatmul.mubr.msk.f32.gmra.mrb[10].mxu0 %vm156_vm1, %v12519_v41  ;;  %10827 = vmatmul.mubr.msk.f32.gmra.mrb[10].mxu1 %vm156_vm1, %v12806_v36 }
  0xb1   : > { %10595 = vmatprep.mubr.msk.f32.mxu0 %vm156_vm1, %v12527_v43  ;;  %10829 = vmatprep.mubr.msk.f32.mxu1 %vm156_vm1, %v12813_v39 }
  0xb4   : > { %10596 = vmatmul.mubr.msk.f32.gmra.mrb[12].mxu0 %vm156_vm1, %v12537_v47  ;;  %10830 = vmatmul.mubr.msk.f32.gmra.mrb[12].mxu1 %vm156_vm1, %v12819_v40 }
  0xb5   : > { %10598 = vmatprep.mubr.msk.f32.mxu0 %vm156_vm1, %v12545_v49  ;;  %10832 = vmatprep.mubr.msk.f32.mxu1 %vm156_vm1, %v12828_v44 }
  0xb8   : > { %10599 = vmatmul.mubr.msk.f32.gmra.mrb[14].mxu0 %vm156_vm1, %v1083_v54  ;;  %10833 = vmatmul.mubr.msk.f32.gmra.mrb[14].mxu1 %vm156_vm1, %v1831_v4  ;;  %v13054_v54 = vunpack.c.h.bf16 %v9836_v50 }
  0xb9   : > { %10603 = vmatprep.mubr.msk.f32.mxu0 %vm156_vm1, %v12418_v10  ;;  %10837 = vmatprep.mubr.msk.f32.mxu1 %vm156_vm1, %v12732_v12  ;;  %v12967_v10 = vld [vmem:[%s12407_s18 + $0xd0] sm:$0xff]  }
  0xbc   : > { %10604 = vmatmul.mubr.msk.f32.vlgmr.msra.gmra.mrb[0].mxu0 %vm156_vm1, %v12424_v14  ;;  %10838 = vmatmul.mubr.msk.f32.vlgmr.msra.gmra.mrb[0].mxu1 %vm156_vm1, %v12741_v15  ;;  %v9650_v14 = vunpack.c.l.bf16 %v12967_v10 }
  0xbd   : > { %10628 = vmatpush3.msk.msra.mxu0 %vm205_vm0, %v8401_v46  ;;  %10862 = vmatpush3.msk.msra.mxu1 %vm205_vm0, %v8401_v46 }
  0xbe   : > { %10606 = vmatprep.mubr.msk.f32.mxu0 %vm156_vm1, %v12436_v16  ;;  %10840 = vmatprep.mubr.msk.f32.mxu1 %vm156_vm1, %v12748_v18  ;;  %v9832_v16 = vld [vmem:[%s12407_s18 + $0xd8] sm:$0xff]  }
  0xbf   : > { %10653 = vmatprep.subr.msk.mxu0 %vm205_vm0, %v8438_v8  ;;  %10887 = vmatprep.subr.msk.mxu1 %vm205_vm0, %v8438_v8 }
  0xc0   : > { %10607 = vmatmul.mubr.msk.f32.gmra.mrb[2].mxu0 %vm156_vm1, %v12447_v19  ;;  %10841 = vmatmul.mubr.msk.f32.gmra.mrb[2].mxu1 %vm156_vm1, %v12761_v21  ;;  %v9651_v19 = vunpack.c.h.bf16 %v12967_v10 }
  0xc1   : > { %10609 = vmatprep.mubr.msk.f32.mxu0 %vm156_vm1, %v12465_v23  ;;  %10843 = vmatprep.mubr.msk.f32.mxu1 %vm156_vm1, %v12767_v22  ;;  %v9654_v23 = vunpack.c.l.bf16 %v9832_v16 }
  0xc4   : > { %10610 = vmatmul.mubr.msk.f32.gmra.mrb[4].mxu0 %vm156_vm1, %v12473_v25  ;;  %10844 = vmatmul.mubr.msk.f32.gmra.mrb[4].mxu1 %vm156_vm1, %v12774_v26  ;;  %v9833_v25 = vld [vmem:[%s12407_s18 + $0xe0] sm:$0xff]  }
  0xc5   : > { %10612 = vmatprep.mubr.msk.f32.mxu0 %vm156_vm1, %v12483_v29  ;;  %10846 = vmatprep.mubr.msk.f32.mxu1 %vm156_vm1, %v12780_v27  ;;  %v9655_v29 = vunpack.c.h.bf16 %v9832_v16 }
  0xc8   : > { %10613 = vmatmul.mubr.msk.f32.gmra.mrb[6].mxu0 %vm156_vm1, %v12491_v31  ;;  %10847 = vmatmul.mubr.msk.f32.gmra.mrb[6].mxu1 %vm156_vm1, %v12787_v30  ;;  %v13001_v31 = vunpack.c.l.bf16 %v9833_v25 }
  0xc9   : > { %10615 = vmatprep.mubr.msk.f32.mxu0 %vm156_vm1, %v12501_v35  ;;  %10849 = vmatprep.mubr.msk.f32.mxu1 %vm156_vm1, %v12793_v32  ;;  %v9834_v35 = vld [vmem:[%s12407_s18 + $0xe8] sm:$0xff]  }
  0xca   : > { %v13028_v48 = vunpack.c.h.bf16 %v9834_v35 }
  0xcc   : > { %10616 = vmatmul.mubr.msk.f32.gmra.mrb[8].mxu0 %vm156_vm1, %v12509_v37  ;;  %10850 = vmatmul.mubr.msk.f32.gmra.mrb[8].mxu1 %vm156_vm1, %v12800_v34  ;;  %v13008_v37 = vunpack.c.h.bf16 %v9833_v25 }
  0xcd   : > { %10618 = vmatprep.mubr.msk.f32.mxu0 %vm156_vm1, %v12519_v41  ;;  %10852 = vmatprep.mubr.msk.f32.mxu1 %vm156_vm1, %v12806_v36  ;;  %v8475_v41 = vld [vmem:[%s14074_s1 + $0x20] sm:$0x7] }
  0xd0   : > { %10619 = vmatmul.mubr.msk.f32.gmra.mrb[10].mxu0 %vm156_vm1, %v12527_v43  ;;  %10853 = vmatmul.mubr.msk.f32.gmra.mrb[10].mxu1 %vm156_vm1, %v12813_v39  ;;  %v13015_v43 = vunpack.c.l.bf16 %v9834_v35 }
  0xd1   : > { %10621 = vmatprep.mubr.msk.f32.mxu0 %vm156_vm1, %v12537_v47  ;;  %10855 = vmatprep.mubr.msk.f32.mxu1 %vm156_vm1, %v12819_v40  ;;  %v9835_v47 = vld [vmem:[%s12407_s18 + $0xf0] sm:$0xff]  }
  0xd2   : > { %v13041_v51 = vunpack.c.h.bf16 %v9835_v47 }
  0xd4   : > { %10622 = vmatmul.mubr.msk.f32.gmra.mrb[12].mxu0 %vm156_vm1, %v12545_v49  ;;  %10856 = vmatmul.mubr.msk.f32.gmra.mrb[12].mxu1 %vm156_vm1, %v12828_v44  ;;  %v13034_v49 = vunpack.c.l.bf16 %v9835_v47 }
  0xd5   : > { %10624 = vmatprep.mubr.msk.f32.mxu0 %vm156_vm1, %v9558_v2  ;;  %10858 = vmatprep.mubr.msk.f32.mxu1 %vm156_vm1, %v9650_v14  ;;  %v3539_v2 = vunpack.c.l.bf16 %v8634_v62 }
  0xd8   : > { %10625 = vmatmul.mubr.msk.f32.gmra.mrb[14].mxu0 %vm156_vm1, %v9559_v6  ;;  %10859 = vmatmul.mubr.msk.f32.gmra.mrb[14].mxu1 %vm156_vm1, %v9651_v19  ;;  %v9742_v6 = vunpack.c.l.bf16 %v9854_v5 }
  0xd9   : > { %10629 = vmatprep.mubr.msk.f32.mxu0 %vm156_vm1, %v9562_v7  ;;  %10863 = vmatprep.mubr.msk.f32.mxu1 %vm156_vm1, %v9654_v23  ;;  %v9743_v7 = vunpack.c.h.bf16 %v9854_v5 }
  0xdc   : > { %10630 = vmatmul.mubr.msk.f32.vlgmr.msra.gmra.mrb[0].mxu0 %vm156_vm1, %v9563_v11  ;;  %10864 = vmatmul.mubr.msk.f32.vlgmr.msra.gmra.mrb[0].mxu1 %vm156_vm1, %v9655_v29 }
  0xdd   : > { %10654 = vmatpush3.msk.msra.mxu0 %vm205_vm0, %v8438_v8  ;;  %10888 = vmatpush3.msk.msra.mxu1 %vm205_vm0, %v8438_v8 }
  0xde   : > { %10632 = vmatprep.mubr.msk.f32.mxu0 %vm156_vm1, %v12732_v12  ;;  %10866 = vmatprep.mubr.msk.f32.mxu1 %vm156_vm1, %v13001_v31 }
  0xdf   : > { %10679 = vmatprep.subr.msk.mxu0 %vm205_vm0, %v8475_v41  ;;  %10913 = vmatprep.subr.msk.mxu1 %vm205_vm0, %v8475_v41 }
  0xe0   : > { %10633 = vmatmul.mubr.msk.f32.gmra.mrb[2].mxu0 %vm156_vm1, %v12741_v15  ;;  %10867 = vmatmul.mubr.msk.f32.gmra.mrb[2].mxu1 %vm156_vm1, %v13008_v37 }
  0xe1   : > { %10635 = vmatprep.mubr.msk.f32.mxu0 %vm156_vm1, %v12748_v18  ;;  %10869 = vmatprep.mubr.msk.f32.mxu1 %vm156_vm1, %v13015_v43 }
  0xe4   : > { %10636 = vmatmul.mubr.msk.f32.gmra.mrb[4].mxu0 %vm156_vm1, %v12761_v21  ;;  %10870 = vmatmul.mubr.msk.f32.gmra.mrb[4].mxu1 %vm156_vm1, %v13028_v48 }
  0xe5   : > { %10638 = vmatprep.mubr.msk.f32.mxu0 %vm156_vm1, %v12767_v22  ;;  %10872 = vmatprep.mubr.msk.f32.mxu1 %vm156_vm1, %v13034_v49 }
  0xe8   : > { %10639 = vmatmul.mubr.msk.f32.gmra.mrb[6].mxu0 %vm156_vm1, %v12774_v26  ;;  %10873 = vmatmul.mubr.msk.f32.gmra.mrb[6].mxu1 %vm156_vm1, %v13041_v51 }
  0xe9   : > { %10641 = vmatprep.mubr.msk.f32.mxu0 %vm156_vm1, %v12780_v27  ;;  %10875 = vmatprep.mubr.msk.f32.mxu1 %vm156_vm1, %v13047_v52 }
  0xec   : > { %10642 = vmatmul.mubr.msk.f32.gmra.mrb[8].mxu0 %vm156_vm1, %v12787_v30  ;;  %10876 = vmatmul.mubr.msk.f32.gmra.mrb[8].mxu1 %vm156_vm1, %v13054_v54 }
  0xed   : > { %10644 = vmatprep.mubr.msk.f32.mxu0 %vm156_vm1, %v12793_v32  ;;  %10878 = vmatprep.mubr.msk.f32.mxu1 %vm156_vm1, %v13060_v55 }
  0xf0   : > { %10645 = vmatmul.mubr.msk.f32.gmra.mrb[10].mxu0 %vm156_vm1, %v12800_v34  ;;  %10879 = vmatmul.mubr.msk.f32.gmra.mrb[10].mxu1 %vm156_vm1, %v13067_v57 }
  0xf1   : > { %10647 = vmatprep.mubr.msk.f32.mxu0 %vm156_vm1, %v12806_v36  ;;  %10881 = vmatprep.mubr.msk.f32.mxu1 %vm156_vm1, %v13073_v58 }
  0xf4   : > { %10648 = vmatmul.mubr.msk.f32.gmra.mrb[12].mxu0 %vm156_vm1, %v12813_v39  ;;  %10882 = vmatmul.mubr.msk.f32.gmra.mrb[12].mxu1 %vm156_vm1, %v13080_v60 }
  0xf5   : > { %10650 = vmatprep.mubr.msk.f32.mxu0 %vm156_vm1, %v12819_v40  ;;  %10884 = vmatprep.mubr.msk.f32.mxu1 %vm156_vm1, %v13086_v61 }
  0xf8   : > { %10651 = vmatmul.mubr.msk.f32.gmra.mrb[14].mxu0 %vm156_vm1, %v12828_v44  ;;  %10885 = vmatmul.mubr.msk.f32.gmra.mrb[14].mxu1 %vm156_vm1, %v13093_v63 }
  0xf9   : > { %10655 = vmatprep.mubr.msk.f32.mxu0 %vm156_vm1, %v1816_v45  ;;  %10889 = vmatprep.mubr.msk.f32.mxu1 %vm156_vm1, %v3539_v2 }
  0xfc   : > { %10656 = vmatmul.mubr.msk.f32.vlgmr.msra.gmra.mrb[0].mxu0 %vm156_vm1, %v12732_v12  ;;  %10890 = vmatmul.mubr.msk.f32.vlgmr.msra.gmra.mrb[0].mxu1 %vm156_vm1, %v13001_v31 }
  0xfd   : > { %10680 = vmatpush3.msk.msra.mxu0 %vm205_vm0, %v8475_v41  ;;  %10914 = vmatpush3.msk.msra.mxu1 %vm205_vm0, %v8475_v41 }
  0xfe   : > { %10658 = vmatprep.mubr.msk.f32.mxu0 %vm156_vm1, %v12741_v15  ;;  %10892 = vmatprep.mubr.msk.f32.mxu1 %vm156_vm1, %v13008_v37 }
 0x100   : > { %10659 = vmatmul.mubr.msk.f32.gmra.mrb[2].mxu0 %vm156_vm1, %v12748_v18  ;;  %10893 = vmatmul.mubr.msk.f32.gmra.mrb[2].mxu1 %vm156_vm1, %v13015_v43 }
 0x101   : > { %10661 = vmatprep.mubr.msk.f32.mxu0 %vm156_vm1, %v12761_v21  ;;  %10895 = vmatprep.mubr.msk.f32.mxu1 %vm156_vm1, %v13028_v48 }
 0x104   : > { %10662 = vmatmul.mubr.msk.f32.gmra.mrb[4].mxu0 %vm156_vm1, %v12767_v22  ;;  %10896 = vmatmul.mubr.msk.f32.gmra.mrb[4].mxu1 %vm156_vm1, %v13034_v49 }
 0x105   : > { %10664 = vmatprep.mubr.msk.f32.mxu0 %vm156_vm1, %v12774_v26  ;;  %10898 = vmatprep.mubr.msk.f32.mxu1 %vm156_vm1, %v13041_v51 }
 0x108   : > { %10665 = vmatmul.mubr.msk.f32.gmra.mrb[6].mxu0 %vm156_vm1, %v12780_v27  ;;  %10899 = vmatmul.mubr.msk.f32.gmra.mrb[6].mxu1 %vm156_vm1, %v13047_v52 }
 0x109   : > { %10667 = vmatprep.mubr.msk.f32.mxu0 %vm156_vm1, %v12787_v30  ;;  %10901 = vmatprep.mubr.msk.f32.mxu1 %vm156_vm1, %v13054_v54 }
 0x10c   : > { %10668 = vmatmul.mubr.msk.f32.gmra.mrb[8].mxu0 %vm156_vm1, %v12793_v32  ;;  %10902 = vmatmul.mubr.msk.f32.gmra.mrb[8].mxu1 %vm156_vm1, %v13060_v55 }
 0x10d   : > { %10670 = vmatprep.mubr.msk.f32.mxu0 %vm156_vm1, %v12800_v34  ;;  %10904 = vmatprep.mubr.msk.f32.mxu1 %vm156_vm1, %v13067_v57 }
 0x110   : > { %10671 = vmatmul.mubr.msk.f32.gmra.mrb[10].mxu0 %vm156_vm1, %v12806_v36  ;;  %10905 = vmatmul.mubr.msk.f32.gmra.mrb[10].mxu1 %vm156_vm1, %v13073_v58 }
 0x111   : > { %10673 = vmatprep.mubr.msk.f32.mxu0 %vm156_vm1, %v12813_v39  ;;  %10907 = vmatprep.mubr.msk.f32.mxu1 %vm156_vm1, %v13080_v60 }
 0x114   : > { %10674 = vmatmul.mubr.msk.f32.gmra.mrb[12].mxu0 %vm156_vm1, %v12819_v40  ;;  %10908 = vmatmul.mubr.msk.f32.gmra.mrb[12].mxu1 %vm156_vm1, %v13086_v61 }
 0x115   : > { %10676 = vmatprep.mubr.msk.f32.mxu0 %vm156_vm1, %v12828_v44  ;;  %10910 = vmatprep.mubr.msk.f32.mxu1 %vm156_vm1, %v13093_v63 }
 0x118   : > { %10677 = vmatmul.mubr.msk.f32.gmra.mrb[14].mxu0 %vm156_vm1, %v1831_v4  ;;  %10911 = vmatmul.mubr.msk.f32.gmra.mrb[14].mxu1 %vm156_vm1, %v3554_v3 }
 0x119   : > { %10681 = vmatprep.mubr.msk.f32.mxu0 %vm156_vm1, %v12732_v12  ;;  %10915 = vmatprep.mubr.msk.f32.mxu1 %vm156_vm1, %v13001_v31 }
 0x11c   : > { %10682 = vmatmul.mubr.msk.f32.vlgmr.msra.gmra.mrb[0].mxu0 %vm156_vm1, %v12741_v15  ;;  %10916 = vmatmul.mubr.msk.f32.vlgmr.msra.gmra.mrb[0].mxu1 %vm156_vm1, %v13008_v37 }
 0x11d   : > { %10684 = vmatprep.mubr.msk.f32.mxu0 %vm156_vm1, %v12748_v18  ;;  %10918 = vmatprep.mubr.msk.f32.mxu1 %vm156_vm1, %v13015_v43 }
 0x120   : > { %10685 = vmatmul.mubr.msk.f32.gmra.mrb[2].mxu0 %vm156_vm1, %v12761_v21  ;;  %10919 = vmatmul.mubr.msk.f32.gmra.mrb[2].mxu1 %vm156_vm1, %v13028_v48 }
 0x121   : > { %10687 = vmatprep.mubr.msk.f32.mxu0 %vm156_vm1, %v12767_v22  ;;  %10921 = vmatprep.mubr.msk.f32.mxu1 %vm156_vm1, %v13034_v49 }
 0x124   : > { %10688 = vmatmul.mubr.msk.f32.gmra.mrb[4].mxu0 %vm156_vm1, %v12774_v26  ;;  %10922 = vmatmul.mubr.msk.f32.gmra.mrb[4].mxu1 %vm156_vm1, %v13041_v51 }
 0x125   : > { %10690 = vmatprep.mubr.msk.f32.mxu0 %vm156_vm1, %v12780_v27  ;;  %10924 = vmatprep.mubr.msk.f32.mxu1 %vm156_vm1, %v13047_v52 }
 0x128   : > { %10691 = vmatmul.mubr.msk.f32.gmra.mrb[6].mxu0 %vm156_vm1, %v12787_v30  ;;  %10925 = vmatmul.mubr.msk.f32.gmra.mrb[6].mxu1 %vm156_vm1, %v13054_v54 }
 0x129   : > { %10693 = vmatprep.mubr.msk.f32.mxu0 %vm156_vm1, %v12793_v32  ;;  %10927 = vmatprep.mubr.msk.f32.mxu1 %vm156_vm1, %v13060_v55 }
 0x12c   : > { %10694 = vmatmul.mubr.msk.f32.gmra.mrb[8].mxu0 %vm156_vm1, %v12800_v34  ;;  %10928 = vmatmul.mubr.msk.f32.gmra.mrb[8].mxu1 %vm156_vm1, %v13067_v57 }
 0x12d   : > { %10696 = vmatprep.mubr.msk.f32.mxu0 %vm156_vm1, %v12806_v36  ;;  %10930 = vmatprep.mubr.msk.f32.mxu1 %vm156_vm1, %v13073_v58 }
 0x130   : > { %10697 = vmatmul.mubr.msk.f32.gmra.mrb[10].mxu0 %vm156_vm1, %v12813_v39  ;;  %10931 = vmatmul.mubr.msk.f32.gmra.mrb[10].mxu1 %vm156_vm1, %v13080_v60 }
 0x131   : > { %10699 = vmatprep.mubr.msk.f32.mxu0 %vm156_vm1, %v12819_v40  ;;  %10933 = vmatprep.mubr.msk.f32.mxu1 %vm156_vm1, %v13086_v61 }
 0x134   : > { %10700 = vmatmul.mubr.msk.f32.gmra.mrb[12].mxu0 %vm156_vm1, %v12828_v44  ;;  %10934 = vmatmul.mubr.msk.f32.gmra.mrb[12].mxu1 %vm156_vm1, %v13093_v63 }
 0x135   : > { %10702 = vmatprep.mubr.msk.f32.mxu0 %vm156_vm1, %v9650_v14  ;;  %10936 = vmatprep.mubr.msk.f32.mxu1 %vm156_vm1, %v9742_v6 }
 0x138   : > { %10703 = vmatmul.mubr.msk.f32.gmra.mrb[14].mxu0 %vm156_vm1, %v9651_v19  ;;  %10937 = vmatmul.mubr.msk.f32.gmra.mrb[14].mxu1 %vm156_vm1, %v9743_v7 }
 0x1ef   : > { %v10683_v9 = vpop.f32.mrb[0].mxu0  ;;  %v10917_v11 = vpop.f32.mrb[0].mxu1 }
 0x1f0   : > { %v2302_v12 = vadd.f32 %v10683_v9, %v12344_v0  ;;  %v4009_v13 = vadd.f32 %v10917_v11, %v12344_v0  ;;  %v2200_v15 = vpop.f32.mrb[1].mxu0  ;;  %v3913_v17 = vpop.f32.mrb[1].mxu1 }
 0x1f1   : > { %v2301_v18 = vadd.f32 %v12344_v0, %v2200_v15  ;;  %v4008_v20 = vadd.f32 %v12344_v0, %v3913_v17 }
 0x1f2   : > { %v2318_v21 = vmax.f32 %v2302_v12, 0.0  ;;  %v4025_v22 = vmax.f32 %v4009_v13, 0.0 }
 0x1f3   : > { %v2317_v24 = vmax.f32 %v2301_v18, 0.0  ;;  %v4024_v26 = vmax.f32 %v4008_v20, 0.0  ;;  %v10686_v27 = vpop.f32.mrb[2].mxu0  ;;  %v10920_v28 = vpop.f32.mrb[2].mxu1 }
 0x1f4   : > { %v2304_v30 = vadd.f32 %v10686_v27, %v12344_v0  ;;  %v4011_v32 = vadd.f32 %v10920_v28, %v12344_v0  ;;  %v2210_v33 = vpop.f32.mrb[3].mxu0  ;;  %v3923_v34 = vpop.f32.mrb[3].mxu1 }
 0x1f5   : > { %v2333_v36 = vmax.f32 %v2317_v24, %v2318_v21  ;;  %v4040_v38 = vmax.f32 %v4024_v26, %v4025_v22  ;;  %v2303_v39 = vadd.f32 %v12344_v0, %v2210_v33  ;;  %v4010_v40 = vadd.f32 %v12344_v0, %v3923_v34 }
 0x1f6   : > { %v2320_v42 = vmax.f32 %v2304_v30, 0.0  ;;  %v4027_v44 = vmax.f32 %v4011_v32, 0.0 }
 0x1f7   : > { %v4048_v45 = vmax.f32 %v2333_v36, %v4040_v38  ;;  %v2319_v46 = vmax.f32 %v2303_v39, 0.0  ;;  %v4026_v4 = vmax.f32 %v4010_v40, 0.0  ;;  %v10689_v8 = vpop.f32.mrb[4].mxu0  ;;  %v10923_v10 = vpop.f32.mrb[4].mxu1 }
 0x1f8   : > { %v2306_v14 = vadd.f32 %v10689_v8, %v12344_v0  ;;  %v4013_v16 = vadd.f32 %v10923_v10, %v12344_v0  ;;  %v2220_v19 = vpop.f32.mrb[5].mxu0  ;;  %v3933_v23 = vpop.f32.mrb[5].mxu1 }
 0x1f9   : > { %v4056_v25 = vpack.c.bf16 %v4048_v45, %v4048_v45  ;;  %v2334_v29 = vmax.f32 %v2319_v46, %v2320_v42  ;;  %v4041_v31 = vmax.f32 %v4026_v4, %v4027_v44  ;;  %v2305_v35 = vadd.f32 %v12344_v0, %v2220_v19 }
 0x1fa   : > { %v2322_v37 = vmax.f32 %v2306_v14, 0.0  ;;  %v4029_v41 = vmax.f32 %v4013_v16, 0.0  ;;  %v4012_v43 = vadd.f32 %v12344_v0, %v3933_v23 }
 0x1fb   : > { %8704 = vst [vmem:[%s13247_s13 + $0x2c] sm:$0xf] %v4056_v25  ;;  %v4049_v47 = vmax.f32 %v2334_v29, %v4041_v31  ;;  %v2321_v48 = vmax.f32 %v2305_v35, 0.0  ;;  %v10692_v49 = vpop.f32.mrb[6].mxu0  ;;  %v10926_v50 = vpop.f32.mrb[6].mxu1 }
 0x1fc   : > { %v4028_v51 = vmax.f32 %v4012_v43, 0.0  ;;  %v2308_v52 = vadd.f32 %v10692_v49, %v12344_v0  ;;  %v4015_v53 = vadd.f32 %v10926_v50, %v12344_v0  ;;  %v2230_v54 = vpop.f32.mrb[7].mxu0  ;;  %v3943_v55 = vpop.f32.mrb[7].mxu1 }
 0x1fd   : > { %v2335_v56 = vmax.f32 %v2321_v48, %v2322_v37  ;;  %v2307_v57 = vadd.f32 %v12344_v0, %v2230_v54  ;;  %v4014_v58 = vadd.f32 %v12344_v0, %v3943_v55 }
 0x1fe   : > { %v4042_v59 = vmax.f32 %v4028_v51, %v4029_v41  ;;  %v2324_v60 = vmax.f32 %v2308_v52, 0.0  ;;  %v4031_v61 = vmax.f32 %v4015_v53, 0.0 }
 0x1ff   : > { %v2323_v62 = vmax.f32 %v2307_v57, 0.0  ;;  %v4030_v63 = vmax.f32 %v4014_v58, 0.0  ;;  %v10695_v2 = vpop.f32.mrb[8].mxu0  ;;  %v10929_v3 = vpop.f32.mrb[8].mxu1 }
 0x200   : > { %v4050_v5 = vmax.f32 %v2335_v56, %v4042_v59  ;;  %v2310_v6 = vadd.f32 %v10695_v2, %v12344_v0  ;;  %v4017_v7 = vadd.f32 %v10929_v3, %v12344_v0  ;;  %v2240_v9 = vpop.f32.mrb[9].mxu0  ;;  %v3953_v11 = vpop.f32.mrb[9].mxu1 }
 0x201   : > { %v2336_v12 = vmax.f32 %v2323_v62, %v2324_v60  ;;  %v4043_v13 = vmax.f32 %v4030_v63, %v4031_v61  ;;  %v2309_v15 = vadd.f32 %v12344_v0, %v2240_v9  ;;  %v4016_v17 = vadd.f32 %v12344_v0, %v3953_v11  ;;  %v13280_v11 = vld [vmem:[%s14077_s4] ss:$0 sm:$0xff] (%p78_p0) }
 0x202   : > { %v9747_v18 = vpack.c.bf16 %v4050_v5, %v4049_v47  ;;  %v2326_v20 = vmax.f32 %v2310_v6, 0.0  ;;  %v4033_v21 = vmax.f32 %v4017_v7, 0.0 }
 0x203   : > { %v4051_v22 = vmax.f32 %v2336_v12, %v4043_v13  ;;  %v2325_v24 = vmax.f32 %v2309_v15, 0.0  ;;  %v4032_v26 = vmax.f32 %v4016_v17, 0.0  ;;  %v10698_v27 = vpop.f32.mrb[10].mxu0  ;;  %v10932_v28 = vpop.f32.mrb[10].mxu1 }
 0x204   : > { %9855 = vst [vmem:[%s13247_s13 + $0x30] sm:$0xff] %v9747_v18   ;;  %v2312_v30 = vadd.f32 %v10698_v27, %v12344_v0  ;;  %v4019_v32 = vadd.f32 %v10932_v28, %v12344_v0  ;;  %v2250_v33 = vpop.f32.mrb[11].mxu0  ;;  %v3963_v34 = vpop.f32.mrb[11].mxu1 }
 0x205   : > { %v2337_v36 = vmax.f32 %v2325_v24, %v2326_v20  ;;  %v4044_v38 = vmax.f32 %v4032_v26, %v4033_v21  ;;  %v2311_v39 = vadd.f32 %v12344_v0, %v2250_v33  ;;  %v4018_v40 = vadd.f32 %v12344_v0, %v3963_v34 }
 0x206   : > { %v2328_v42 = vmax.f32 %v2312_v30, 0.0  ;;  %v4035_v44 = vmax.f32 %v4019_v32, 0.0 }
 0x207   : > { %v4052_v45 = vmax.f32 %v2337_v36, %v4044_v38  ;;  %v2327_v46 = vmax.f32 %v2311_v39, 0.0  ;;  %v4034_v4 = vmax.f32 %v4018_v40, 0.0  ;;  %v10701_v8 = vpop.f32.mrb[12].mxu0  ;;  %v10935_v10 = vpop.f32.mrb[12].mxu1 }
 0x208   : > { %v2314_v14 = vadd.f32 %v10701_v8, %v12344_v0  ;;  %v4021_v16 = vadd.f32 %v10935_v10, %v12344_v0  ;;  %v2260_v19 = vpop.f32.mrb[13].mxu0  ;;  %v3973_v23 = vpop.f32.mrb[13].mxu1 }
 0x209   : > { %v9752_v25 = vpack.c.bf16 %v4052_v45, %v4051_v22  ;;  %v2338_v29 = vmax.f32 %v2327_v46, %v2328_v42  ;;  %v4045_v31 = vmax.f32 %v4034_v4, %v4035_v44  ;;  %v2313_v35 = vadd.f32 %v12344_v0, %v2260_v19 }
 0x20a   : > { %v2330_v37 = vmax.f32 %v2314_v14, 0.0  ;;  %v4037_v41 = vmax.f32 %v4021_v16, 0.0  ;;  %v4020_v43 = vadd.f32 %v12344_v0, %v3973_v23 }
 0x20b   : > { %9856 = vst [vmem:[%s13247_s13 + $0x38] sm:$0xff] %v9752_v25   ;;  %v4053_v47 = vmax.f32 %v2338_v29, %v4045_v31  ;;  %v2329_v48 = vmax.f32 %v2313_v35, 0.0  ;;  %v10704_v49 = vpop.f32.mrb[14].mxu0  ;;  %v10938_v50 = vpop.f32.mrb[14].mxu1 }
 0x20c   : > { %v4036_v51 = vmax.f32 %v4020_v43, 0.0  ;;  %v2316_v52 = vadd.f32 %v10704_v49, %v12344_v0  ;;  %v4023_v53 = vadd.f32 %v10938_v50, %v12344_v0  ;;  %v2270_v54 = vpop.f32.mrb[15].mxu0  ;;  %v3983_v55 = vpop.f32.mrb[15].mxu1 }
 0x20d   : > { %v2339_v56 = vmax.f32 %v2329_v48, %v2330_v37  ;;  %v2315_v57 = vadd.f32 %v12344_v0, %v2270_v54  ;;  %v4022_v58 = vadd.f32 %v12344_v0, %v3983_v55 }
 0x20e   : > { %v4046_v59 = vmax.f32 %v4036_v51, %v4037_v41  ;;  %v2332_v60 = vmax.f32 %v2316_v52, 0.0  ;;  %v4039_v61 = vmax.f32 %v4023_v53, 0.0 }
 0x20f   : > { %v2331_v62 = vmax.f32 %v2315_v57, 0.0  ;;  %v4038_v63 = vmax.f32 %v4022_v58, 0.0 }
 0x210   : > { %v4054_v2 = vmax.f32 %v2339_v56, %v4046_v59 }
 0x211   : > { %v2340_v3 = vmax.f32 %v2331_v62, %v2332_v60  ;;  %v4047_v5 = vmax.f32 %v4038_v63, %v4039_v61  ;;  %80 = sbr.rel (!%p78_p0) target bundleno = 21 (0x15), region = 140 }
 0x212   : > { %v9757_v6 = vpack.c.bf16 %v4054_v2, %v4053_v47 }
 0x213   : > { %v4055_v7 = vmax.f32 %v2340_v3, %v4047_v5 }
 0x214   : > { %9857 = vst [vmem:[%s13247_s13 + $0x40] sm:$0xff] %v9757_v6  }
 0x215   : > { %v4063_v9 = vpack.c.bf16 %v4055_v7, %v4055_v7 }
 0x217   : > { %8711 = vst [vmem:[%s13247_s13 + $0x48] sm:$0xf] %v4063_v9 }
 0x218 LB: > { %v12000_v0 = vld [vmem:[%s14076_s3 + $0x40] sm:$0xff]   ;;  %v12001_v12 = vld [vmem:[%s14076_s3 + $0x48] sm:$0xff]   ;;  %s9374_s17 = smul.u32 80, %s12280_s0  ;;  %v12002_v13 = vld [vmem:[%s14076_s3 + $0x50] sm:$0xff]   ;;  %s12280_s0 = sphi %s13306_s0, %s4109_s0  }
 0x219   : > { %10939 = vmatprep.subr.bf16.mxu0 %v12000_v0  ;;  %11155 = vmatprep.subr.bf16.mxu1 %v12000_v0  ;;  %v12003_v15 = vld [vmem:[%s14076_s3 + $0x58] sm:$0xff]   ;;  %v12004_v20 = vld [vmem:[%s14076_s3 + $0x60] sm:$0xff]   ;;  %v12005_v21 = vld [vmem:[%s14076_s3 + $0x68] sm:$0xff]  }
 0x21a   : > { %10940 = vmatpush3.bf16.msra.mxu0 %v12000_v0  ;;  %11156 = vmatpush3.bf16.msra.mxu1 %v12000_v0  ;;  %s13324_s22 = scalar_lea.vmem [#allocation2], %s9374_s17  ;;  %v12006_v22 = vld [vmem:[%s14076_s3 + $0x70] sm:$0xff]   ;;  %v12007_v24 = vld [vmem:[%s14076_s3 + $0x78] sm:$0xff]   ;;  %v12009_v26 = vld [vmem:[%s14076_s3] sm:$0xff]  }
 0x21b   : > { %10941 = vmatprep.subr.bf16.mxu0 %v12001_v12  ;;  %11157 = vmatprep.subr.bf16.mxu1 %v12001_v12  ;;  %v12013_v30 = vld [vmem:[%s14076_s3 + $0x8] sm:$0xff]   ;;  %v12014_v34 = vld [vmem:[%s14076_s3 + $0x10] sm:$0xff]   ;;  %v12015_v39 = vld [vmem:[%s14076_s3 + $0x18] sm:$0xff]  }
 0x21c   : > { %v12016_v44 = vld [vmem:[%s14076_s3 + $0x20] sm:$0xff]   ;;  %v12017_v45 = vld [vmem:[%s14076_s3 + $0x28] sm:$0xff]   ;;  %v12019_v46 = vld [vmem:[%s14076_s3 + $0x30] sm:$0xff]  }
 0x21d   : > { %v12023_v4 = vld [vmem:[%s14076_s3 + $0x38] sm:$0xff]   ;;  %v12025_v8 = vld [vmem:[%s14076_s3 + $0x80] sm:$0xff]   ;;  %v12029_v16 = vld [vmem:[%s14076_s3 + $0x88] sm:$0xff]  }
 0x21e   : > { %10942 = vmatpush3.bf16.msra.mxu0 %v12001_v12  ;;  %11158 = vmatpush3.bf16.msra.mxu1 %v12001_v12  ;;  %v12008_v17 = vld [vmem:[%s13324_s22 + $0x4] sm:$0xff]   ;;  %v13328_v18 = vld [vmem:[%s13324_s22 + $0x2c] sm:$0xff]   ;;  %v13348_v28 = vld [vmem:[%s13324_s22 + $0x34] sm:$0xff]  }
 0x21f   : > { %10943 = vmatprep.subr.bf16.mxu0 %v12002_v13  ;;  %11159 = vmatprep.subr.bf16.mxu1 %v12002_v13  ;;  %v12011_v27 = vld [vmem:[%s13324_s22 + $0xc] sm:$0xff]   ;;  %v12018_v32 = vld [vmem:[%s13324_s22 + $0x14] sm:$0xff]   ;;  %v13355_v33 = vld [vmem:[%s13324_s22 + $0x3c] sm:$0xff]  }
 0x220   : > { %10955 = vmatprep.mubr.bf16.mxu0 %v12008_v17  ;;  %11171 = vmatprep.mubr.bf16.mxu1 %v13328_v18  ;;  %v12021_v36 = vld [vmem:[%s13324_s22 + $0x1c] sm:$0xff]   ;;  %v13364_v38 = vld [vmem:[%s13324_s22 + $0x44] sm:$0xff]   ;;  %v13392_v14 = vld [vmem:[%s13324_s22 + $0x30] sm:$0xff]  }
 0x221   : > { %v12024_v40 = vld [vmem:[%s13324_s22] sm:$0xff]   ;;  %v13371_v42 = vld [vmem:[%s13324_s22 + $0x28] sm:$0xff]   ;;  %v12034_v19 = vld [vmem:[%s13324_s22 + $0x10] sm:$0xff]  }
 0x222   : > { %10944 = vmatpush3.bf16.msra.mxu0 %v12002_v13  ;;  %11160 = vmatpush3.bf16.msra.mxu1 %v12002_v13  ;;  %v12027_v10 = vld [vmem:[%s13324_s22 + $0x8] sm:$0xff]   ;;  %v13399_v23 = vld [vmem:[%s13324_s22 + $0x38] sm:$0xff]   ;;  %v12030_v25 = vld [vmem:[%s14076_s3 + $0x90] sm:$0xff]  }
 0x223   : > { %10945 = vmatprep.subr.bf16.mxu0 %v12003_v15  ;;  %11161 = vmatprep.subr.bf16.mxu1 %v12003_v15  ;;  %v12037_v29 = vld [vmem:[%s13324_s22 + $0x18] sm:$0xff]   ;;  %v13408_v31 = vld [vmem:[%s13324_s22 + $0x40] sm:$0xff]   ;;  %v12040_v37 = vld [vmem:[%s13324_s22 + $0x8] sm:$0xff]  }
 0x224   : > { %v12031_v35 = vld [vmem:[%s14076_s3 + $0x98] sm:$0xff]   ;;  %v13415_v41 = vld [vmem:[%s13324_s22 + $0x30] sm:$0xff]   ;;  %v12032_v43 = vld [vmem:[%s14076_s3 + $0xa0] sm:$0xff]  }
 0x225   : > { %v12033_v47 = vld [vmem:[%s14076_s3 + $0xa8] sm:$0xff]   ;;  %v12035_v48 = vld [vmem:[%s14076_s3 + $0xb0] sm:$0xff]   ;;  %v12039_v49 = vld [vmem:[%s14076_s3 + $0xb8] sm:$0xff]  }
 0x226   : > { %10946 = vmatpush3.bf16.msra.mxu0 %v12003_v15  ;;  %11162 = vmatpush3.bf16.msra.mxu1 %v12003_v15  ;;  %v12041_v50 = vld [vmem:[%s14076_s3 + $0xc0] sm:$0xff]   ;;  %v12043_v51 = vld [vmem:[%s13324_s22 + $0x10] sm:$0xff]   ;;  %v13436_v52 = vld [vmem:[%s13324_s22 + $0x38] sm:$0xff]  }
 0x227   : > { %10947 = vmatprep.subr.bf16.mxu0 %v12004_v20  ;;  %11163 = vmatprep.subr.bf16.mxu1 %v12004_v20  ;;  %v12045_v53 = vld [vmem:[%s14076_s3 + $0xc8] sm:$0xff]   ;;  %v12050_v54 = vld [vmem:[%s13324_s22 + $0x18] sm:$0xff]   ;;  %v13443_v55 = vld [vmem:[%s13324_s22 + $0x40] sm:$0xff]  }
 0x228   : > { %v12046_v56 = vld [vmem:[%s14076_s3 + $0xd0] sm:$0xff]   ;;  %v12053_v57 = vld [vmem:[%s13324_s22 + $0x20] sm:$0xff]   ;;  %v13451_v58 = vld [vmem:[%s13324_s22 + $0x48] sm:$0xff]  }
 0x229   : > { %v12047_v59 = vld [vmem:[%s14076_s3 + $0xd8] sm:$0xff]   ;;  %v13458_v60 = vld [vmem:[%s13324_s22 + $0x50] sm:$0xff]   ;;  %v12048_v61 = vld [vmem:[%s14076_s3 + $0xe0] sm:$0xff]  }
 0x22a   : > { %10948 = vmatpush3.bf16.msra.mxu0 %v12004_v20  ;;  %11164 = vmatpush3.bf16.msra.mxu1 %v12004_v20  ;;  %v12049_v62 = vld [vmem:[%s14076_s3 + $0xe8] sm:$0xff]   ;;  %v12051_v63 = vld [vmem:[%s14076_s3 + $0xf0] sm:$0xff]   ;;  %v12055_v2 = vld [vmem:[%s14076_s3 + $0xf8] sm:$0xff]  }
 0x22b   : > { %10949 = vmatprep.subr.bf16.mxu0 %v12005_v21  ;;  %11165 = vmatprep.subr.bf16.mxu1 %v12005_v21  ;;  %v12056_v3 = vld [vmem:[%s14076_s3 + $0x100] sm:$0xff]   ;;  %v13479_v5 = vld [vmem:[%s13324_s22 + $0x58] sm:$0xff]   ;;  %v12059_v6 = vld [vmem:[%s14076_s3 + $0x108] sm:$0xff]  }
 0x22c   : > { %v13485_v7 = vld [vmem:[%s13324_s22 + $0x60] sm:$0xff]   ;;  %v12060_v9 = vld [vmem:[%s14076_s3 + $0x110] sm:$0xff]   ;;  %v13495_v0 = vld [vmem:[%s13324_s22 + $0x68] sm:$0xff]  }
 0x22d   : > { %v12061_v12 = vld [vmem:[%s14076_s3 + $0x118] sm:$0xff]   ;;  %v12062_v15 = vld [vmem:[%s14076_s3 + $0x120] sm:$0xff]   ;;  %v12063_v17 = vld [vmem:[%s14076_s3 + $0x128] sm:$0xff]  }
 0x22e   : > { %10950 = vmatpush3.bf16.msra.mxu0 %v12005_v21  ;;  %11166 = vmatpush3.bf16.msra.mxu1 %v12005_v21  ;;  %v13501_v13 = vld [vmem:[%s13324_s22 + $0x54] sm:$0xff]   ;;  %v12068_v21 = vld [vmem:[%s14076_s3 + $0x140] sm:$0xff]  }
 0x22f   : > { %10951 = vmatprep.subr.bf16.mxu0 %v12006_v22  ;;  %11167 = vmatprep.subr.bf16.mxu1 %v12006_v22  ;;  %v12064_v20 = vld [vmem:[%s14076_s3 + $0x130] sm:$0xff]  }
 0x232   : > { %10952 = vmatpush3.bf16.msra.mxu0 %v12006_v22  ;;  %11168 = vmatpush3.bf16.msra.mxu1 %v12006_v22  ;;  %v13523_v22 = vld [vmem:[%s13324_s22 + $0x5c] sm:$0xff]  }
 0x233   : > { %10953 = vmatprep.subr.bf16.mxu0 %v12007_v24  ;;  %11169 = vmatprep.subr.bf16.mxu1 %v12007_v24 }
 0x236   : > { %10954 = vmatpush3.bf16.msra.mxu0 %v12007_v24  ;;  %11170 = vmatpush3.bf16.msra.mxu1 %v12007_v24  ;;  %v12071_v24 = vld [vmem:[%s14076_s3 + $0x148] sm:$0xff]  }
 0x237   : > { %10963 = vmatprep.subr.bf16.mxu0 %v12009_v26  ;;  %11179 = vmatprep.subr.bf16.mxu1 %v12009_v26 }
 0x239   : > { %10956 = vmatmul.mubr.bf16.vlgmr.msra.gmra.mrb[0].mxu0 %v12011_v27  ;;  %11172 = vmatmul.mubr.bf16.vlgmr.msra.gmra.mrb[0].mxu1 %v13348_v28  ;;  %v12072_v27 = vld [vmem:[%s14076_s3 + $0x150] sm:$0xff]  }
 0x23a   : > { %10964 = vmatpush3.bf16.msra.mxu0 %v12009_v26  ;;  %11180 = vmatpush3.bf16.msra.mxu1 %v12009_v26  ;;  %v13529_v26 = vld [vmem:[%s13324_s22 + $0x64] sm:$0xff]  }
 0x23b   : > { %10965 = vmatprep.subr.bf16.mxu0 %v12013_v30  ;;  %11181 = vmatprep.subr.bf16.mxu1 %v12013_v30 }
 0x23c   : > { %10959 = vmatprep.mubr.bf16.mxu0 %v12018_v32  ;;  %11175 = vmatprep.mubr.bf16.mxu1 %v13355_v33  ;;  %v13545_v32 = vld [vmem:[%s13324_s22 + $0x58] sm:$0xff]  }
 0x23e   : > { %10966 = vmatpush3.bf16.msra.mxu0 %v12013_v30  ;;  %11182 = vmatpush3.bf16.msra.mxu1 %v12013_v30  ;;  %v13539_v30 = vld [vmem:[%s13324_s22 + $0x6c] sm:$0xff]  }
 0x23f   : > { %10967 = vmatprep.subr.bf16.mxu0 %v12014_v34  ;;  %11183 = vmatprep.subr.bf16.mxu1 %v12014_v34 }
 0x241   : > { %10960 = vmatmul.mubr.bf16.gmra.mrb[4].mxu0 %v12021_v36  ;;  %11176 = vmatmul.mubr.bf16.gmra.mrb[4].mxu1 %v13364_v38  ;;  %v12076_v36 = vld [vmem:[%s14076_s3 + $0x170] sm:$0xff]  }
 0x242   : > { %10968 = vmatpush3.bf16.msra.mxu0 %v12014_v34  ;;  %11184 = vmatpush3.bf16.msra.mxu1 %v12014_v34  ;;  %v12075_v34 = vld [vmem:[%s14076_s3 + $0x168] sm:$0xff]  }
 0x243   : > { %10969 = vmatprep.subr.bf16.mxu0 %v12015_v39  ;;  %11185 = vmatprep.subr.bf16.mxu1 %v12015_v39 }
 0x244   : > { %10979 = vmatprep.mubr.bf16.mxu0 %v12024_v40  ;;  %11195 = vmatprep.mubr.bf16.mxu1 %v13371_v42  ;;  %v13567_v40 = vld [vmem:[%s13324_s22 + $0x60] sm:$0xff]  }
 0x246   : > { %10970 = vmatpush3.bf16.msra.mxu0 %v12015_v39  ;;  %11186 = vmatpush3.bf16.msra.mxu1 %v12015_v39  ;;  %v12080_v39 = vld [vmem:[%s14076_s3 + $0x180] sm:$0xff]  }
 0x247   : > { %10971 = vmatprep.subr.bf16.mxu0 %v12016_v44  ;;  %11187 = vmatprep.subr.bf16.mxu1 %v12016_v44 }
 0x24a   : > { %10972 = vmatpush3.bf16.msra.mxu0 %v12016_v44  ;;  %11188 = vmatpush3.bf16.msra.mxu1 %v12016_v44  ;;  %v13573_v44 = vld [vmem:[%s13324_s22 + $0x68] sm:$0xff]  }
 0x24b   : > { %10973 = vmatprep.subr.bf16.mxu0 %v12017_v45  ;;  %11189 = vmatprep.subr.bf16.mxu1 %v12017_v45 }
 0x24e   : > { %10974 = vmatpush3.bf16.msra.mxu0 %v12017_v45  ;;  %11190 = vmatpush3.bf16.msra.mxu1 %v12017_v45  ;;  %v12084_v45 = vld [vmem:[%s14076_s3 + $0x190] sm:$0xff]  }
 0x24f   : > { %10975 = vmatprep.subr.bf16.mxu0 %v12019_v46  ;;  %11191 = vmatprep.subr.bf16.mxu1 %v12019_v46 }
 0x252   : > { %10976 = vmatpush3.bf16.msra.mxu0 %v12019_v46  ;;  %11192 = vmatpush3.bf16.msra.mxu1 %v12019_v46  ;;  %v13583_v46 = vld [vmem:[%s13324_s22 + $0x70] sm:$0xff]  }
 0x253   : > { %10977 = vmatprep.subr.bf16.mxu0 %v12023_v4  ;;  %11193 = vmatprep.subr.bf16.mxu1 %v12023_v4 }
 0x256   : > { %10978 = vmatpush3.bf16.msra.mxu0 %v12023_v4  ;;  %11194 = vmatpush3.bf16.msra.mxu1 %v12023_v4  ;;  %v12085_v4 = vld [vmem:[%s14076_s3 + $0x198] sm:$0xff]  }
 0x257   : > { %10987 = vmatprep.subr.bf16.mxu0 %v12025_v8  ;;  %11203 = vmatprep.subr.bf16.mxu1 %v12025_v8 }
 0x259   : > { %10980 = vmatmul.mubr.bf16.vlgmr.msra.gmra.mrb[0].mxu0 %v12027_v10  ;;  %11196 = vmatmul.mubr.bf16.vlgmr.msra.gmra.mrb[0].mxu1 %v13392_v14  ;;  %v12086_v10 = vld [vmem:[%s14076_s3 + $0x1a0] sm:$0xff]  }
 0x25a   : > { %10988 = vmatpush3.bf16.msra.mxu0 %v12025_v8  ;;  %11204 = vmatpush3.bf16.msra.mxu1 %v12025_v8  ;;  %v12093_v8 = vld [vmem:[%s13324_s22 + $0x78] sm:$0xff]  }
 0x25b   : > { %10989 = vmatprep.subr.bf16.mxu0 %v12029_v16  ;;  %11205 = vmatprep.subr.bf16.mxu1 %v12029_v16 }
 0x25c   : > { %10983 = vmatprep.mubr.bf16.mxu0 %v12034_v19  ;;  %11199 = vmatprep.mubr.bf16.mxu1 %v13399_v23  ;;  %v12091_v19 = vld [vmem:[%s14076_s3 + $0x1b8] sm:$0xff]  }
 0x25e   : > { %10990 = vmatpush3.bf16.msra.mxu0 %v12029_v16  ;;  %11206 = vmatpush3.bf16.msra.mxu1 %v12029_v16  ;;  %v12088_v16 = vld [vmem:[%s14076_s3 + $0x1b0] sm:$0xff]  }
 0x25f   : > { %10991 = vmatprep.subr.bf16.mxu0 %v12030_v25  ;;  %11207 = vmatprep.subr.bf16.mxu1 %v12030_v25 }
 0x261   : > { %10984 = vmatmul.mubr.bf16.gmra.mrb[4].mxu0 %v12037_v29  ;;  %11200 = vmatmul.mubr.bf16.gmra.mrb[4].mxu1 %v13408_v31  ;;  %v12095_v29 = vld [vmem:[%s14076_s3 + $0x1c8] sm:$0xff]  }
 0x262   : > { %10992 = vmatpush3.bf16.msra.mxu0 %v12030_v25  ;;  %11208 = vmatpush3.bf16.msra.mxu1 %v12030_v25  ;;  %v12094_v25 = vld [vmem:[%s13324_s22 + $0x80] sm:$0xff]  }
 0x263   : > { %10993 = vmatprep.subr.bf16.mxu0 %v12031_v35  ;;  %11209 = vmatprep.subr.bf16.mxu1 %v12031_v35 }
 0x264   : > { %11003 = vmatprep.mubr.bf16.mxu0 %v12040_v37  ;;  %11219 = vmatprep.mubr.bf16.mxu1 %v13415_v41  ;;  %v12102_v37 = vld [vmem:[%s13324_s22 + $0x90] sm:$0xff]  }
 0x266   : > { %10994 = vmatpush3.bf16.msra.mxu0 %v12031_v35  ;;  %11210 = vmatpush3.bf16.msra.mxu1 %v12031_v35  ;;  %v12096_v35 = vld [vmem:[%s14076_s3 + $0x1d0] sm:$0xff]  }
 0x267   : > { %10995 = vmatprep.subr.bf16.mxu0 %v12032_v43  ;;  %11211 = vmatprep.subr.bf16.mxu1 %v12032_v43 }
 0x26a   : > { %10996 = vmatpush3.bf16.msra.mxu0 %v12032_v43  ;;  %11212 = vmatpush3.bf16.msra.mxu1 %v12032_v43  ;;  %v12105_v43 = vld [vmem:[%s13324_s22 + $0x7c] sm:$0xff]  }
 0x26b   : > { %10997 = vmatprep.subr.bf16.mxu0 %v12033_v47  ;;  %11213 = vmatprep.subr.bf16.mxu1 %v12033_v47 }
 0x26e   : > { %10998 = vmatpush3.bf16.msra.mxu0 %v12033_v47  ;;  %11214 = vmatpush3.bf16.msra.mxu1 %v12033_v47  ;;  %v12098_v47 = vld [vmem:[%s14076_s3 + $0x1e0] sm:$0xff]  }
 0x26f   : > { %10999 = vmatprep.subr.bf16.mxu0 %v12035_v48  ;;  %11215 = vmatprep.subr.bf16.mxu1 %v12035_v48 }
 0x272   : > { %11000 = vmatpush3.bf16.msra.mxu0 %v12035_v48  ;;  %11216 = vmatpush3.bf16.msra.mxu1 %v12035_v48  ;;  %v12099_v48 = vld [vmem:[%s14076_s3 + $0x1e8] sm:$0xff]  }
 0x273   : > { %11001 = vmatprep.subr.bf16.mxu0 %v12039_v49  ;;  %11217 = vmatprep.subr.bf16.mxu1 %v12039_v49 }
 0x276   : > { %11002 = vmatpush3.bf16.msra.mxu0 %v12039_v49  ;;  %11218 = vmatpush3.bf16.msra.mxu1 %v12039_v49  ;;  %v12100_v49 = vld [vmem:[%s14076_s3 + $0x1f0] sm:$0xff]  }
 0x277   : > { %11011 = vmatprep.subr.bf16.mxu0 %v12041_v50  ;;  %11227 = vmatprep.subr.bf16.mxu1 %v12041_v50 }
 0x279   : > { %11004 = vmatmul.mubr.bf16.vlgmr.msra.gmra.mrb[0].mxu0 %v12043_v51  ;;  %11220 = vmatmul.mubr.bf16.vlgmr.msra.gmra.mrb[0].mxu1 %v13436_v52  ;;  %v12104_v51 = vld [vmem:[%s14076_s3 + $0x200] sm:$0xff]  }
 0x27a   : > { %11012 = vmatpush3.bf16.msra.mxu0 %v12041_v50  ;;  %11228 = vmatpush3.bf16.msra.mxu1 %v12041_v50  ;;  %v12103_v50 = vld [vmem:[%s14076_s3 + $0x1f8] sm:$0xff]  }
 0x27b   : > { %11013 = vmatprep.subr.bf16.mxu0 %v12045_v53  ;;  %11229 = vmatprep.subr.bf16.mxu1 %v12045_v53 }
 0x27c   : > { %11007 = vmatprep.mubr.bf16.mxu0 %v12050_v54  ;;  %11223 = vmatprep.mubr.bf16.mxu1 %v13443_v55  ;;  %v12112_v54 = vld [vmem:[%s13324_s22 + $0x8c] sm:$0xff]  }
 0x27e   : > { %11014 = vmatpush3.bf16.msra.mxu0 %v12045_v53  ;;  %11230 = vmatpush3.bf16.msra.mxu1 %v12045_v53  ;;  %v12107_v53 = vld [vmem:[%s14076_s3 + $0x208] sm:$0xff]  }
 0x27f   : > { %11015 = vmatprep.subr.bf16.mxu0 %v12046_v56  ;;  %11231 = vmatprep.subr.bf16.mxu1 %v12046_v56 }
 0x281   : > { %11008 = vmatmul.mubr.bf16.gmra.mrb[4].mxu0 %v12053_v57  ;;  %11224 = vmatmul.mubr.bf16.gmra.mrb[4].mxu1 %v13451_v58  ;;  %v12109_v57 = vld [vmem:[%s14076_s3 + $0x218] sm:$0xff]  }
 0x282   : > { %11016 = vmatpush3.bf16.msra.mxu0 %v12046_v56  ;;  %11232 = vmatpush3.bf16.msra.mxu1 %v12046_v56  ;;  %v12114_v56 = vld [vmem:[%s13324_s22 + $0x94] sm:$0xff]  }
 0x283   : > { %11017 = vmatprep.subr.bf16.mxu0 %v12047_v59  ;;  %11233 = vmatprep.subr.bf16.mxu1 %v12047_v59 }
 0x284   : > { %11027 = vmatprep.mubr.bf16.mxu0 %v13371_v42  ;;  %11243 = vmatprep.mubr.bf16.mxu1 %v13458_v60  ;;  %v12083_v42 = vld [vmem:[%s14076_s3 + $0x188] sm:$0xff]  }
 0x286   : > { %11018 = vmatpush3.bf16.msra.mxu0 %v12047_v59  ;;  %11234 = vmatpush3.bf16.msra.mxu1 %v12047_v59  ;;  %v12110_v59 = vld [vmem:[%s14076_s3 + $0x220] sm:$0xff]  }
 0x287   : > { %11019 = vmatprep.subr.bf16.mxu0 %v12048_v61  ;;  %11235 = vmatprep.subr.bf16.mxu1 %v12048_v61 }
 0x28a   : > { %11020 = vmatpush3.bf16.msra.mxu0 %v12048_v61  ;;  %11236 = vmatpush3.bf16.msra.mxu1 %v12048_v61  ;;  %v12113_v61 = vld [vmem:[%s14076_s3 + $0x230] sm:$0xff]  }
 0x28b   : > { %11021 = vmatprep.subr.bf16.mxu0 %v12049_v62  ;;  %11237 = vmatprep.subr.bf16.mxu1 %v12049_v62 }
 0x28e   : > { %11022 = vmatpush3.bf16.msra.mxu0 %v12049_v62  ;;  %11238 = vmatpush3.bf16.msra.mxu1 %v12049_v62  ;;  %v12115_v62 = vld [vmem:[%s14076_s3 + $0x238] sm:$0xff]  }
 0x28f   : > { %11023 = vmatprep.subr.bf16.mxu0 %v12051_v63  ;;  %11239 = vmatprep.subr.bf16.mxu1 %v12051_v63 }
 0x292   : > { %11024 = vmatpush3.bf16.msra.mxu0 %v12051_v63  ;;  %11240 = vmatpush3.bf16.msra.mxu1 %v12051_v63  ;;  %v12117_v63 = vld [vmem:[%s13324_s22 + $0x88] sm:$0xff]  }
 0x293   : > { %11025 = vmatprep.subr.bf16.mxu0 %v12055_v2  ;;  %11241 = vmatprep.subr.bf16.mxu1 %v12055_v2 }
 0x296   : > { %11026 = vmatpush3.bf16.msra.mxu0 %v12055_v2  ;;  %11242 = vmatpush3.bf16.msra.mxu1 %v12055_v2  ;;  %v12118_v2 = vld [vmem:[%s13324_s22 + $0x90] sm:$0xff]  }
 0x297   : > { %11035 = vmatprep.subr.bf16.mxu0 %v12056_v3  ;;  %11251 = vmatprep.subr.bf16.mxu1 %v12056_v3 }
 0x299   : > { %11028 = vmatmul.mubr.bf16.vlgmr.msra.gmra.mrb[0].mxu0 %v13392_v14  ;;  %11244 = vmatmul.mubr.bf16.vlgmr.msra.gmra.mrb[0].mxu1 %v13479_v5  ;;  %v12087_v14 = vld [vmem:[%s14076_s3 + $0x1a8] sm:$0xff]  }
 0x29a   : > { %11036 = vmatpush3.bf16.msra.mxu0 %v12056_v3  ;;  %11252 = vmatpush3.bf16.msra.mxu1 %v12056_v3  ;;  %v12119_v3 = vld [vmem:[%s13324_s22 + $0x98] sm:$0xff]  }
 0x29b   : > { %11037 = vmatprep.subr.bf16.mxu0 %v12059_v6  ;;  %11253 = vmatprep.subr.bf16.mxu1 %v12059_v6 }
 0x29c   : > { %11031 = vmatprep.mubr.bf16.mxu0 %v13399_v23  ;;  %11247 = vmatprep.mubr.bf16.mxu1 %v13485_v7  ;;  %v12092_v23 = vld [vmem:[%s14076_s3 + $0x1c0] sm:$0xff]  }
 0x29e   : > { %11038 = vmatpush3.bf16.msra.mxu0 %v12059_v6  ;;  %11254 = vmatpush3.bf16.msra.mxu1 %v12059_v6 }
 0x29f   : > { %11039 = vmatprep.subr.bf16.mxu0 %v12060_v9  ;;  %11255 = vmatprep.subr.bf16.mxu1 %v12060_v9 }
 0x2a1   : > { %11032 = vmatmul.mubr.bf16.gmra.mrb[4].mxu0 %v13408_v31  ;;  %11248 = vmatmul.mubr.bf16.gmra.mrb[4].mxu1 %v13495_v0  ;;  %v12101_v31 = vld [vmem:[%s13324_s22 + $0x88] sm:$0xff]  }
 0x2a2   : > { %11040 = vmatpush3.bf16.msra.mxu0 %v12060_v9  ;;  %11256 = vmatpush3.bf16.msra.mxu1 %v12060_v9 }
 0x2a3   : > { %11041 = vmatprep.subr.bf16.mxu0 %v12061_v12  ;;  %11257 = vmatprep.subr.bf16.mxu1 %v12061_v12 }
 0x2a4   : > { %11051 = vmatprep.mubr.bf16.mxu0 %v13328_v18  ;;  %11267 = vmatprep.mubr.bf16.mxu1 %v13501_v13  ;;  %v12067_v18 = vld [vmem:[%s14076_s3 + $0x138] sm:$0xff]  }
 0x2a6   : > { %11042 = vmatpush3.bf16.msra.mxu0 %v12061_v12  ;;  %11258 = vmatpush3.bf16.msra.mxu1 %v12061_v12 }
 0x2a7   : > { %11043 = vmatprep.subr.bf16.mxu0 %v12062_v15  ;;  %11259 = vmatprep.subr.bf16.mxu1 %v12062_v15 }
 0x2aa   : > { %11044 = vmatpush3.bf16.msra.mxu0 %v12062_v15  ;;  %11260 = vmatpush3.bf16.msra.mxu1 %v12062_v15 }
 0x2ab   : > { %11045 = vmatprep.subr.bf16.mxu0 %v12063_v17  ;;  %11261 = vmatprep.subr.bf16.mxu1 %v12063_v17 }
 0x2ae   : > { %11046 = vmatpush3.bf16.msra.mxu0 %v12063_v17  ;;  %11262 = vmatpush3.bf16.msra.mxu1 %v12063_v17 }
 0x2af   : > { %11047 = vmatprep.subr.bf16.mxu0 %v12064_v20  ;;  %11263 = vmatprep.subr.bf16.mxu1 %v12064_v20 }
 0x2b2   : > { %11048 = vmatpush3.bf16.msra.mxu0 %v12064_v20  ;;  %11264 = vmatpush3.bf16.msra.mxu1 %v12064_v20 }
 0x2b3   : > { %11049 = vmatprep.subr.bf16.mxu0 %v12067_v18  ;;  %11265 = vmatprep.subr.bf16.mxu1 %v12067_v18 }
 0x2b6   : > { %11050 = vmatpush3.bf16.msra.mxu0 %v12067_v18  ;;  %11266 = vmatpush3.bf16.msra.mxu1 %v12067_v18 }
 0x2b7   : > { %11059 = vmatprep.subr.bf16.mxu0 %v12068_v21  ;;  %11275 = vmatprep.subr.bf16.mxu1 %v12068_v21 }
 0x2b9   : > { %11052 = vmatmul.mubr.bf16.vlgmr.msra.gmra.mrb[0].mxu0 %v13348_v28  ;;  %11268 = vmatmul.mubr.bf16.vlgmr.msra.gmra.mrb[0].mxu1 %v13523_v22  ;;  %v12073_v28 = vld [vmem:[%s14076_s3 + $0x158] sm:$0xff]  }
 0x2ba   : > { %11060 = vmatpush3.bf16.msra.mxu0 %v12068_v21  ;;  %11276 = vmatpush3.bf16.msra.mxu1 %v12068_v21 }
 0x2bb   : > { %11061 = vmatprep.subr.bf16.mxu0 %v12071_v24  ;;  %11277 = vmatprep.subr.bf16.mxu1 %v12071_v24 }
 0x2bc   : > { %11055 = vmatprep.mubr.bf16.mxu0 %v13355_v33  ;;  %11271 = vmatprep.mubr.bf16.mxu1 %v13529_v26  ;;  %v12074_v33 = vld [vmem:[%s14076_s3 + $0x160] sm:$0xff]  }
 0x2be   : > { %11062 = vmatpush3.bf16.msra.mxu0 %v12071_v24  ;;  %11278 = vmatpush3.bf16.msra.mxu1 %v12071_v24 }
 0x2bf   : > { %11063 = vmatprep.subr.bf16.mxu0 %v12072_v27  ;;  %11279 = vmatprep.subr.bf16.mxu1 %v12072_v27 }
 0x2c1   : > { %11056 = vmatmul.mubr.bf16.gmra.mrb[4].mxu0 %v13364_v38  ;;  %11272 = vmatmul.mubr.bf16.gmra.mrb[4].mxu1 %v13539_v30  ;;  %v12079_v38 = vld [vmem:[%s14076_s3 + $0x178] sm:$0xff]  }
 0x2c2   : > { %11064 = vmatpush3.bf16.msra.mxu0 %v12072_v27  ;;  %11280 = vmatpush3.bf16.msra.mxu1 %v12072_v27 }
 0x2c3   : > { %11065 = vmatprep.subr.bf16.mxu0 %v12073_v28  ;;  %11281 = vmatprep.subr.bf16.mxu1 %v12073_v28 }
 0x2c4   : > { %11075 = vmatprep.mubr.bf16.mxu0 %v13415_v41  ;;  %11291 = vmatprep.mubr.bf16.mxu1 %v13545_v32  ;;  %v12097_v41 = vld [vmem:[%s14076_s3 + $0x1d8] sm:$0xff]  }
 0x2c6   : > { %11066 = vmatpush3.bf16.msra.mxu0 %v12073_v28  ;;  %11282 = vmatpush3.bf16.msra.mxu1 %v12073_v28 }
 0x2c7   : > { %11067 = vmatprep.subr.bf16.mxu0 %v12074_v33  ;;  %11283 = vmatprep.subr.bf16.mxu1 %v12074_v33 }
 0x2ca   : > { %11068 = vmatpush3.bf16.msra.mxu0 %v12074_v33  ;;  %11284 = vmatpush3.bf16.msra.mxu1 %v12074_v33 }
 0x2cb   : > { %11069 = vmatprep.subr.bf16.mxu0 %v12075_v34  ;;  %11285 = vmatprep.subr.bf16.mxu1 %v12075_v34 }
 0x2ce   : > { %11070 = vmatpush3.bf16.msra.mxu0 %v12075_v34  ;;  %11286 = vmatpush3.bf16.msra.mxu1 %v12075_v34 }
 0x2cf   : > { %11071 = vmatprep.subr.bf16.mxu0 %v12076_v36  ;;  %11287 = vmatprep.subr.bf16.mxu1 %v12076_v36 }
 0x2d2   : > { %11072 = vmatpush3.bf16.msra.mxu0 %v12076_v36  ;;  %11288 = vmatpush3.bf16.msra.mxu1 %v12076_v36 }
 0x2d3   : > { %11073 = vmatprep.subr.bf16.mxu0 %v12079_v38  ;;  %11289 = vmatprep.subr.bf16.mxu1 %v12079_v38 }
 0x2d6   : > { %11074 = vmatpush3.bf16.msra.mxu0 %v12079_v38  ;;  %11290 = vmatpush3.bf16.msra.mxu1 %v12079_v38 }
 0x2d7   : > { %11083 = vmatprep.subr.bf16.mxu0 %v12080_v39  ;;  %11299 = vmatprep.subr.bf16.mxu1 %v12080_v39 }
 0x2d9   : > { %11076 = vmatmul.mubr.bf16.vlgmr.msra.gmra.mrb[0].mxu0 %v13436_v52  ;;  %11292 = vmatmul.mubr.bf16.vlgmr.msra.gmra.mrb[0].mxu1 %v13567_v40  ;;  %v12106_v52 = vld [vmem:[%s13324_s22 + $0x84] sm:$0xff]  }
 0x2da   : > { %11084 = vmatpush3.bf16.msra.mxu0 %v12080_v39  ;;  %11300 = vmatpush3.bf16.msra.mxu1 %v12080_v39 }
 0x2db   : > { %11085 = vmatprep.subr.bf16.mxu0 %v12083_v42  ;;  %11301 = vmatprep.subr.bf16.mxu1 %v12083_v42 }
 0x2dc   : > { %11079 = vmatprep.mubr.bf16.mxu0 %v13443_v55  ;;  %11295 = vmatprep.mubr.bf16.mxu1 %v13573_v44  ;;  %v12108_v55 = vld [vmem:[%s14076_s3 + $0x210] sm:$0xff]  }
 0x2de   : > { %11086 = vmatpush3.bf16.msra.mxu0 %v12083_v42  ;;  %11302 = vmatpush3.bf16.msra.mxu1 %v12083_v42 }
 0x2df   : > { %11087 = vmatprep.subr.bf16.mxu0 %v12084_v45  ;;  %11303 = vmatprep.subr.bf16.mxu1 %v12084_v45 }
 0x2e1   : > { %11080 = vmatmul.mubr.bf16.gmra.mrb[4].mxu0 %v13451_v58  ;;  %11296 = vmatmul.mubr.bf16.gmra.mrb[4].mxu1 %v13583_v46  ;;  %v12116_v58 = vld [vmem:[%s13324_s22 + $0x80] sm:$0xff]   ;;  %s9078_s22 = smul.u32 24, %s12280_s0  ;;  %s4109_s0 = sadd.s32 1, %s12280_s0  }
 0x2e2   : > { %11088 = vmatpush3.bf16.msra.mxu0 %v12084_v45  ;;  %11304 = vmatpush3.bf16.msra.mxu1 %v12084_v45  ;;  %p4106_p1 = scmp.ge.s32.totalorder %s4109_s0, 4  }
 0x2e3   : > { %11089 = vmatprep.subr.bf16.mxu0 %v12085_v4  ;;  %11305 = vmatprep.subr.bf16.mxu1 %v12085_v4  ;;  %s8131_s20 = scalar_lea.vmem [#allocation3], %s9078_s22  ;;  %s13701_s24 = smov (%p4106_p1), 0  }
 0x2e4   : > { %11099 = vmatprep.mubr.bf16.mxu0 %v13458_v60  ;;  %11315 = vmatprep.mubr.bf16.mxu1 %v12093_v8  ;;  %v12111_v60 = vld [vmem:[%s14076_s3 + $0x228] sm:$0xff]  }
 0x2e6   : > { %11090 = vmatpush3.bf16.msra.mxu0 %v12085_v4  ;;  %11306 = vmatpush3.bf16.msra.mxu1 %v12085_v4 }
 0x2e7   : > { %11091 = vmatprep.subr.bf16.mxu0 %v12086_v10  ;;  %11307 = vmatprep.subr.bf16.mxu1 %v12086_v10 }
 0x2ea   : > { %11092 = vmatpush3.bf16.msra.mxu0 %v12086_v10  ;;  %11308 = vmatpush3.bf16.msra.mxu1 %v12086_v10 }
 0x2eb   : > { %11093 = vmatprep.subr.bf16.mxu0 %v12087_v14  ;;  %11309 = vmatprep.subr.bf16.mxu1 %v12087_v14 }
 0x2ee   : > { %11094 = vmatpush3.bf16.msra.mxu0 %v12087_v14  ;;  %11310 = vmatpush3.bf16.msra.mxu1 %v12087_v14 }
 0x2ef   : > { %11095 = vmatprep.subr.bf16.mxu0 %v12088_v16  ;;  %11311 = vmatprep.subr.bf16.mxu1 %v12088_v16 }
 0x2f2   : > { %11096 = vmatpush3.bf16.msra.mxu0 %v12088_v16  ;;  %11312 = vmatpush3.bf16.msra.mxu1 %v12088_v16 }
 0x2f3   : > { %11097 = vmatprep.subr.bf16.mxu0 %v12091_v19  ;;  %11313 = vmatprep.subr.bf16.mxu1 %v12091_v19 }
 0x2f6   : > { %11098 = vmatpush3.bf16.msra.mxu0 %v12091_v19  ;;  %11314 = vmatpush3.bf16.msra.mxu1 %v12091_v19 }
 0x2f7   : > { %11107 = vmatprep.subr.bf16.mxu0 %v12092_v23  ;;  %11323 = vmatprep.subr.bf16.mxu1 %v12092_v23 }
 0x2f9   : > { %11100 = vmatmul.mubr.bf16.vlgmr.msra.gmra.mrb[0].mxu0 %v13479_v5  ;;  %11316 = vmatmul.mubr.bf16.vlgmr.msra.gmra.mrb[0].mxu1 %v12094_v25 }
 0x2fa   : > { %11108 = vmatpush3.bf16.msra.mxu0 %v12092_v23  ;;  %11324 = vmatpush3.bf16.msra.mxu1 %v12092_v23 }
 0x2fb   : > { %11109 = vmatprep.subr.bf16.mxu0 %v12095_v29  ;;  %11325 = vmatprep.subr.bf16.mxu1 %v12095_v29 }
 0x2fc   : > { %11103 = vmatprep.mubr.bf16.mxu0 %v13485_v7  ;;  %11319 = vmatprep.mubr.bf16.mxu1 %v12101_v31 }
 0x2fe   : > { %11110 = vmatpush3.bf16.msra.mxu0 %v12095_v29  ;;  %11326 = vmatpush3.bf16.msra.mxu1 %v12095_v29 }
 0x2ff   : > { %11111 = vmatprep.subr.bf16.mxu0 %v12096_v35  ;;  %11327 = vmatprep.subr.bf16.mxu1 %v12096_v35 }
 0x301   : > { %11104 = vmatmul.mubr.bf16.gmra.mrb[4].mxu0 %v13495_v0  ;;  %11320 = vmatmul.mubr.bf16.gmra.mrb[4].mxu1 %v12102_v37 }
 0x302   : > { %11112 = vmatpush3.bf16.msra.mxu0 %v12096_v35  ;;  %11328 = vmatpush3.bf16.msra.mxu1 %v12096_v35 }
 0x303   : > { %11113 = vmatprep.subr.bf16.mxu0 %v12097_v41  ;;  %11329 = vmatprep.subr.bf16.mxu1 %v12097_v41 }
 0x304   : > { %11123 = vmatprep.mubr.bf16.mxu0 %v13501_v13  ;;  %11339 = vmatprep.mubr.bf16.mxu1 %v12105_v43 }
 0x306   : > { %11114 = vmatpush3.bf16.msra.mxu0 %v12097_v41  ;;  %11330 = vmatpush3.bf16.msra.mxu1 %v12097_v41 }
 0x307   : > { %11115 = vmatprep.subr.bf16.mxu0 %v12098_v47  ;;  %11331 = vmatprep.subr.bf16.mxu1 %v12098_v47 }
 0x30a   : > { %11116 = vmatpush3.bf16.msra.mxu0 %v12098_v47  ;;  %11332 = vmatpush3.bf16.msra.mxu1 %v12098_v47 }
 0x30b   : > { %11117 = vmatprep.subr.bf16.mxu0 %v12099_v48  ;;  %11333 = vmatprep.subr.bf16.mxu1 %v12099_v48 }
 0x30e   : > { %11118 = vmatpush3.bf16.msra.mxu0 %v12099_v48  ;;  %11334 = vmatpush3.bf16.msra.mxu1 %v12099_v48 }
 0x30f   : > { %11119 = vmatprep.subr.bf16.mxu0 %v12100_v49  ;;  %11335 = vmatprep.subr.bf16.mxu1 %v12100_v49 }
 0x312   : > { %11120 = vmatpush3.bf16.msra.mxu0 %v12100_v49  ;;  %11336 = vmatpush3.bf16.msra.mxu1 %v12100_v49 }
 0x313   : > { %11121 = vmatprep.subr.bf16.mxu0 %v12103_v50  ;;  %11337 = vmatprep.subr.bf16.mxu1 %v12103_v50 }
 0x316   : > { %11122 = vmatpush3.bf16.msra.mxu0 %v12103_v50  ;;  %11338 = vmatpush3.bf16.msra.mxu1 %v12103_v50 }
 0x317   : > { %11131 = vmatprep.subr.bf16.mxu0 %v12104_v51  ;;  %11347 = vmatprep.subr.bf16.mxu1 %v12104_v51 }
 0x319   : > { %11124 = vmatmul.mubr.bf16.vlgmr.msra.gmra.mrb[0].mxu0 %v13523_v22  ;;  %11340 = vmatmul.mubr.bf16.vlgmr.msra.gmra.mrb[0].mxu1 %v12106_v52 }
 0x31a   : > { %11132 = vmatpush3.bf16.msra.mxu0 %v12104_v51  ;;  %11348 = vmatpush3.bf16.msra.mxu1 %v12104_v51 }
 0x31b   : > { %11133 = vmatprep.subr.bf16.mxu0 %v12107_v53  ;;  %11349 = vmatprep.subr.bf16.mxu1 %v12107_v53 }
 0x31c   : > { %11127 = vmatprep.mubr.bf16.mxu0 %v13529_v26  ;;  %11343 = vmatprep.mubr.bf16.mxu1 %v12112_v54 }
 0x31e   : > { %11134 = vmatpush3.bf16.msra.mxu0 %v12107_v53  ;;  %11350 = vmatpush3.bf16.msra.mxu1 %v12107_v53 }
 0x31f   : > { %11135 = vmatprep.subr.bf16.mxu0 %v12108_v55  ;;  %11351 = vmatprep.subr.bf16.mxu1 %v12108_v55 }
 0x321   : > { %11128 = vmatmul.mubr.bf16.gmra.mrb[4].mxu0 %v13539_v30  ;;  %11344 = vmatmul.mubr.bf16.gmra.mrb[4].mxu1 %v12114_v56 }
 0x322   : > { %11136 = vmatpush3.bf16.msra.mxu0 %v12108_v55  ;;  %11352 = vmatpush3.bf16.msra.mxu1 %v12108_v55 }
 0x323   : > { %11137 = vmatprep.subr.bf16.mxu0 %v12109_v57  ;;  %11353 = vmatprep.subr.bf16.mxu1 %v12109_v57 }
 0x324   : > { %11147 = vmatprep.mubr.bf16.mxu0 %v13545_v32  ;;  %11363 = vmatprep.mubr.bf16.mxu1 %v12116_v58 }
 0x326   : > { %11138 = vmatpush3.bf16.msra.mxu0 %v12109_v57  ;;  %11354 = vmatpush3.bf16.msra.mxu1 %v12109_v57 }
 0x327   : > { %11139 = vmatprep.subr.bf16.mxu0 %v12110_v59  ;;  %11355 = vmatprep.subr.bf16.mxu1 %v12110_v59 }
 0x32a   : > { %11140 = vmatpush3.bf16.msra.mxu0 %v12110_v59  ;;  %11356 = vmatpush3.bf16.msra.mxu1 %v12110_v59 }
 0x32b   : > { %11141 = vmatprep.subr.bf16.mxu0 %v12111_v60  ;;  %11357 = vmatprep.subr.bf16.mxu1 %v12111_v60 }
 0x32e   : > { %11142 = vmatpush3.bf16.msra.mxu0 %v12111_v60  ;;  %11358 = vmatpush3.bf16.msra.mxu1 %v12111_v60 }
 0x32f   : > { %11143 = vmatprep.subr.bf16.mxu0 %v12113_v61  ;;  %11359 = vmatprep.subr.bf16.mxu1 %v12113_v61 }
 0x332   : > { %11144 = vmatpush3.bf16.msra.mxu0 %v12113_v61  ;;  %11360 = vmatpush3.bf16.msra.mxu1 %v12113_v61 }
 0x333   : > { %11145 = vmatprep.subr.bf16.mxu0 %v12115_v62  ;;  %11361 = vmatprep.subr.bf16.mxu1 %v12115_v62 }
 0x336   : > { %11146 = vmatpush3.bf16.msra.mxu0 %v12115_v62  ;;  %11362 = vmatpush3.bf16.msra.mxu1 %v12115_v62 }
 0x339   : > { %11148 = vmatmul.mubr.bf16.vlgmr.msra.gmra.mrb[0].mxu0 %v13567_v40  ;;  %11364 = vmatmul.mubr.bf16.vlgmr.msra.gmra.mrb[0].mxu1 %v12117_v63 }
 0x33a   : > { %11151 = vmatprep.mubr.bf16.mxu0 %v13573_v44  ;;  %11367 = vmatprep.mubr.bf16.mxu1 %v12118_v2 }
 0x341   : > { %11152 = vmatmul.mubr.bf16.gmra.mrb[4].mxu0 %v13583_v46  ;;  %11368 = vmatmul.mubr.bf16.gmra.mrb[4].mxu1 %v12119_v3 }
 0x40c   : > { %v11149_v5 = vpop.f32.mrb[0].mxu0  ;;  %v11365_v6 = vpop.f32.mrb[0].mxu1 }
 0x40d   : > { %v5661_v7 = vadd.f32 %v11149_v5, %v13280_v11  ;;  %v6428_v9 = vadd.f32 %v11365_v6, %v13280_v11  ;;  %v5614_v0 = vpop.f32.mrb[1].mxu0  ;;  %v6387_v12 = vpop.f32.mrb[1].mxu1  ;;  %v13697_v6 = vld [vmem:[%s14079_s6] ss:$0 sm:$0xff] (%p4106_p1) }
 0x40e   : > { %v5659_v13 = vadd.f32 %v13280_v11, %v5614_v0  ;;  %v6426_v15 = vadd.f32 %v13280_v11, %v6387_v12  ;;  %v11150_v17 = vpop.f32.mrb[2].mxu0  ;;  %v11366_v20 = vpop.f32.mrb[2].mxu1 }
 0x40f   : > { %v5662_v18 = vadd.f32 %v11150_v17, %v13280_v11  ;;  %v6429_v21 = vadd.f32 %v11366_v20, %v13280_v11  ;;  %v5617_v22 = vpop.f32.mrb[3].mxu0  ;;  %v6390_v24 = vpop.f32.mrb[3].mxu1  ;;  %v5669_v30 = vmax.f32 %v5661_v7, 0.0  ;;  %v6436_v28 = vmax.f32 %v6428_v9, 0.0 }
 0x410   : > { %v5660_v26 = vadd.f32 %v13280_v11, %v5617_v22  ;;  %v6427_v27 = vadd.f32 %v13280_v11, %v6390_v24  ;;  %v5667_v34 = vmax.f32 %v5659_v13, 0.0  ;;  %v6434_v36 = vmax.f32 %v6426_v15, 0.0 }
 0x411   : > { %v5670_v32 = vmax.f32 %v5662_v18, 0.0  ;;  %v6437_v33 = vmax.f32 %v6429_v21, 0.0  ;;  %v13699_v7 = vmov (%p4106_p1), 0.0  }
 0x412   : > { %v5668_v38 = vmax.f32 %v5660_v26, 0.0  ;;  %v6435_v39 = vmax.f32 %v6427_v27, 0.0 }
 0x413   : > { %v5676_v40 = vmax.f32 %v5669_v30, %v5670_v32  ;;  %v6443_v42 = vmax.f32 %v6436_v28, %v6437_v33 }
 0x414   : > { %v5675_v44 = vmax.f32 %v5667_v34, %v5668_v38  ;;  %v6442_v45 = vmax.f32 %v6434_v36, %v6435_v39  ;;  %v11153_v46 = vpop.f32.mrb[4].mxu0  ;;  %v11369_v4 = vpop.f32.mrb[4].mxu1 }
 0x415   : > { %v6447_v8 = vmax.f32 %v5676_v40, %v6443_v42  ;;  %v5665_v10 = vadd.f32 %v11153_v46, %v13280_v11  ;;  %v6432_v14 = vadd.f32 %v11369_v4, %v13280_v11  ;;  %v5630_v16 = vpop.f32.mrb[5].mxu0  ;;  %v6403_v19 = vpop.f32.mrb[5].mxu1 }
 0x416   : > { %v6446_v23 = vmax.f32 %v5675_v44, %v6442_v45  ;;  %v5663_v25 = vadd.f32 %v13280_v11, %v5630_v16  ;;  %v11154_v29 = vpop.f32.mrb[6].mxu0  ;;  %v11370_v31 = vpop.f32.mrb[6].mxu1  ;;  %v6430_v35 = vadd.f32 %v13280_v11, %v6403_v19 }
 0x417   : > { %v5666_v37 = vadd.f32 %v11154_v29, %v13280_v11  ;;  %v6433_v41 = vadd.f32 %v11370_v31, %v13280_v11  ;;  %v5633_v43 = vpop.f32.mrb[7].mxu0  ;;  %v6406_v47 = vpop.f32.mrb[7].mxu1  ;;  %v5673_v49 = vmax.f32 %v5665_v10, 0.0  ;;  %v6440_v51 = vmax.f32 %v6432_v14, 0.0 }
 0x418   : > { %v6450_v48 = vpack.c.bf16 %v6446_v23, %v6446_v23  ;;  %v5664_v50 = vadd.f32 %v13280_v11, %v5633_v43  ;;  %v6431_v54 = vadd.f32 %v13280_v11, %v6406_v47  ;;  %v5671_v55 = vmax.f32 %v5663_v25, 0.0 }
 0x419   : > { %v5674_v52 = vmax.f32 %v5666_v37, 0.0  ;;  %v6441_v53 = vmax.f32 %v6433_v41, 0.0  ;;  %v6438_v57 = vmax.f32 %v6430_v35, 0.0 }
 0x41a   : > { %9079 = vst [vmem:[%s8131_s20 + $0x1c] sm:$0xf] %v6450_v48  ;;  %v5672_v56 = vmax.f32 %v5664_v50, 0.0  ;;  %v6439_v60 = vmax.f32 %v6431_v54, 0.0 }
 0x41b   : > { %v5678_v58 = vmax.f32 %v5673_v49, %v5674_v52  ;;  %v6445_v59 = vmax.f32 %v6440_v51, %v6441_v53 }
 0x41c   : > { %v5677_v61 = vmax.f32 %v5671_v55, %v5672_v56  ;;  %v6444_v63 = vmax.f32 %v6438_v57, %v6439_v60  ;;  %4108 = sbr.rel (!%p4106_p1) target bundleno = 536 (0x218), region = 151 }
 0x41d   : > { %v6449_v62 = vmax.f32 %v5678_v58, %v6445_v59 }
 0x41e   : > { %v6448_v3 = vmax.f32 %v5677_v61, %v6444_v63 }
 0x41f   : > { %v6453_v2 = vpack.c.bf16 %v6449_v62, %v6449_v62 }
 0x420   : > { %v9762_v5 = vpack.c.bf16 %v6448_v3, %v6447_v8 }
 0x421   : > { %9082 = vst [vmem:[%s8131_s20 + $0x28] sm:$0xf] %v6453_v2 }
 0x422   : > { %9858 = vst [vmem:[%s8131_s20 + $0x20] sm:$0xff] %v9762_v5  }
 0x423 LB: > { %v12120_v11 = vld [vmem:[%s14078_s5 + $0x40] sm:$0xff]   ;;  %v12122_v0 = vld [vmem:[%s14078_s5 + $0x48] sm:$0xff]   ;;  %v12124_v13 = vld [vmem:[%s14078_s5 + $0x50] sm:$0xff]   ;;  %s9375_s4 = smul.u32 24, %s12288_s24  ;;  %s6469_s24 = sadd.s32 1, %s12288_s24   ;;  %s12288_s24 = sphi %s13701_s24, %s6469_s24   ;;  %v12284_v7 = vphi %v13699_v7, %v14084_v7  }
 0x424   : > { %v12121_v9 = vld [vmem:[%s14078_s5 + $0x100] sm:$0xff]   ;;  %11371 = vmatprep.subr.bf16.mxu1 %v12120_v11  ;;  %v12123_v12 = vld [vmem:[%s14078_s5 + $0x108] sm:$0xff]   ;;  %v12125_v15 = vld [vmem:[%s14078_s5 + $0x110] sm:$0xff]   ;;  %p6466_p2 = scmp.ge.s32.totalorder %s6469_s24, 4  }
 0x425   : > { %11451 = vmatprep.subr.bf16.mxu0 %v12121_v9  ;;  %11372 = vmatpush3.bf16.msra.mxu1 %v12120_v11  ;;  %v12126_v17 = vld [vmem:[%s14078_s5 + $0x58] sm:$0xff]   ;;  %v12128_v18 = vld [vmem:[%s14078_s5 + $0x60] sm:$0xff]   ;;  %v12130_v22 = vld [vmem:[%s14078_s5 + $0x68] sm:$0xff]   ;;  %s13743_s20 = scalar_lea.vmem [#allocation3], %s9375_s4 }
 0x426   : > { %11452 = vmatpush3.bf16.msra.mxu0 %v12121_v9  ;;  %11373 = vmatprep.subr.bf16.mxu1 %v12122_v0  ;;  %v12127_v20 = vld [vmem:[%s14078_s5 + $0x118] sm:$0xff]   ;;  %v12129_v21 = vld [vmem:[%s14078_s5 + $0x120] sm:$0xff]   ;;  %v12131_v26 = vld [vmem:[%s14078_s5 + $0x128] sm:$0xff]  }
 0x427   : > { %11453 = vmatprep.subr.bf16.mxu0 %v12123_v12  ;;  %v12132_v30 = vld [vmem:[%s14078_s5 + $0x70] sm:$0xff]   ;;  %v12134_v32 = vld [vmem:[%s14078_s5 + $0x78] sm:$0xff]   ;;  %v12137_v34 = vld [vmem:[%s14078_s5] sm:$0xff]  }
 0x428   : > { %v12133_v28 = vld [vmem:[%s14078_s5 + $0x130] sm:$0xff]   ;;  %v12135_v33 = vld [vmem:[%s14078_s5 + $0x138] sm:$0xff]   ;;  %v12139_v36 = vld [vmem:[%s14078_s5 + $0x140] sm:$0xff]  }
 0x429   : > { %11374 = vmatpush3.bf16.msra.mxu1 %v12122_v0  ;;  %v12136_v24 = vld [vmem:[%s13743_s20 + $0x4] sm:$0xff]   ;;  %v12138_v27 = vld [vmem:[%s13743_s20 + $0x1c] sm:$0xff]   ;;  %v12140_v38 = vld [vmem:[%s13743_s20 + $0xc] sm:$0xff]  }
 0x42a   : > { %11454 = vmatpush3.bf16.msra.mxu0 %v12123_v12  ;;  %11375 = vmatprep.subr.bf16.mxu1 %v12124_v13  ;;  %v12141_v39 = vld [vmem:[%s13743_s20 + $0x24] sm:$0xff]   ;;  %v12144_v44 = vld [vmem:[%s14078_s5 + $0x10] sm:$0xff]   ;;  %v12146_v8 = vld [vmem:[%s14078_s5 + $0x18] sm:$0xff]  }
 0x42b   : > { %11455 = vmatprep.subr.bf16.mxu0 %v12125_v15  ;;  %11387 = vmatprep.mubr.bf16.mxu1 %v12136_v24  ;;  %v12142_v40 = vld [vmem:[%s14078_s5 + $0x8] sm:$0xff]   ;;  %v12156_v45 = vld [vmem:[%s13743_s20] sm:$0xff]   ;;  %v12145_v46 = vld [vmem:[%s14078_s5 + $0x150] sm:$0xff]  }
 0x42c   : > { %11467 = vmatprep.mubr.bf16.mxu0 %v12138_v27  ;;  %v12143_v42 = vld [vmem:[%s14078_s5 + $0x148] sm:$0xff]   ;;  %v12158_v4 = vld [vmem:[%s13743_s20 + $0x20] sm:$0xff]   ;;  %v12147_v10 = vld [vmem:[%s14078_s5 + $0x158] sm:$0xff]  }
 0x42d   : > { %11376 = vmatpush3.bf16.msra.mxu1 %v12124_v13  ;;  %v12148_v14 = vld [vmem:[%s14078_s5 + $0x20] sm:$0xff]   ;;  %v12150_v19 = vld [vmem:[%s14078_s5 + $0x28] sm:$0xff]   ;;  %v12152_v25 = vld [vmem:[%s14078_s5 + $0x30] sm:$0xff]  }
 0x42e   : > { %11456 = vmatpush3.bf16.msra.mxu0 %v12125_v15  ;;  %11377 = vmatprep.subr.bf16.mxu1 %v12126_v17  ;;  %v12149_v16 = vld [vmem:[%s14078_s5 + $0x160] sm:$0xff]   ;;  %v12151_v23 = vld [vmem:[%s14078_s5 + $0x168] sm:$0xff]   ;;  %v12153_v29 = vld [vmem:[%s14078_s5 + $0x170] sm:$0xff]  }
 0x42f   : > { %11457 = vmatprep.subr.bf16.mxu0 %v12127_v20  ;;  %v12154_v31 = vld [vmem:[%s14078_s5 + $0x38] sm:$0xff]   ;;  %v12157_v37 = vld [vmem:[%s14078_s5 + $0x80] sm:$0xff]   ;;  %v12160_v43 = vld [vmem:[%s13743_s20 + $0x8] sm:$0xff]  }
 0x430   : > { %v12155_v35 = vld [vmem:[%s14078_s5 + $0x178] sm:$0xff]   ;;  %v12159_v41 = vld [vmem:[%s14078_s5 + $0x180] sm:$0xff]   ;;  %v12161_v47 = vld [vmem:[%s13743_s20 + $0x28] sm:$0xff]  }
 0x431   : > { %11378 = vmatpush3.bf16.msra.mxu1 %v12126_v17  ;;  %v12162_v48 = vld [vmem:[%s14078_s5 + $0x88] sm:$0xff]   ;;  %v12178_v51 = vld [vmem:[%s13743_s20 + $0x30] sm:$0xff]   ;;  %v12166_v54 = vld [vmem:[%s14078_s5 + $0x98] sm:$0xff]  }
 0x432   : > { %11458 = vmatpush3.bf16.msra.mxu0 %v12127_v20  ;;  %11379 = vmatprep.subr.bf16.mxu1 %v12128_v18  ;;  %v12163_v49 = vld [vmem:[%s14078_s5 + $0x188] sm:$0xff]   ;;  %v12164_v52 = vld [vmem:[%s14078_s5 + $0x90] sm:$0xff]   ;;  %v12167_v55 = vld [vmem:[%s14078_s5 + $0x198] sm:$0xff]  }
 0x433   : > { %11459 = vmatprep.subr.bf16.mxu0 %v12129_v21  ;;  %v12176_v50 = vld [vmem:[%s13743_s20 + $0x8] sm:$0xff]   ;;  %v12165_v53 = vld [vmem:[%s14078_s5 + $0x190] sm:$0xff]   ;;  %v12168_v56 = vld [vmem:[%s14078_s5 + $0xa0] sm:$0xff]  }
 0x434   : > { %v12169_v57 = vld [vmem:[%s14078_s5 + $0x1a0] sm:$0xff]   ;;  %v12170_v58 = vld [vmem:[%s14078_s5 + $0xa8] sm:$0xff]   ;;  %v12172_v60 = vld [vmem:[%s14078_s5 + $0xb0] sm:$0xff]  }
 0x435   : > { %11380 = vmatpush3.bf16.msra.mxu1 %v12128_v18  ;;  %v12171_v59 = vld [vmem:[%s14078_s5 + $0x1a8] sm:$0xff]   ;;  %v12173_v61 = vld [vmem:[%s14078_s5 + $0x1b0] sm:$0xff]   ;;  %v12174_v62 = vld [vmem:[%s14078_s5 + $0xb8] sm:$0xff]  }
 0x436   : > { %11460 = vmatpush3.bf16.msra.mxu0 %v12129_v21  ;;  %11381 = vmatprep.subr.bf16.mxu1 %v12130_v22  ;;  %v12175_v63 = vld [vmem:[%s14078_s5 + $0x1b8] sm:$0xff]   ;;  %v12177_v2 = vld [vmem:[%s14078_s5 + $0xc0] sm:$0xff]   ;;  %v12180_v5 = vld [vmem:[%s13743_s20 + $0x10] sm:$0xff]  }
 0x437   : > { %11461 = vmatprep.subr.bf16.mxu0 %v12131_v26  ;;  %v12179_v3 = vld [vmem:[%s14078_s5 + $0x1c0] sm:$0xff]   ;;  %v12181_v11 = vld [vmem:[%s13743_s20 + $0x38] sm:$0xff]   ;;  %v12182_v9 = vld [vmem:[%s14078_s5 + $0xc8] sm:$0xff]  }
 0x438   : > { %v12183_v0 = vld [vmem:[%s14078_s5 + $0x1c8] sm:$0xff]   ;;  %v12196_v12 = vld [vmem:[%s13743_s20 + $0x18] sm:$0xff]   ;;  %v12184_v15 = vld [vmem:[%s14078_s5 + $0xd0] sm:$0xff]  }
 0x439   : > { %11382 = vmatpush3.bf16.msra.mxu1 %v12130_v22  ;;  %v12198_v13 = vld [vmem:[%s13743_s20 + $0x34] sm:$0xff]   ;;  %v12188_v21 = vld [vmem:[%s14078_s5 + $0xe0] sm:$0xff]   ;;  %v12190_v24 = vld [vmem:[%s14078_s5 + $0xe8] sm:$0xff]  }
 0x43a   : > { %11462 = vmatpush3.bf16.msra.mxu0 %v12131_v26  ;;  %11383 = vmatprep.subr.bf16.mxu1 %v12132_v30  ;;  %v12185_v17 = vld [vmem:[%s14078_s5 + $0x1d0] sm:$0xff]   ;;  %v12186_v20 = vld [vmem:[%s14078_s5 + $0xd8] sm:$0xff]   ;;  %v12189_v22 = vld [vmem:[%s14078_s5 + $0x1e0] sm:$0xff]  }
 0x43b   : > { %11463 = vmatprep.subr.bf16.mxu0 %v12133_v28  ;;  %v12187_v18 = vld [vmem:[%s14078_s5 + $0x1d8] sm:$0xff]   ;;  %v12191_v26 = vld [vmem:[%s14078_s5 + $0x1e8] sm:$0xff]   ;;  %v12192_v27 = vld [vmem:[%s14078_s5 + $0xf0] sm:$0xff]  }
 0x43d   : > { %11384 = vmatpush3.bf16.msra.mxu1 %v12132_v30  ;;  %v12193_v30 = vld [vmem:[%s14078_s5 + $0x1f0] sm:$0xff]  }
 0x43e   : > { %11464 = vmatpush3.bf16.msra.mxu0 %v12133_v28  ;;  %11385 = vmatprep.subr.bf16.mxu1 %v12134_v32  ;;  %v12194_v28 = vld [vmem:[%s14078_s5 + $0xf8] sm:$0xff]  }
 0x43f   : > { %11465 = vmatprep.subr.bf16.mxu0 %v12135_v33 }
 0x441   : > { %11386 = vmatpush3.bf16.msra.mxu1 %v12134_v32  ;;  %v12195_v32 = vld [vmem:[%s14078_s5 + $0x1f8] sm:$0xff]  }
 0x442   : > { %11466 = vmatpush3.bf16.msra.mxu0 %v12135_v33  ;;  %11391 = vmatprep.subr.bf16.mxu1 %v12137_v34  ;;  %v12199_v33 = vld [vmem:[%s14078_s5 + $0x200] sm:$0xff]  }
 0x443   : > { %11471 = vmatprep.subr.bf16.mxu0 %v12139_v36 }
 0x444   : > { %11388 = vmatmul.mubr.bf16.vlgmr.msra.gmra.mrb[0].mxu1 %v12140_v38  ;;  %v12208_v38 = vld [vmem:[%s13743_s20 + $0x38] sm:$0xff]  }
 0x445   : > { %11392 = vmatpush3.bf16.msra.mxu1 %v12137_v34  ;;  %11468 = vmatmul.mubr.bf16.vlgmr.msra.gmra.mrb[0].mxu0 %v12141_v39  ;;  %v12197_v34 = vld [vmem:[%s13743_s20 + $0x20] sm:$0xff]   ;;  %v12201_v39 = vld [vmem:[%s14078_s5 + $0x208] sm:$0xff]  }
 0x446   : > { %11472 = vmatpush3.bf16.msra.mxu0 %v12139_v36  ;;  %11393 = vmatprep.subr.bf16.mxu1 %v12142_v40  ;;  %v12200_v36 = vld [vmem:[%s13743_s20 + $0x3c] sm:$0xff]  }
 0x447   : > { %11473 = vmatprep.subr.bf16.mxu0 %v12143_v42  ;;  %11407 = vmatprep.mubr.bf16.mxu1 %v12156_v45  ;;  %v12205_v45 = vld [vmem:[%s14078_s5 + $0x228] sm:$0xff]  }
 0x448   : > { %11487 = vmatprep.mubr.bf16.mxu0 %v12158_v4  ;;  %v12207_v4 = vld [vmem:[%s14078_s5 + $0x238] sm:$0xff]  }
 0x449   : > { %11394 = vmatpush3.bf16.msra.mxu1 %v12142_v40  ;;  %v12202_v40 = vld [vmem:[%s14078_s5 + $0x210] sm:$0xff]  }
 0x44a   : > { %11474 = vmatpush3.bf16.msra.mxu0 %v12143_v42  ;;  %11395 = vmatprep.subr.bf16.mxu1 %v12144_v44  ;;  %v12203_v42 = vld [vmem:[%s14078_s5 + $0x218] sm:$0xff]  }
 0x44b   : > { %11475 = vmatprep.subr.bf16.mxu0 %v12145_v46 }
 0x44d   : > { %11396 = vmatpush3.bf16.msra.mxu1 %v12144_v44  ;;  %v12204_v44 = vld [vmem:[%s14078_s5 + $0x220] sm:$0xff]  }
 0x44e   : > { %11476 = vmatpush3.bf16.msra.mxu0 %v12145_v46  ;;  %11397 = vmatprep.subr.bf16.mxu1 %v12146_v8  ;;  %v12206_v46 = vld [vmem:[%s14078_s5 + $0x230] sm:$0xff]  }
 0x44f   : > { %11477 = vmatprep.subr.bf16.mxu0 %v12147_v10 }
 0x451   : > { %11398 = vmatpush3.bf16.msra.mxu1 %v12146_v8  ;;  %v12209_v8 = vld [vmem:[%s13743_s20 + $0x40] sm:$0xff]  }
 0x452   : > { %11478 = vmatpush3.bf16.msra.mxu0 %v12147_v10  ;;  %11399 = vmatprep.subr.bf16.mxu1 %v12148_v14 }
 0x453   : > { %11479 = vmatprep.subr.bf16.mxu0 %v12149_v16 }
 0x455   : > { %11400 = vmatpush3.bf16.msra.mxu1 %v12148_v14 }
 0x456   : > { %11480 = vmatpush3.bf16.msra.mxu0 %v12149_v16  ;;  %11401 = vmatprep.subr.bf16.mxu1 %v12150_v19 }
 0x457   : > { %11481 = vmatprep.subr.bf16.mxu0 %v12151_v23 }
 0x459   : > { %11402 = vmatpush3.bf16.msra.mxu1 %v12150_v19 }
 0x45a   : > { %11482 = vmatpush3.bf16.msra.mxu0 %v12151_v23  ;;  %11403 = vmatprep.subr.bf16.mxu1 %v12152_v25 }
 0x45b   : > { %11483 = vmatprep.subr.bf16.mxu0 %v12153_v29 }
 0x45d   : > { %11404 = vmatpush3.bf16.msra.mxu1 %v12152_v25 }
 0x45e   : > { %11484 = vmatpush3.bf16.msra.mxu0 %v12153_v29  ;;  %11405 = vmatprep.subr.bf16.mxu1 %v12154_v31 }
 0x45f   : > { %11485 = vmatprep.subr.bf16.mxu0 %v12155_v35 }
 0x461   : > { %11406 = vmatpush3.bf16.msra.mxu1 %v12154_v31 }
 0x462   : > { %11486 = vmatpush3.bf16.msra.mxu0 %v12155_v35  ;;  %11411 = vmatprep.subr.bf16.mxu1 %v12157_v37 }
 0x463   : > { %11491 = vmatprep.subr.bf16.mxu0 %v12159_v41 }
 0x464   : > { %11408 = vmatmul.mubr.bf16.vlgmr.msra.gmra.mrb[0].mxu1 %v12160_v43 }
 0x465   : > { %11412 = vmatpush3.bf16.msra.mxu1 %v12157_v37  ;;  %11488 = vmatmul.mubr.bf16.vlgmr.msra.gmra.mrb[0].mxu0 %v12161_v47 }
 0x466   : > { %11492 = vmatpush3.bf16.msra.mxu0 %v12159_v41  ;;  %11413 = vmatprep.subr.bf16.mxu1 %v12162_v48 }
 0x467   : > { %11493 = vmatprep.subr.bf16.mxu0 %v12163_v49  ;;  %11427 = vmatprep.mubr.bf16.mxu1 %v12176_v50 }
 0x468   : > { %11507 = vmatprep.mubr.bf16.mxu0 %v12178_v51 }
 0x469   : > { %11414 = vmatpush3.bf16.msra.mxu1 %v12162_v48 }
 0x46a   : > { %11494 = vmatpush3.bf16.msra.mxu0 %v12163_v49  ;;  %11415 = vmatprep.subr.bf16.mxu1 %v12164_v52 }
 0x46b   : > { %11495 = vmatprep.subr.bf16.mxu0 %v12165_v53 }
 0x46d   : > { %11416 = vmatpush3.bf16.msra.mxu1 %v12164_v52 }
 0x46e   : > { %11496 = vmatpush3.bf16.msra.mxu0 %v12165_v53  ;;  %11417 = vmatprep.subr.bf16.mxu1 %v12166_v54 }
 0x46f   : > { %11497 = vmatprep.subr.bf16.mxu0 %v12167_v55 }
 0x471   : > { %11418 = vmatpush3.bf16.msra.mxu1 %v12166_v54 }
 0x472   : > { %11498 = vmatpush3.bf16.msra.mxu0 %v12167_v55  ;;  %11419 = vmatprep.subr.bf16.mxu1 %v12168_v56 }
 0x473   : > { %11499 = vmatprep.subr.bf16.mxu0 %v12169_v57 }
 0x475   : > { %11420 = vmatpush3.bf16.msra.mxu1 %v12168_v56 }
 0x476   : > { %11500 = vmatpush3.bf16.msra.mxu0 %v12169_v57  ;;  %11421 = vmatprep.subr.bf16.mxu1 %v12170_v58 }
 0x477   : > { %11501 = vmatprep.subr.bf16.mxu0 %v12171_v59 }
 0x479   : > { %11422 = vmatpush3.bf16.msra.mxu1 %v12170_v58 }
 0x47a   : > { %11502 = vmatpush3.bf16.msra.mxu0 %v12171_v59  ;;  %11423 = vmatprep.subr.bf16.mxu1 %v12172_v60  ;;  %v12210_v59 = vld [vmem:[%s14080_s7 + $0x4] ss:$16 sps:$4 sm:$0xff] (%p6466_p2)  }
 0x47b   : > { %11503 = vmatprep.subr.bf16.mxu0 %v12173_v61 }
 0x47d   : > { %11424 = vmatpush3.bf16.msra.mxu1 %v12172_v60  ;;  %v12214_v60 = vld [vmem:[%s14080_s7] ss:$16 sps:$4 sm:$0xff] (%p6466_p2)  }
 0x47e   : > { %11504 = vmatpush3.bf16.msra.mxu0 %v12173_v61  ;;  %11425 = vmatprep.subr.bf16.mxu1 %v12174_v62  ;;  %v12216_v61 = vld [vmem:[%s14080_s7 + $0x24] ss:$16 sps:$4 sm:$0xff] (%p6466_p2)  }
 0x47f   : > { %11505 = vmatprep.subr.bf16.mxu0 %v12175_v63 }
 0x481   : > { %11426 = vmatpush3.bf16.msra.mxu1 %v12174_v62  ;;  %v12220_v62 = vld [vmem:[%s14080_s7 + $0x20] ss:$16 sps:$4 sm:$0xff] (%p6466_p2)  }
 0x482   : > { %11506 = vmatpush3.bf16.msra.mxu0 %v12175_v63  ;;  %11431 = vmatprep.subr.bf16.mxu1 %v12177_v2  ;;  %v12221_v63 = vld [vmem:[%s14080_s7 + $0x28] ss:$16 sps:$4 sm:$0xff] (%p6466_p2)  }
 0x483   : > { %11511 = vmatprep.subr.bf16.mxu0 %v12179_v3 }
 0x484   : > { %11428 = vmatmul.mubr.bf16.vlgmr.msra.gmra.mrb[0].mxu1 %v12180_v5  ;;  %v12226_v5 = vld [vmem:[%s14080_s7 + $0x40] ss:$16 sps:$4 sm:$0xff] (%p6466_p2)  }
 0x485   : > { %11432 = vmatpush3.bf16.msra.mxu1 %v12177_v2  ;;  %11508 = vmatmul.mubr.bf16.vlgmr.msra.gmra.mrb[0].mxu0 %v12181_v11  ;;  %v12222_v2 = vld [vmem:[%s14080_s7 + $0x44] ss:$16 sps:$4 sm:$0xff] (%p6466_p2)   ;;  %v12227_v11 = vld [vmem:[%s14080_s7 + $0x48] ss:$16 sps:$4 sm:$0xff] (%p6466_p2)  }
 0x486   : > { %11512 = vmatpush3.bf16.msra.mxu0 %v12179_v3  ;;  %11433 = vmatprep.subr.bf16.mxu1 %v12182_v9  ;;  %v12224_v3 = vld [vmem:[%s14080_s7 + $0x4c] ss:$16 sps:$4 sm:$0xff] (%p6466_p2)  }
 0x487   : > { %11513 = vmatprep.subr.bf16.mxu0 %v12183_v0  ;;  %11447 = vmatprep.mubr.bf16.mxu1 %v12196_v12  ;;  %v12232_v12 = vld [vmem:[%s14080_s7 + $0x60] ss:$16 sps:$4 sm:$0xff] (%p6466_p2)  }
 0x488   : > { %11527 = vmatprep.mubr.bf16.mxu0 %v12198_v13  ;;  %v12233_v13 = vld [vmem:[%s14080_s7 + $0x68] ss:$16 sps:$4 sm:$0xff] (%p6466_p2)  }
 0x489   : > { %11434 = vmatpush3.bf16.msra.mxu1 %v12182_v9  ;;  %v12228_v9 = vld [vmem:[%s14080_s7 + $0x64] ss:$16 sps:$4 sm:$0xff] (%p6466_p2)  }
 0x48a   : > { %11514 = vmatpush3.bf16.msra.mxu0 %v12183_v0  ;;  %11435 = vmatprep.subr.bf16.mxu1 %v12184_v15  ;;  %v12230_v0 = vld [vmem:[%s14080_s7 + $0x6c] ss:$16 sps:$4 sm:$0xff] (%p6466_p2)  }
 0x48b   : > { %11515 = vmatprep.subr.bf16.mxu0 %v12185_v17 }
 0x48d   : > { %11436 = vmatpush3.bf16.msra.mxu1 %v12184_v15  ;;  %v12234_v15 = vld [vmem:[%s14080_s7 + $0x84] ss:$16 sps:$4 sm:$0xff] (%p6466_p2)  }
 0x48e   : > { %11516 = vmatpush3.bf16.msra.mxu0 %v12185_v17  ;;  %11437 = vmatprep.subr.bf16.mxu1 %v12186_v20  ;;  %v12236_v17 = vld [vmem:[%s14080_s7 + $0x8c] ss:$16 sps:$4 sm:$0xff] (%p6466_p2)  }
 0x48f   : > { %11517 = vmatprep.subr.bf16.mxu0 %v12187_v18 }
 0x491   : > { %11438 = vmatpush3.bf16.msra.mxu1 %v12186_v20  ;;  %v12238_v20 = vld [vmem:[%s14080_s7 + $0x80] ss:$16 sps:$4 sm:$0xff] (%p6466_p2)  }
 0x492   : > { %11518 = vmatpush3.bf16.msra.mxu0 %v12187_v18  ;;  %11439 = vmatprep.subr.bf16.mxu1 %v12188_v21  ;;  %v12239_v18 = vld [vmem:[%s14080_s7 + $0x88] ss:$16 sps:$4 sm:$0xff] (%p6466_p2)  }
 0x493   : > { %11519 = vmatprep.subr.bf16.mxu0 %v12189_v22 }
 0x495   : > { %11440 = vmatpush3.bf16.msra.mxu1 %v12188_v21  ;;  %v12240_v21 = vld [vmem:[%s14080_s7 + $0xa4] ss:$16 sps:$4 sm:$0xff] (%p6466_p2)  }
 0x496   : > { %11520 = vmatpush3.bf16.msra.mxu0 %v12189_v22  ;;  %11441 = vmatprep.subr.bf16.mxu1 %v12190_v24  ;;  %v12242_v22 = vld [vmem:[%s14080_s7 + $0xac] ss:$16 sps:$4 sm:$0xff] (%p6466_p2)  }
 0x497   : > { %11521 = vmatprep.subr.bf16.mxu0 %v12191_v26 }
 0x499   : > { %11442 = vmatpush3.bf16.msra.mxu1 %v12190_v24  ;;  %v12244_v24 = vld [vmem:[%s14080_s7 + $0xa0] ss:$16 sps:$4 sm:$0xff] (%p6466_p2)  }
 0x49a   : > { %11522 = vmatpush3.bf16.msra.mxu0 %v12191_v26  ;;  %11443 = vmatprep.subr.bf16.mxu1 %v12192_v27  ;;  %v12245_v26 = vld [vmem:[%s14080_s7 + $0xa8] ss:$16 sps:$4 sm:$0xff] (%p6466_p2)  }
 0x49b   : > { %11523 = vmatprep.subr.bf16.mxu0 %v12193_v30 }
 0x49d   : > { %11444 = vmatpush3.bf16.msra.mxu1 %v12192_v27  ;;  %v12246_v27 = vld [vmem:[%s14080_s7 + $0xc4] ss:$16 sps:$4 sm:$0xff] (%p6466_p2)  }
 0x49e   : > { %11524 = vmatpush3.bf16.msra.mxu0 %v12193_v30  ;;  %11445 = vmatprep.subr.bf16.mxu1 %v12194_v28  ;;  %v12248_v30 = vld [vmem:[%s14080_s7 + $0xcc] ss:$16 sps:$4 sm:$0xff] (%p6466_p2)  }
 0x49f   : > { %11525 = vmatprep.subr.bf16.mxu0 %v12195_v32 }
 0x4a1   : > { %11446 = vmatpush3.bf16.msra.mxu1 %v12194_v28  ;;  %v12250_v28 = vld [vmem:[%s14080_s7 + $0xc0] ss:$16 sps:$4 sm:$0xff] (%p6466_p2)  }
 0x4a2   : > { %11526 = vmatpush3.bf16.msra.mxu0 %v12195_v32  ;;  %v12251_v32 = vld [vmem:[%s14080_s7 + $0xc8] ss:$16 sps:$4 sm:$0xff] (%p6466_p2)  }
 0x4a3   : > { %11531 = vmatprep.subr.bf16.mxu0 %v12199_v33 }
 0x4a4   : > { %11448 = vmatmul.mubr.bf16.vlgmr.msra.gmra.mrb[0].mxu1 %v12197_v34  ;;  %v12254_v34 = vld [vmem:[%s14080_s7 + $0xec] ss:$16 sps:$4 sm:$0xff] (%p6466_p2)  }
 0x4a5   : > { %11528 = vmatmul.mubr.bf16.vlgmr.msra.gmra.mrb[0].mxu0 %v12200_v36  ;;  %8004 = vmatprep.mubr.bf16.mxu1 (%p6466_p2), %v12290_v1 }
 0x4a6   : > { %11532 = vmatpush3.bf16.msra.mxu0 %v12199_v33  ;;  %11547 = vmatprep.mubr.bf16.mxu0 %v12208_v38  ;;  %v12252_v33 = vld [vmem:[%s14080_s7 + $0xe4] ss:$16 sps:$4 sm:$0xff] (%p6466_p2)   ;;  %v12256_v38 = vld [vmem:[%s14080_s7 + $0xe0] ss:$16 sps:$4 sm:$0xff] (%p6466_p2)  }
 0x4a7   : > { %11533 = vmatprep.subr.bf16.mxu0 %v12201_v39 }
 0x4aa   : > { %11534 = vmatpush3.bf16.msra.mxu0 %v12201_v39  ;;  %v12257_v39 = vld [vmem:[%s14080_s7 + $0xe8] ss:$16 sps:$4 sm:$0xff] (%p6466_p2)  }
 0x4ab   : > { %11535 = vmatprep.subr.bf16.mxu0 %v12202_v40 }
 0x4ae   : > { %11536 = vmatpush3.bf16.msra.mxu0 %v12202_v40 }
 0x4af   : > { %11537 = vmatprep.subr.bf16.mxu0 %v12203_v42 }
 0x4b2   : > { %11538 = vmatpush3.bf16.msra.mxu0 %v12203_v42  ;;  %v7751_v42 = vlaneseq (%p6466_p2) }
 0x4b3   : > { %11539 = vmatprep.subr.bf16.mxu0 %v12204_v44 }
 0x4b6   : > { %11540 = vmatpush3.bf16.msra.mxu0 %v12204_v44  ;;  %v7752_v44 = vshrl.u32 (%p6466_p2), %v7751_v42, 7 }
 0x4b7   : > { %11541 = vmatprep.subr.bf16.mxu0 %v12205_v45 }
 0x4ba   : > { %11542 = vmatpush3.bf16.msra.mxu0 %v12205_v45  ;;  %v7753_v45 = vsub.s32 (%p6466_p2), 0, %v7752_v44 }
 0x4bb   : > { %11543 = vmatprep.subr.bf16.mxu0 %v12206_v46 }
 0x4be   : > { %11544 = vmatpush3.bf16.msra.mxu0 %v12206_v46  ;;  %v7761_v46 = vsub.s32 (%p6466_p2), 2, %v7752_v44 }
 0x4bf   : > { %11545 = vmatprep.subr.bf16.mxu0 %v12207_v4 }
 0x4c2   : > { %11546 = vmatpush3.bf16.msra.mxu0 %v12207_v4  ;;  %v7749_v4 = vld [vmem:[%s14081_s8] sm:$0xf] (%p6466_p2) }
 0x4c3   :  { %7931 = vmatprep.subr.bf16.mxu0 (%p6466_p2), %v12210_v59 }
 0x4c5   : > { %11548 = vmatmul.mubr.bf16.vlgmr.msra.gmra.mrb[0].mxu0 %v12209_v8  ;;  %v7757_v8 = vsub.s32 (%p6466_p2), 1, %v7752_v44 }
 0x4c6   :  { %7963 = vmatprep.mubr.bf16.mxu0 (%p6466_p2), %v12290_v1  ;;  %7932 = vmatpush1.bf16.msra.mxu0 (%p6466_p2), %v12214_v60  ;;  %v12218_v1 = vld [vmem:[%s14080_s7 + $0x2c] ss:$16 sps:$4 sm:$0xff] (%p6466_p2)  }
 0x4c7   :  { %7933 = vmatprep.subr.bf16.mxu0 (%p6466_p2), %v12216_v61 }
 0x4ca   :  { %7934 = vmatpush1.bf16.msra.mxu0 (%p6466_p2), %v12220_v62 }
 0x4cb   :  { %7935 = vmatprep.subr.bf16.mxu0 (%p6466_p2), %v12222_v2 }
 0x4ce   :  { %7936 = vmatpush1.bf16.msra.mxu0 (%p6466_p2), %v12226_v5 }
 0x4cf   :  { %7937 = vmatprep.subr.bf16.mxu0 (%p6466_p2), %v12228_v9 }
 0x4d2   :  { %7938 = vmatpush1.bf16.msra.mxu0 (%p6466_p2), %v12232_v12 }
 0x4d3   :  { %7939 = vmatprep.subr.bf16.mxu0 (%p6466_p2), %v12234_v15 }
 0x4d6   :  { %7940 = vmatpush1.bf16.msra.mxu0 (%p6466_p2), %v12238_v20 }
 0x4d7   :  { %7941 = vmatprep.subr.bf16.mxu0 (%p6466_p2), %v12240_v21 }
 0x4da   :  { %7942 = vmatpush1.bf16.msra.mxu0 (%p6466_p2), %v12244_v24 }
 0x4db   :  { %7943 = vmatprep.subr.bf16.mxu0 (%p6466_p2), %v12246_v27 }
 0x4de   :  { %7944 = vmatpush1.bf16.msra.mxu0 (%p6466_p2), %v12250_v28 }
 0x4df   :  { %7945 = vmatprep.subr.bf16.mxu0 (%p6466_p2), %v12252_v33 }
 0x4e2   :  { %7946 = vmatpush1.bf16.msra.mxu0 (%p6466_p2), %v12256_v38 }
 0x577   : > { %v11449_v10 = vpop.f32.mrb[0].mxu1 }
 0x578   : > { %v6992_v14 = vpop.f32.mrb[1].mxu1 }
 0x579   : > { %v11450_v16 = vpop.f32.mrb[2].mxu1 }
 0x57a   : > { %v6995_v19 = vpop.f32.mrb[3].mxu1 }
 0x598   : > { %v11549_v23 = vpop.f32.mrb[0].mxu0 }
 0x599   : > { %v11935_v25 = vadd.f32 %v11549_v23, %v11449_v10  ;;  %v7678_v29 = vpop.f32.mrb[1].mxu0  ;;  %v7765_v10 = vsub.s32 (%p6466_p2), 3, %v7752_v44 }
 0x59a   : > { %v11936_v31 = vadd.f32 %v7678_v29, %v6992_v14  ;;  %v11550_v35 = vpop.f32.mrb[2].mxu0  ;;  %v7754_v14 = vrot.slane (%p6466_p2), %v7749_v4, %v7753_v45 }
 0x59b   : > { %v11937_v37 = vadd.f32 %v11550_v35, %v11450_v16  ;;  %v7681_v41 = vpop.f32.mrb[3].mxu0  ;;  %v7705_v48 = vadd.f32 %v11935_v25, %v13697_v6  ;;  %v7762_v16 = vrot.slane (%p6466_p2), %v7749_v4, %v7761_v46  ;;  %v7766_v23 = vrot.slane (%p6466_p2), %v7749_v4, %v7765_v10 }
 0x59c   : > { %v7703_v43 = vadd.f32 %v11936_v31, %v13697_v6  ;;  %v11938_v47 = vadd.f32 %v7681_v41, %v6995_v19  ;;  %v7758_v19 = vrot.slane (%p6466_p2), %v7749_v4, %v7757_v8 }
 0x59d   : > { %v7706_v51 = vadd.f32 %v11937_v37, %v13697_v6  ;;  %v7709_v53 = vmax.f32 %v7705_v48, 0.0 }
 0x59e   : > { %v7704_v49 = vadd.f32 %v11938_v47, %v13697_v6  ;;  %v7707_v50 = vmax.f32 %v7703_v43, 0.0  ;;  %v12215_v6 = vld [vmem:[%s14080_s7 + $0x8] ss:$16 sps:$4 sm:$0xff] (%p6466_p2)  }
 0x59f   : > { %v7710_v55 = vmax.f32 %v7706_v51, 0.0 }
 0x5a0   : > { %v7708_v52 = vmax.f32 %v7704_v49, 0.0 }
 0x5a2   : > { %v7711_v54 = vadd.f32 %v7708_v52, %v7707_v50 }
 0x5a4   : > { %v7712_v56 = vadd.f32 %v7711_v54, %v7709_v53 }
 0x5a5   :  { %6468 = sbr.rel (!%p6466_p2) target bundleno = 1059 (0x423), region = 162 }
 0x5a6   : > { %v7713_v57 = vadd.f32 %v7712_v56, %v7710_v55 }
 0x5a8   : > { %v13951_v7 = vadd.f32 %v12284_v7, %v7713_v57  }
 0x5aa   : > { %v14083_v58 = vmov %v13951_v7 }
 0x5ab   : > { %v14084_v7 = vmov %v14083_v58  ;;  %v7715_v36 = vmul.f32 (%p6466_p2), 0.0625, %v14083_v58 }
 0x5ac   :  { %v12212_v7 = vld [vmem:[%s14080_s7 + $0xc] ss:$16 sps:$4 sm:$0xff]  }
 0x5ad   :  { %7972 = vmatprep.subr.bf16.mxu1 %v12212_v7  ;;  %v7716_v40 = vpack.c.bf16 %v7715_v36, %v7715_v36 }
 0x5ae   :  { %7973 = vmatpush1.bf16.msra.mxu1 %v12215_v6 }
 0x5af   :  { %7974 = vmatprep.subr.bf16.mxu1 %v12218_v1  ;;  %7964 = vmatmul.mubr.bf16.vlgmr.msra.gmra.mrb[0].mxu0 %v7716_v40 }
 0x5b2   :  { %7975 = vmatpush1.bf16.msra.mxu1 %v12221_v63 }
 0x5b3   :  { %7976 = vmatprep.subr.bf16.mxu1 %v12224_v3 }
 0x5b6   :  { %7977 = vmatpush1.bf16.msra.mxu1 %v12227_v11 }
 0x5b7   :  { %7978 = vmatprep.subr.bf16.mxu1 %v12230_v0 }
 0x5ba   :  { %7979 = vmatpush1.bf16.msra.mxu1 %v12233_v13 }
 0x5bb   :  { %7980 = vmatprep.subr.bf16.mxu1 %v12236_v17 }
 0x5be   :  { %7981 = vmatpush1.bf16.msra.mxu1 %v12239_v18 }
 0x5bf   :  { %7982 = vmatprep.subr.bf16.mxu1 %v12242_v22 }
 0x5c2   :  { %7983 = vmatpush1.bf16.msra.mxu1 %v12245_v26 }
 0x5c3   :  { %7984 = vmatprep.subr.bf16.mxu1 %v12248_v30 }
 0x5c6   :  { %7985 = vmatpush1.bf16.msra.mxu1 %v12251_v32 }
 0x5c7   :  { %7986 = vmatprep.subr.bf16.mxu1 %v12254_v34 }
 0x5ca   :  { %7987 = vmatpush1.bf16.msra.mxu1 %v12257_v39 }
 0x5cd   :  { %8005 = vmatmul.mubr.bf16.vlgmr.msra.gmra.mrb[0].mxu1 %v7716_v40 }
 0x682   :  { %v7965_v25 = vpop.f32.mrb[0].mxu0 }
 0x683   :  { %v7966_v31 = vadd.f32 %v7965_v25, %v7754_v14  ;;  %v7967_v37 = vpop.f32.mrb[1].mxu0 }
 0x684   :  { %v7968_v43 = vadd.f32 %v7967_v37, %v7758_v19  ;;  %v7969_v48 = vpop.f32.mrb[2].mxu0 }
 0x685   :  { %8013 = vst [vmem:[%s14082_s9] sm:$0xff] %v7966_v31  ;;  %v7970_v50 = vpop.f32.mrb[3].mxu0 }
 0x686   :  { %8014 = vst [vmem:[%s14082_s9 + $0x8] sm:$0xff] %v7968_v43 }
 0x6a0   :  { %v8006_v29 = vpop.f32.mrb[0].mxu1 }
 0x6a1   :  { %v8007_v35 = vadd.f32 %v8006_v29, %v7762_v16  ;;  %v8008_v41 = vpop.f32.mrb[1].mxu1 }
 0x6a2   :  { %v8009_v47 = vadd.f32 %v8008_v41, %v7766_v23  ;;  %v8010_v49 = vpop.f32.mrb[2].mxu1 }
 0x6a3   :  { %8015 = vst [vmem:[%s14082_s9 + $0x10] sm:$0xff] %v8007_v35  ;;  %v8011_v51 = vpop.f32.mrb[3].mxu1 }
 0x6a4   :  { %8016 = vst [vmem:[%s14082_s9 + $0x18] sm:$0xff] %v8009_v47 }

</bundles_post_ra>
